<compile_context>
chip_gen: v7x
topology: tpu7x:2x2x1
jax: 0.10.0
libtpu: 0.0.40
codegen_flags: <defaults>
</compile_context>

<pallas_src>
import functools

import jax
import jax.numpy as jnp
from jax.experimental import pallas as pl
from jax.experimental.pallas import tpu as pltpu


# ----------------------------------------------------------------------------
# Pallas kernel: B images per grid step.
# ----------------------------------------------------------------------------
def _spatial_attention_kernel(w_ref,       # SMEM (2*K*K,) conv weight, (c,ky,kx) flat
                              x_ref,       # VMEM (B, C, H*W)  native dtype, lane-dense
                              o_ref,       # VMEM (B, 1, H*W)  lane-dense output
                              pad_ref,     # VMEM (2, Hp, Wp) f32  zero-padded [avg ; max]
                              red_ref,     # VMEM (2, H*W)    f32  flat reduced planes
                              cols_ref,    # VMEM (2*K, Hp, W) f32 kx-shifted column planes
                              y2d_ref,     # VMEM (H, W)      f32  sigmoid(conv) bridge
                              *, B, C, H, W, K):
    p = (K - 1) // 2

    # Zero the padded scratch ONCE; its border is never overwritten, and the
    # interior is fully rewritten for every image below.
    @pl.when(pl.program_id(0) == 0)
    def _():
        pad_ref[...] = jnp.zeros_like(pad_ref)

    for b in range(B):                                  # static unroll over images
        # ---- single-pass channel mean / max on the lane-dense (HW,) view ----
        x0 = x_ref[b, 0, :].astype(jnp.float32)
        s = x0
        m = x0
        for c in range(1, C):
            xc = x_ref[b, c, :].astype(jnp.float32)
            s = s + xc
            m = jnp.maximum(m, xc)
        red_ref[0, :] = s * (1.0 / C)                   # channel mean
        red_ref[1, :] = m                               # channel max

        # ---- scatter the two reduced planes into the zero-padded 2-D map ----
        for c2 in range(2):
            for r in range(H):
                pad_ref[c2, p + r, p:p + W] = red_ref[c2, r * W:(r + 1) * W]

        # ---- hoist the kx lane shifts: 2*K pre-shifted column planes --------
        for c2 in range(2):
            for kx in range(K):
                cols_ref[c2 * K + kx] = pad_ref[c2, :, kx:kx + W]

        # ---- 2*K*K conv taps: SMEM scalar x VMEM plane, 4 accumulators ------
        accs = [jnp.zeros((H, W), jnp.float32) for _ in range(4)]
        t = 0
        for c2 in range(2):
            for kx in range(K):
                plane = c2 * K + kx
                for ky in range(K):
                    w_tap = w_ref[(c2 * K + ky) * K + kx]
                    accs[t % 4] = accs[t % 4] + w_tap * cols_ref[plane, ky:ky + H, :]
                    t += 1
        acc = (accs[0] + accs[1]) + (accs[2] + accs[3])

        # ---- sigmoid: exp on the EUP, approximate reciprocal on the EUP -----
        y2d_ref[...] = pl.reciprocal(1.0 + jnp.exp(-acc), approx=True)

        # ---- lane-dense output rows ------------------------------------------
        for r in range(H):
            o_ref[b, 0, r * W:(r + 1) * W] = y2d_ref[r, :].astype(o_ref.dtype)


def _pick_batch_block(N, C, HW, itemsize):
    """Images per grid step: a few MiB double-buffered, >=2 grid steps, divides N."""
    per_image = max(1, C * HW * itemsize)
    bmax = max(1, (2 * 1024 * 1024) // per_image)       # ~4 MiB once double-buffered
    if N >= 2:
        bmax = min(bmax, N // 2)                         # keep both v7x TCs busy
    bmax = max(1, min(bmax, N))
    best = 1
    for d in range(1, int(bmax) + 1):                    # largest divisor of N <= bmax
        if N % d == 0:
            best = d
    return best


# ----------------------------------------------------------------------------
# Wrapper
# ----------------------------------------------------------------------------
def spatial_attention_pallas(x, weight, kernel_size=7):
    """x: (N, C, H, W); weight: (1, 2, K, K)  ->  (N, 1, H, W), dtype of x."""
    N, C, H, W = x.shape
    K = kernel_size
    assert K in (3, 7), "kernel size must be 3 or 7"
    p = (K - 1) // 2
    Hp, Wp = H + 2 * p, W + 2 * p
    HW = H * W

    x_flat = x.reshape(N, C, HW)                         # free layout plumbing
    w_flat = weight.astype(jnp.float32).reshape(-1)      # (2*K*K,) -> SMEM

    B = _pick_batch_block(N, C, HW, x.dtype.itemsize)
    grid = (N // B,)
    out_dtype = x.dtype

    # VMEM budget: double-buffered in/out blocks + scratch, generous slack.
    in_block = B * C * HW * x.dtype.itemsize
    out_block = B * HW * jnp.dtype(out_dtype).itemsize
    scratch = 4 * (2 * Hp * Wp + 2 * HW + 2 * K * Hp * W + H * W)
    vmem_needed = 2 * (in_block + out_block) + scratch
    vmem_limit = int(min(96 * 2**20, max(32 * 2**20, 4 * vmem_needed)))

    cost = pl.CostEstimate(
        flops=3 * N * C * HW + 2 * (2 * K * K) * N * HW,
        transcendentals=2 * N * HW,
        bytes_accessed=(N * C * HW * x.dtype.itemsize
                        + N * HW * jnp.dtype(out_dtype).itemsize
                        + 2 * K * K * 4),
    )

    kernel = functools.partial(_spatial_attention_kernel, B=B, C=C, H=H, W=W, K=K)

    out_flat = pl.pallas_call(
        kernel,
        out_shape=jax.ShapeDtypeStruct((N, 1, HW), out_dtype),
        grid=grid,
        in_specs=[
            pl.BlockSpec(memory_space=pltpu.MemorySpace.SMEM),       # conv weights
            pl.BlockSpec((B, C, HW), lambda g: (g, 0, 0)),           # x, lane-dense
        ],
        out_specs=pl.BlockSpec((B, 1, HW), lambda g: (g, 0, 0)),
        scratch_shapes=[
            pltpu.VMEM((2, Hp, Wp), jnp.float32),        # zero-padded [avg ; max]
            pltpu.VMEM((2, HW), jnp.float32),            # flat reduced planes
            pltpu.VMEM((2 * K, Hp, W), jnp.float32),     # kx-shifted column planes
            pltpu.VMEM((H, W), jnp.float32),             # sigmoid(conv) bridge
        ],
        compiler_params=pltpu.CompilerParams(
            dimension_semantics=("parallel",),
            vmem_limit_bytes=vmem_limit),
        cost_estimate=cost,
    )(w_flat, x_flat)

    return out_flat.reshape(N, 1, H, W)


# Pure-JAX reference (mirrors the PyTorch module) for a correctness check.
def spatial_attention_reference(x, weight):
    avg = jnp.mean(x, axis=1, keepdims=True)
    mx = jnp.max(x, axis=1, keepdims=True)
    cat = jnp.concatenate([avg, mx], axis=1)
    K = weight.shape[-1]
    p = (K - 1) // 2
    y = jax.lax.conv_general_dilated(
        cat, weight, window_strides=(1, 1), padding=((p, p), (p, p)),
        dimension_numbers=("NCHW", "OIHW", "NCHW"))
    return jax.nn.sigmoid(y)


# ----------------------------------------------------------------------------
if __name__ == "__main__":
    N, C, H, W = 2, 4, 16, 16
    K = 7  # kernel_size in (3, 7); padding = 3 for 7

    key = jax.random.PRNGKey(0)
    k_x, k_w = jax.random.split(key)
    x = jax.random.normal(k_x, (N, C, H, W), jnp.float32)

    # Conv2d(2, 1, 7, bias=False) weight, deterministic init.
    fan_in = 2 * K * K
    bound = 1.0 / (fan_in ** 0.5)
    weight = jax.random.uniform(k_w, (1, 2, K, K), jnp.float32,
                                minval=-bound, maxval=bound)

    fwd = jax.jit(spatial_attention_pallas, static_argnums=2)
    out = jax.block_until_ready(fwd(x, weight, K))

    assert out.shape == (N, 1, H, W), out.shape
    assert bool(jnp.all(jnp.isfinite(out)))

    ref = spatial_attention_reference(x, weight)
    max_err = float(jnp.max(jnp.abs(out - ref)))
    # Tolerance loosened slightly: the sigmoid denominator uses the EUP's
    # approximate reciprocal (pl.reciprocal(..., approx=True)).
    assert bool(jnp.allclose(out, ref, atol=5e-3, rtol=1e-3)), max_err

    print("KERNEL_OK")
</pallas_src>

<mosaic_0001>
module attributes {stable_mosaic.version = 11 : i64} {
  func.func @_spatial_attention_kernel(%arg0: i32, %arg1: memref<98xf32, #tpu.memory_space<smem>>, %arg2: memref<1x4x256xf32, #tpu.memory_space<vmem>>, %arg3: memref<1x1x256xf32, #tpu.memory_space<vmem>>, %arg4: memref<2x22x22xf32, #tpu.memory_space<vmem>>, %arg5: memref<2x256xf32, #tpu.memory_space<vmem>>, %arg6: memref<14x22x16xf32, #tpu.memory_space<vmem>>, %arg7: memref<16x16xf32, #tpu.memory_space<vmem>>) attributes {dimension_semantics = [#tpu.dimension_semantics<parallel>], iteration_bounds = array<i64: 2>, scalar_prefetch = 0 : i64, scratch_operands = 4 : i64, tpu.core_type = #tpu.core_type<tc>, window_params = [{transform_indices = @transform_0, window_bounds = array<i64: 98>}, {transform_indices = @transform_1, window_bounds = array<i64: 1, 4, 256>}, {transform_indices = @transform_2, window_bounds = array<i64: 1, 1, 256>}]} {
    %c0_i32 = arith.constant 0 : i32
    %0 = arith.cmpi eq, %arg0, %c0_i32 : i32
    %1 = arith.extui %0 : i1 to i32
    %c0_i32_0 = arith.constant 0 : i32
    %2 = arith.cmpi ne, %1, %c0_i32_0 : i32
    scf.if %2 {
      %cst_634 = arith.constant 0.000000e+00 : f32
      %937 = vector.broadcast %cst_634 : f32 to vector<2x22x22xf32>
      %c0_635 = arith.constant 0 : index
      %c0_636 = arith.constant 0 : index
      %c0_637 = arith.constant 0 : index
      %938 = vector.load %arg4[%c0_635, %c0_636, %c0_637] : memref<2x22x22xf32, #tpu.memory_space<vmem>>, vector<2x22x22xf32>
      tpu.vector_store %arg4[%c0_635, %c0_636, %c0_637], %937 {strides = array<i32>} : memref<2x22x22xf32, #tpu.memory_space<vmem>>, vector<2x22x22xf32>,
    } else {
    }
    %c0 = arith.constant 0 : index
    %c0_1 = arith.constant 0 : index
    %c0_2 = arith.constant 0 : index
    %3 = vector.load %arg2[%c0, %c0_1, %c0_2] : memref<1x4x256xf32, #tpu.memory_space<vmem>>, vector<1x1x256xf32>
    %4 = vector.shape_cast %3 : vector<1x1x256xf32> to vector<256xf32>
    %c0_3 = arith.constant 0 : index
    %c1 = arith.constant 1 : index
    %c0_4 = arith.constant 0 : index
    %5 = vector.load %arg2[%c0_3, %c1, %c0_4] : memref<1x4x256xf32, #tpu.memory_space<vmem>>, vector<1x1x256xf32>
    %6 = vector.shape_cast %5 : vector<1x1x256xf32> to vector<256xf32>
    %7 = arith.addf %4, %6 : vector<256xf32>
    %8 = arith.maximumf %4, %6 : vector<256xf32>
    %c0_5 = arith.constant 0 : index
    %c2 = arith.constant 2 : index
    %c0_6 = arith.constant 0 : index
    %9 = vector.load %arg2[%c0_5, %c2, %c0_6] : memref<1x4x256xf32, #tpu.memory_space<vmem>>, vector<1x1x256xf32>
    %10 = vector.shape_cast %9 : vector<1x1x256xf32> to vector<256xf32>
    %11 = arith.addf %7, %10 : vector<256xf32>
    %12 = arith.maximumf %8, %10 : vector<256xf32>
    %c0_7 = arith.constant 0 : index
    %c3 = arith.constant 3 : index
    %c0_8 = arith.constant 0 : index
    %13 = vector.load %arg2[%c0_7, %c3, %c0_8] : memref<1x4x256xf32, #tpu.memory_space<vmem>>, vector<1x1x256xf32>
    %14 = vector.shape_cast %13 : vector<1x1x256xf32> to vector<256xf32>
    %15 = arith.addf %11, %14 : vector<256xf32>
    %16 = arith.maximumf %12, %14 : vector<256xf32>
    %cst = arith.constant 2.500000e-01 : f32
    %17 = vector.broadcast %cst : f32 to vector<256xf32>
    %18 = arith.mulf %15, %17 : vector<256xf32>
    %c0_9 = arith.constant 0 : index
    %c0_10 = arith.constant 0 : index
    %19 = vector.load %arg5[%c0_9, %c0_10] : memref<2x256xf32, #tpu.memory_space<vmem>>, vector<1x256xf32>
    %20 = vector.shape_cast %19 : vector<1x256xf32> to vector<256xf32>
    %21 = vector.shape_cast %18 : vector<256xf32> to vector<1x256xf32>
    tpu.vector_store %arg5[%c0_9, %c0_10], %21 {strides = array<i32>} : memref<2x256xf32, #tpu.memory_space<vmem>>, vector<1x256xf32>,
    %c1_11 = arith.constant 1 : index
    %c0_12 = arith.constant 0 : index
    %22 = vector.load %arg5[%c1_11, %c0_12] : memref<2x256xf32, #tpu.memory_space<vmem>>, vector<1x256xf32>
    %23 = vector.shape_cast %22 : vector<1x256xf32> to vector<256xf32>
    %24 = vector.shape_cast %16 : vector<256xf32> to vector<1x256xf32>
    tpu.vector_store %arg5[%c1_11, %c0_12], %24 {strides = array<i32>} : memref<2x256xf32, #tpu.memory_space<vmem>>, vector<1x256xf32>,
    %c0_13 = arith.constant 0 : index
    %c0_14 = arith.constant 0 : index
    %25 = vector.load %arg5[%c0_13, %c0_14] : memref<2x256xf32, #tpu.memory_space<vmem>>, vector<1x16xf32>
    %26 = vector.shape_cast %25 : vector<1x16xf32> to vector<16xf32>
    %c0_15 = arith.constant 0 : index
    %c3_16 = arith.constant 3 : index
    %c3_17 = arith.constant 3 : index
    %27 = vector.load %arg4[%c0_15, %c3_16, %c3_17] : memref<2x22x22xf32, #tpu.memory_space<vmem>>, vector<1x1x16xf32>
    %28 = vector.shape_cast %27 : vector<1x1x16xf32> to vector<16xf32>
    %29 = vector.shape_cast %26 : vector<16xf32> to vector<1x1x16xf32>
    tpu.vector_store %arg4[%c0_15, %c3_16, %c3_17], %29 {strides = array<i32>} : memref<2x22x22xf32, #tpu.memory_space<vmem>>, vector<1x1x16xf32>,
    %c0_18 = arith.constant 0 : index
    %c16 = arith.constant 16 : index
    %30 = vector.load %arg5[%c0_18, %c16] : memref<2x256xf32, #tpu.memory_space<vmem>>, vector<1x16xf32>
    %31 = vector.shape_cast %30 : vector<1x16xf32> to vector<16xf32>
    %c0_19 = arith.constant 0 : index
    %c4 = arith.constant 4 : index
    %c3_20 = arith.constant 3 : index
    %32 = vector.load %arg4[%c0_19, %c4, %c3_20] : memref<2x22x22xf32, #tpu.memory_space<vmem>>, vector<1x1x16xf32>
    %33 = vector.shape_cast %32 : vector<1x1x16xf32> to vector<16xf32>
    %34 = vector.shape_cast %31 : vector<16xf32> to vector<1x1x16xf32>
    tpu.vector_store %arg4[%c0_19, %c4, %c3_20], %34 {strides = array<i32>} : memref<2x22x22xf32, #tpu.memory_space<vmem>>, vector<1x1x16xf32>,
    %c0_21 = arith.constant 0 : index
    %c32 = arith.constant 32 : index
    %35 = vector.load %arg5[%c0_21, %c32] : memref<2x256xf32, #tpu.memory_space<vmem>>, vector<1x16xf32>
    %36 = vector.shape_cast %35 : vector<1x16xf32> to vector<16xf32>
    %c0_22 = arith.constant 0 : index
    %c5 = arith.constant 5 : index
    %c3_23 = arith.constant 3 : index
    %37 = vector.load %arg4[%c0_22, %c5, %c3_23] : memref<2x22x22xf32, #tpu.memory_space<vmem>>, vector<1x1x16xf32>
    %38 = vector.shape_cast %37 : vector<1x1x16xf32> to vector<16xf32>
    %39 = vector.shape_cast %36 : vector<16xf32> to vector<1x1x16xf32>
    tpu.vector_store %arg4[%c0_22, %c5, %c3_23], %39 {strides = array<i32>} : memref<2x22x22xf32, #tpu.memory_space<vmem>>, vector<1x1x16xf32>,
    %c0_24 = arith.constant 0 : index
    %c48 = arith.constant 48 : index
    %40 = vector.load %arg5[%c0_24, %c48] : memref<2x256xf32, #tpu.memory_space<vmem>>, vector<1x16xf32>
    %41 = vector.shape_cast %40 : vector<1x16xf32> to vector<16xf32>
    %c0_25 = arith.constant 0 : index
    %c6 = arith.constant 6 : index
    %c3_26 = arith.constant 3 : index
    %42 = vector.load %arg4[%c0_25, %c6, %c3_26] : memref<2x22x22xf32, #tpu.memory_space<vmem>>, vector<1x1x16xf32>
    %43 = vector.shape_cast %42 : vector<1x1x16xf32> to vector<16xf32>
    %44 = vector.shape_cast %41 : vector<16xf32> to vector<1x1x16xf32>
    tpu.vector_store %arg4[%c0_25, %c6, %c3_26], %44 {strides = array<i32>} : memref<2x22x22xf32, #tpu.memory_space<vmem>>, vector<1x1x16xf32>,
    %c0_27 = arith.constant 0 : index
    %c64 = arith.constant 64 : index
    %45 = vector.load %arg5[%c0_27, %c64] : memref<2x256xf32, #tpu.memory_space<vmem>>, vector<1x16xf32>
    %46 = vector.shape_cast %45 : vector<1x16xf32> to vector<16xf32>
    %c0_28 = arith.constant 0 : index
    %c7 = arith.constant 7 : index
    %c3_29 = arith.constant 3 : index
    %47 = vector.load %arg4[%c0_28, %c7, %c3_29] : memref<2x22x22xf32, #tpu.memory_space<vmem>>, vector<1x1x16xf32>
    %48 = vector.shape_cast %47 : vector<1x1x16xf32> to vector<16xf32>
    %49 = vector.shape_cast %46 : vector<16xf32> to vector<1x1x16xf32>
    tpu.vector_store %arg4[%c0_28, %c7, %c3_29], %49 {strides = array<i32>} : memref<2x22x22xf32, #tpu.memory_space<vmem>>, vector<1x1x16xf32>,
    %c0_30 = arith.constant 0 : index
    %c80 = arith.constant 80 : index
    %50 = vector.load %arg5[%c0_30, %c80] : memref<2x256xf32, #tpu.memory_space<vmem>>, vector<1x16xf32>
    %51 = vector.shape_cast %50 : vector<1x16xf32> to vector<16xf32>
    %c0_31 = arith.constant 0 : index
    %c8 = arith.constant 8 : index
    %c3_32 = arith.constant 3 : index
    %52 = vector.load %arg4[%c0_31, %c8, %c3_32] : memref<2x22x22xf32, #tpu.memory_space<vmem>>, vector<1x1x16xf32>
    %53 = vector.shape_cast %52 : vector<1x1x16xf32> to vector<16xf32>
    %54 = vector.shape_cast %51 : vector<16xf32> to vector<1x1x16xf32>
    tpu.vector_store %arg4[%c0_31, %c8, %c3_32], %54 {strides = array<i32>} : memref<2x22x22xf32, #tpu.memory_space<vmem>>, vector<1x1x16xf32>,
    %c0_33 = arith.constant 0 : index
    %c96 = arith.constant 96 : index
    %55 = vector.load %arg5[%c0_33, %c96] : memref<2x256xf32, #tpu.memory_space<vmem>>, vector<1x16xf32>
    %56 = vector.shape_cast %55 : vector<1x16xf32> to vector<16xf32>
    %c0_34 = arith.constant 0 : index
    %c9 = arith.constant 9 : index
    %c3_35 = arith.constant 3 : index
    %57 = vector.load %arg4[%c0_34, %c9, %c3_35] : memref<2x22x22xf32, #tpu.memory_space<vmem>>, vector<1x1x16xf32>
    %58 = vector.shape_cast %57 : vector<1x1x16xf32> to vector<16xf32>
    %59 = vector.shape_cast %56 : vector<16xf32> to vector<1x1x16xf32>
    tpu.vector_store %arg4[%c0_34, %c9, %c3_35], %59 {strides = array<i32>} : memref<2x22x22xf32, #tpu.memory_space<vmem>>, vector<1x1x16xf32>,
    %c0_36 = arith.constant 0 : index
    %c112 = arith.constant 112 : index
    %60 = vector.load %arg5[%c0_36, %c112] : memref<2x256xf32, #tpu.memory_space<vmem>>, vector<1x16xf32>
    %61 = vector.shape_cast %60 : vector<1x16xf32> to vector<16xf32>
    %c0_37 = arith.constant 0 : index
    %c10 = arith.constant 10 : index
    %c3_38 = arith.constant 3 : index
    %62 = vector.load %arg4[%c0_37, %c10, %c3_38] : memref<2x22x22xf32, #tpu.memory_space<vmem>>, vector<1x1x16xf32>
    %63 = vector.shape_cast %62 : vector<1x1x16xf32> to vector<16xf32>
    %64 = vector.shape_cast %61 : vector<16xf32> to vector<1x1x16xf32>
    tpu.vector_store %arg4[%c0_37, %c10, %c3_38], %64 {strides = array<i32>} : memref<2x22x22xf32, #tpu.memory_space<vmem>>, vector<1x1x16xf32>,
    %c0_39 = arith.constant 0 : index
    %c128 = arith.constant 128 : index
    %65 = vector.load %arg5[%c0_39, %c128] : memref<2x256xf32, #tpu.memory_space<vmem>>, vector<1x16xf32>
    %66 = vector.shape_cast %65 : vector<1x16xf32> to vector<16xf32>
    %c0_40 = arith.constant 0 : index
    %c11 = arith.constant 11 : index
    %c3_41 = arith.constant 3 : index
    %67 = vector.load %arg4[%c0_40, %c11, %c3_41] : memref<2x22x22xf32, #tpu.memory_space<vmem>>, vector<1x1x16xf32>
    %68 = vector.shape_cast %67 : vector<1x1x16xf32> to vector<16xf32>
    %69 = vector.shape_cast %66 : vector<16xf32> to vector<1x1x16xf32>
    tpu.vector_store %arg4[%c0_40, %c11, %c3_41], %69 {strides = array<i32>} : memref<2x22x22xf32, #tpu.memory_space<vmem>>, vector<1x1x16xf32>,
    %c0_42 = arith.constant 0 : index
    %c144 = arith.constant 144 : index
    %70 = vector.load %arg5[%c0_42, %c144] : memref<2x256xf32, #tpu.memory_space<vmem>>, vector<1x16xf32>
    %71 = vector.shape_cast %70 : vector<1x16xf32> to vector<16xf32>
    %c0_43 = arith.constant 0 : index
    %c12 = arith.constant 12 : index
    %c3_44 = arith.constant 3 : index
    %72 = vector.load %arg4[%c0_43, %c12, %c3_44] : memref<2x22x22xf32, #tpu.memory_space<vmem>>, vector<1x1x16xf32>
    %73 = vector.shape_cast %72 : vector<1x1x16xf32> to vector<16xf32>
    %74 = vector.shape_cast %71 : vector<16xf32> to vector<1x1x16xf32>
    tpu.vector_store %arg4[%c0_43, %c12, %c3_44], %74 {strides = array<i32>} : memref<2x22x22xf32, #tpu.memory_space<vmem>>, vector<1x1x16xf32>,
    %c0_45 = arith.constant 0 : index
    %c160 = arith.constant 160 : index
    %75 = vector.load %arg5[%c0_45, %c160] : memref<2x256xf32, #tpu.memory_space<vmem>>, vector<1x16xf32>
    %76 = vector.shape_cast %75 : vector<1x16xf32> to vector<16xf32>
    %c0_46 = arith.constant 0 : index
    %c13 = arith.constant 13 : index
    %c3_47 = arith.constant 3 : index
    %77 = vector.load %arg4[%c0_46, %c13, %c3_47] : memref<2x22x22xf32, #tpu.memory_space<vmem>>, vector<1x1x16xf32>
    %78 = vector.shape_cast %77 : vector<1x1x16xf32> to vector<16xf32>
    %79 = vector.shape_cast %76 : vector<16xf32> to vector<1x1x16xf32>
    tpu.vector_store %arg4[%c0_46, %c13, %c3_47], %79 {strides = array<i32>} : memref<2x22x22xf32, #tpu.memory_space<vmem>>, vector<1x1x16xf32>,
    %c0_48 = arith.constant 0 : index
    %c176 = arith.constant 176 : index
    %80 = vector.load %arg5[%c0_48, %c176] : memref<2x256xf32, #tpu.memory_space<vmem>>, vector<1x16xf32>
    %81 = vector.shape_cast %80 : vector<1x16xf32> to vector<16xf32>
    %c0_49 = arith.constant 0 : index
    %c14 = arith.constant 14 : index
    %c3_50 = arith.constant 3 : index
    %82 = vector.load %arg4[%c0_49, %c14, %c3_50] : memref<2x22x22xf32, #tpu.memory_space<vmem>>, vector<1x1x16xf32>
    %83 = vector.shape_cast %82 : vector<1x1x16xf32> to vector<16xf32>
    %84 = vector.shape_cast %81 : vector<16xf32> to vector<1x1x16xf32>
    tpu.vector_store %arg4[%c0_49, %c14, %c3_50], %84 {strides = array<i32>} : memref<2x22x22xf32, #tpu.memory_space<vmem>>, vector<1x1x16xf32>,
    %c0_51 = arith.constant 0 : index
    %c192 = arith.constant 192 : index
    %85 = vector.load %arg5[%c0_51, %c192] : memref<2x256xf32, #tpu.memory_space<vmem>>, vector<1x16xf32>
    %86 = vector.shape_cast %85 : vector<1x16xf32> to vector<16xf32>
    %c0_52 = arith.constant 0 : index
    %c15 = arith.constant 15 : index
    %c3_53 = arith.constant 3 : index
    %87 = vector.load %arg4[%c0_52, %c15, %c3_53] : memref<2x22x22xf32, #tpu.memory_space<vmem>>, vector<1x1x16xf32>
    %88 = vector.shape_cast %87 : vector<1x1x16xf32> to vector<16xf32>
    %89 = vector.shape_cast %86 : vector<16xf32> to vector<1x1x16xf32>
    tpu.vector_store %arg4[%c0_52, %c15, %c3_53], %89 {strides = array<i32>} : memref<2x22x22xf32, #tpu.memory_space<vmem>>, vector<1x1x16xf32>,
    %c0_54 = arith.constant 0 : index
    %c208 = arith.constant 208 : index
    %90 = vector.load %arg5[%c0_54, %c208] : memref<2x256xf32, #tpu.memory_space<vmem>>, vector<1x16xf32>
    %91 = vector.shape_cast %90 : vector<1x16xf32> to vector<16xf32>
    %c0_55 = arith.constant 0 : index
    %c16_56 = arith.constant 16 : index
    %c3_57 = arith.constant 3 : index
    %92 = vector.load %arg4[%c0_55, %c16_56, %c3_57] : memref<2x22x22xf32, #tpu.memory_space<vmem>>, vector<1x1x16xf32>
    %93 = vector.shape_cast %92 : vector<1x1x16xf32> to vector<16xf32>
    %94 = vector.shape_cast %91 : vector<16xf32> to vector<1x1x16xf32>
    tpu.vector_store %arg4[%c0_55, %c16_56, %c3_57], %94 {strides = array<i32>} : memref<2x22x22xf32, #tpu.memory_space<vmem>>, vector<1x1x16xf32>,
    %c0_58 = arith.constant 0 : index
    %c224 = arith.constant 224 : index
    %95 = vector.load %arg5[%c0_58, %c224] : memref<2x256xf32, #tpu.memory_space<vmem>>, vector<1x16xf32>
    %96 = vector.shape_cast %95 : vector<1x16xf32> to vector<16xf32>
    %c0_59 = arith.constant 0 : index
    %c17 = arith.constant 17 : index
    %c3_60 = arith.constant 3 : index
    %97 = vector.load %arg4[%c0_59, %c17, %c3_60] : memref<2x22x22xf32, #tpu.memory_space<vmem>>, vector<1x1x16xf32>
    %98 = vector.shape_cast %97 : vector<1x1x16xf32> to vector<16xf32>
    %99 = vector.shape_cast %96 : vector<16xf32> to vector<1x1x16xf32>
    tpu.vector_store %arg4[%c0_59, %c17, %c3_60], %99 {strides = array<i32>} : memref<2x22x22xf32, #tpu.memory_space<vmem>>, vector<1x1x16xf32>,
    %c0_61 = arith.constant 0 : index
    %c240 = arith.constant 240 : index
    %100 = vector.load %arg5[%c0_61, %c240] : memref<2x256xf32, #tpu.memory_space<vmem>>, vector<1x16xf32>
    %101 = vector.shape_cast %100 : vector<1x16xf32> to vector<16xf32>
    %c0_62 = arith.constant 0 : index
    %c18 = arith.constant 18 : index
    %c3_63 = arith.constant 3 : index
    %102 = vector.load %arg4[%c0_62, %c18, %c3_63] : memref<2x22x22xf32, #tpu.memory_space<vmem>>, vector<1x1x16xf32>
    %103 = vector.shape_cast %102 : vector<1x1x16xf32> to vector<16xf32>
    %104 = vector.shape_cast %101 : vector<16xf32> to vector<1x1x16xf32>
    tpu.vector_store %arg4[%c0_62, %c18, %c3_63], %104 {strides = array<i32>} : memref<2x22x22xf32, #tpu.memory_space<vmem>>, vector<1x1x16xf32>,
    %c1_64 = arith.constant 1 : index
    %c0_65 = arith.constant 0 : index
    %105 = vector.load %arg5[%c1_64, %c0_65] : memref<2x256xf32, #tpu.memory_space<vmem>>, vector<1x16xf32>
    %106 = vector.shape_cast %105 : vector<1x16xf32> to vector<16xf32>
    %c1_66 = arith.constant 1 : index
    %c3_67 = arith.constant 3 : index
    %c3_68 = arith.constant 3 : index
    %107 = vector.load %arg4[%c1_66, %c3_67, %c3_68] : memref<2x22x22xf32, #tpu.memory_space<vmem>>, vector<1x1x16xf32>
    %108 = vector.shape_cast %107 : vector<1x1x16xf32> to vector<16xf32>
    %109 = vector.shape_cast %106 : vector<16xf32> to vector<1x1x16xf32>
    tpu.vector_store %arg4[%c1_66, %c3_67, %c3_68], %109 {strides = array<i32>} : memref<2x22x22xf32, #tpu.memory_space<vmem>>, vector<1x1x16xf32>,
    %c1_69 = arith.constant 1 : index
    %c16_70 = arith.constant 16 : index
    %110 = vector.load %arg5[%c1_69, %c16_70] : memref<2x256xf32, #tpu.memory_space<vmem>>, vector<1x16xf32>
    %111 = vector.shape_cast %110 : vector<1x16xf32> to vector<16xf32>
    %c1_71 = arith.constant 1 : index
    %c4_72 = arith.constant 4 : index
    %c3_73 = arith.constant 3 : index
    %112 = vector.load %arg4[%c1_71, %c4_72, %c3_73] : memref<2x22x22xf32, #tpu.memory_space<vmem>>, vector<1x1x16xf32>
    %113 = vector.shape_cast %112 : vector<1x1x16xf32> to vector<16xf32>
    %114 = vector.shape_cast %111 : vector<16xf32> to vector<1x1x16xf32>
    tpu.vector_store %arg4[%c1_71, %c4_72, %c3_73], %114 {strides = array<i32>} : memref<2x22x22xf32, #tpu.memory_space<vmem>>, vector<1x1x16xf32>,
    %c1_74 = arith.constant 1 : index
    %c32_75 = arith.constant 32 : index
    %115 = vector.load %arg5[%c1_74, %c32_75] : memref<2x256xf32, #tpu.memory_space<vmem>>, vector<1x16xf32>
    %116 = vector.shape_cast %115 : vector<1x16xf32> to vector<16xf32>
    %c1_76 = arith.constant 1 : index
    %c5_77 = arith.constant 5 : index
    %c3_78 = arith.constant 3 : index
    %117 = vector.load %arg4[%c1_76, %c5_77, %c3_78] : memref<2x22x22xf32, #tpu.memory_space<vmem>>, vector<1x1x16xf32>
    %118 = vector.shape_cast %117 : vector<1x1x16xf32> to vector<16xf32>
    %119 = vector.shape_cast %116 : vector<16xf32> to vector<1x1x16xf32>
    tpu.vector_store %arg4[%c1_76, %c5_77, %c3_78], %119 {strides = array<i32>} : memref<2x22x22xf32, #tpu.memory_space<vmem>>, vector<1x1x16xf32>,
    %c1_79 = arith.constant 1 : index
    %c48_80 = arith.constant 48 : index
    %120 = vector.load %arg5[%c1_79, %c48_80] : memref<2x256xf32, #tpu.memory_space<vmem>>, vector<1x16xf32>
    %121 = vector.shape_cast %120 : vector<1x16xf32> to vector<16xf32>
    %c1_81 = arith.constant 1 : index
    %c6_82 = arith.constant 6 : index
    %c3_83 = arith.constant 3 : index
    %122 = vector.load %arg4[%c1_81, %c6_82, %c3_83] : memref<2x22x22xf32, #tpu.memory_space<vmem>>, vector<1x1x16xf32>
    %123 = vector.shape_cast %122 : vector<1x1x16xf32> to vector<16xf32>
    %124 = vector.shape_cast %121 : vector<16xf32> to vector<1x1x16xf32>
    tpu.vector_store %arg4[%c1_81, %c6_82, %c3_83], %124 {strides = array<i32>} : memref<2x22x22xf32, #tpu.memory_space<vmem>>, vector<1x1x16xf32>,
    %c1_84 = arith.constant 1 : index
    %c64_85 = arith.constant 64 : index
    %125 = vector.load %arg5[%c1_84, %c64_85] : memref<2x256xf32, #tpu.memory_space<vmem>>, vector<1x16xf32>
    %126 = vector.shape_cast %125 : vector<1x16xf32> to vector<16xf32>
    %c1_86 = arith.constant 1 : index
    %c7_87 = arith.constant 7 : index
    %c3_88 = arith.constant 3 : index
    %127 = vector.load %arg4[%c1_86, %c7_87, %c3_88] : memref<2x22x22xf32, #tpu.memory_space<vmem>>, vector<1x1x16xf32>
    %128 = vector.shape_cast %127 : vector<1x1x16xf32> to vector<16xf32>
    %129 = vector.shape_cast %126 : vector<16xf32> to vector<1x1x16xf32>
    tpu.vector_store %arg4[%c1_86, %c7_87, %c3_88], %129 {strides = array<i32>} : memref<2x22x22xf32, #tpu.memory_space<vmem>>, vector<1x1x16xf32>,
    %c1_89 = arith.constant 1 : index
    %c80_90 = arith.constant 80 : index
    %130 = vector.load %arg5[%c1_89, %c80_90] : memref<2x256xf32, #tpu.memory_space<vmem>>, vector<1x16xf32>
    %131 = vector.shape_cast %130 : vector<1x16xf32> to vector<16xf32>
    %c1_91 = arith.constant 1 : index
    %c8_92 = arith.constant 8 : index
    %c3_93 = arith.constant 3 : index
    %132 = vector.load %arg4[%c1_91, %c8_92, %c3_93] : memref<2x22x22xf32, #tpu.memory_space<vmem>>, vector<1x1x16xf32>
    %133 = vector.shape_cast %132 : vector<1x1x16xf32> to vector<16xf32>
    %134 = vector.shape_cast %131 : vector<16xf32> to vector<1x1x16xf32>
    tpu.vector_store %arg4[%c1_91, %c8_92, %c3_93], %134 {strides = array<i32>} : memref<2x22x22xf32, #tpu.memory_space<vmem>>, vector<1x1x16xf32>,
    %c1_94 = arith.constant 1 : index
    %c96_95 = arith.constant 96 : index
    %135 = vector.load %arg5[%c1_94, %c96_95] : memref<2x256xf32, #tpu.memory_space<vmem>>, vector<1x16xf32>
    %136 = vector.shape_cast %135 : vector<1x16xf32> to vector<16xf32>
    %c1_96 = arith.constant 1 : index
    %c9_97 = arith.constant 9 : index
    %c3_98 = arith.constant 3 : index
    %137 = vector.load %arg4[%c1_96, %c9_97, %c3_98] : memref<2x22x22xf32, #tpu.memory_space<vmem>>, vector<1x1x16xf32>
    %138 = vector.shape_cast %137 : vector<1x1x16xf32> to vector<16xf32>
    %139 = vector.shape_cast %136 : vector<16xf32> to vector<1x1x16xf32>
    tpu.vector_store %arg4[%c1_96, %c9_97, %c3_98], %139 {strides = array<i32>} : memref<2x22x22xf32, #tpu.memory_space<vmem>>, vector<1x1x16xf32>,
    %c1_99 = arith.constant 1 : index
    %c112_100 = arith.constant 112 : index
    %140 = vector.load %arg5[%c1_99, %c112_100] : memref<2x256xf32, #tpu.memory_space<vmem>>, vector<1x16xf32>
    %141 = vector.shape_cast %140 : vector<1x16xf32> to vector<16xf32>
    %c1_101 = arith.constant 1 : index
    %c10_102 = arith.constant 10 : index
    %c3_103 = arith.constant 3 : index
    %142 = vector.load %arg4[%c1_101, %c10_102, %c3_103] : memref<2x22x22xf32, #tpu.memory_space<vmem>>, vector<1x1x16xf32>
    %143 = vector.shape_cast %142 : vector<1x1x16xf32> to vector<16xf32>
    %144 = vector.shape_cast %141 : vector<16xf32> to vector<1x1x16xf32>
    tpu.vector_store %arg4[%c1_101, %c10_102, %c3_103], %144 {strides = array<i32>} : memref<2x22x22xf32, #tpu.memory_space<vmem>>, vector<1x1x16xf32>,
    %c1_104 = arith.constant 1 : index
    %c128_105 = arith.constant 128 : index
    %145 = vector.load %arg5[%c1_104, %c128_105] : memref<2x256xf32, #tpu.memory_space<vmem>>, vector<1x16xf32>
    %146 = vector.shape_cast %145 : vector<1x16xf32> to vector<16xf32>
    %c1_106 = arith.constant 1 : index
    %c11_107 = arith.constant 11 : index
    %c3_108 = arith.constant 3 : index
    %147 = vector.load %arg4[%c1_106, %c11_107, %c3_108] : memref<2x22x22xf32, #tpu.memory_space<vmem>>, vector<1x1x16xf32>
    %148 = vector.shape_cast %147 : vector<1x1x16xf32> to vector<16xf32>
    %149 = vector.shape_cast %146 : vector<16xf32> to vector<1x1x16xf32>
    tpu.vector_store %arg4[%c1_106, %c11_107, %c3_108], %149 {strides = array<i32>} : memref<2x22x22xf32, #tpu.memory_space<vmem>>, vector<1x1x16xf32>,
    %c1_109 = arith.constant 1 : index
    %c144_110 = arith.constant 144 : index
    %150 = vector.load %arg5[%c1_109, %c144_110] : memref<2x256xf32, #tpu.memory_space<vmem>>, vector<1x16xf32>
    %151 = vector.shape_cast %150 : vector<1x16xf32> to vector<16xf32>
    %c1_111 = arith.constant 1 : index
    %c12_112 = arith.constant 12 : index
    %c3_113 = arith.constant 3 : index
    %152 = vector.load %arg4[%c1_111, %c12_112, %c3_113] : memref<2x22x22xf32, #tpu.memory_space<vmem>>, vector<1x1x16xf32>
    %153 = vector.shape_cast %152 : vector<1x1x16xf32> to vector<16xf32>
    %154 = vector.shape_cast %151 : vector<16xf32> to vector<1x1x16xf32>
    tpu.vector_store %arg4[%c1_111, %c12_112, %c3_113], %154 {strides = array<i32>} : memref<2x22x22xf32, #tpu.memory_space<vmem>>, vector<1x1x16xf32>,
    %c1_114 = arith.constant 1 : index
    %c160_115 = arith.constant 160 : index
    %155 = vector.load %arg5[%c1_114, %c160_115] : memref<2x256xf32, #tpu.memory_space<vmem>>, vector<1x16xf32>
    %156 = vector.shape_cast %155 : vector<1x16xf32> to vector<16xf32>
    %c1_116 = arith.constant 1 : index
    %c13_117 = arith.constant 13 : index
    %c3_118 = arith.constant 3 : index
    %157 = vector.load %arg4[%c1_116, %c13_117, %c3_118] : memref<2x22x22xf32, #tpu.memory_space<vmem>>, vector<1x1x16xf32>
    %158 = vector.shape_cast %157 : vector<1x1x16xf32> to vector<16xf32>
    %159 = vector.shape_cast %156 : vector<16xf32> to vector<1x1x16xf32>
    tpu.vector_store %arg4[%c1_116, %c13_117, %c3_118], %159 {strides = array<i32>} : memref<2x22x22xf32, #tpu.memory_space<vmem>>, vector<1x1x16xf32>,
    %c1_119 = arith.constant 1 : index
    %c176_120 = arith.constant 176 : index
    %160 = vector.load %arg5[%c1_119, %c176_120] : memref<2x256xf32, #tpu.memory_space<vmem>>, vector<1x16xf32>
    %161 = vector.shape_cast %160 : vector<1x16xf32> to vector<16xf32>
    %c1_121 = arith.constant 1 : index
    %c14_122 = arith.constant 14 : index
    %c3_123 = arith.constant 3 : index
    %162 = vector.load %arg4[%c1_121, %c14_122, %c3_123] : memref<2x22x22xf32, #tpu.memory_space<vmem>>, vector<1x1x16xf32>
    %163 = vector.shape_cast %162 : vector<1x1x16xf32> to vector<16xf32>
    %164 = vector.shape_cast %161 : vector<16xf32> to vector<1x1x16xf32>
    tpu.vector_store %arg4[%c1_121, %c14_122, %c3_123], %164 {strides = array<i32>} : memref<2x22x22xf32, #tpu.memory_space<vmem>>, vector<1x1x16xf32>,
    %c1_124 = arith.constant 1 : index
    %c192_125 = arith.constant 192 : index
    %165 = vector.load %arg5[%c1_124, %c192_125] : memref<2x256xf32, #tpu.memory_space<vmem>>, vector<1x16xf32>
    %166 = vector.shape_cast %165 : vector<1x16xf32> to vector<16xf32>
    %c1_126 = arith.constant 1 : index
    %c15_127 = arith.constant 15 : index
    %c3_128 = arith.constant 3 : index
    %167 = vector.load %arg4[%c1_126, %c15_127, %c3_128] : memref<2x22x22xf32, #tpu.memory_space<vmem>>, vector<1x1x16xf32>
    %168 = vector.shape_cast %167 : vector<1x1x16xf32> to vector<16xf32>
    %169 = vector.shape_cast %166 : vector<16xf32> to vector<1x1x16xf32>
    tpu.vector_store %arg4[%c1_126, %c15_127, %c3_128], %169 {strides = array<i32>} : memref<2x22x22xf32, #tpu.memory_space<vmem>>, vector<1x1x16xf32>,
    %c1_129 = arith.constant 1 : index
    %c208_130 = arith.constant 208 : index
    %170 = vector.load %arg5[%c1_129, %c208_130] : memref<2x256xf32, #tpu.memory_space<vmem>>, vector<1x16xf32>
    %171 = vector.shape_cast %170 : vector<1x16xf32> to vector<16xf32>
    %c1_131 = arith.constant 1 : index
    %c16_132 = arith.constant 16 : index
    %c3_133 = arith.constant 3 : index
    %172 = vector.load %arg4[%c1_131, %c16_132, %c3_133] : memref<2x22x22xf32, #tpu.memory_space<vmem>>, vector<1x1x16xf32>
    %173 = vector.shape_cast %172 : vector<1x1x16xf32> to vector<16xf32>
    %174 = vector.shape_cast %171 : vector<16xf32> to vector<1x1x16xf32>
    tpu.vector_store %arg4[%c1_131, %c16_132, %c3_133], %174 {strides = array<i32>} : memref<2x22x22xf32, #tpu.memory_space<vmem>>, vector<1x1x16xf32>,
    %c1_134 = arith.constant 1 : index
    %c224_135 = arith.constant 224 : index
    %175 = vector.load %arg5[%c1_134, %c224_135] : memref<2x256xf32, #tpu.memory_space<vmem>>, vector<1x16xf32>
    %176 = vector.shape_cast %175 : vector<1x16xf32> to vector<16xf32>
    %c1_136 = arith.constant 1 : index
    %c17_137 = arith.constant 17 : index
    %c3_138 = arith.constant 3 : index
    %177 = vector.load %arg4[%c1_136, %c17_137, %c3_138] : memref<2x22x22xf32, #tpu.memory_space<vmem>>, vector<1x1x16xf32>
    %178 = vector.shape_cast %177 : vector<1x1x16xf32> to vector<16xf32>
    %179 = vector.shape_cast %176 : vector<16xf32> to vector<1x1x16xf32>
    tpu.vector_store %arg4[%c1_136, %c17_137, %c3_138], %179 {strides = array<i32>} : memref<2x22x22xf32, #tpu.memory_space<vmem>>, vector<1x1x16xf32>,
    %c1_139 = arith.constant 1 : index
    %c240_140 = arith.constant 240 : index
    %180 = vector.load %arg5[%c1_139, %c240_140] : memref<2x256xf32, #tpu.memory_space<vmem>>, vector<1x16xf32>
    %181 = vector.shape_cast %180 : vector<1x16xf32> to vector<16xf32>
    %c1_141 = arith.constant 1 : index
    %c18_142 = arith.constant 18 : index
    %c3_143 = arith.constant 3 : index
    %182 = vector.load %arg4[%c1_141, %c18_142, %c3_143] : memref<2x22x22xf32, #tpu.memory_space<vmem>>, vector<1x1x16xf32>
    %183 = vector.shape_cast %182 : vector<1x1x16xf32> to vector<16xf32>
    %184 = vector.shape_cast %181 : vector<16xf32> to vector<1x1x16xf32>
    tpu.vector_store %arg4[%c1_141, %c18_142, %c3_143], %184 {strides = array<i32>} : memref<2x22x22xf32, #tpu.memory_space<vmem>>, vector<1x1x16xf32>,
    %c0_144 = arith.constant 0 : index
    %c0_145 = arith.constant 0 : index
    %c0_146 = arith.constant 0 : index
    %185 = vector.load %arg4[%c0_144, %c0_145, %c0_146] : memref<2x22x22xf32, #tpu.memory_space<vmem>>, vector<1x22x16xf32>
    %186 = vector.shape_cast %185 : vector<1x22x16xf32> to vector<22x16xf32>
    %c0_147 = arith.constant 0 : index
    %c0_148 = arith.constant 0 : index
    %c0_149 = arith.constant 0 : index
    %187 = vector.load %arg6[%c0_147, %c0_148, %c0_149] : memref<14x22x16xf32, #tpu.memory_space<vmem>>, vector<1x22x16xf32>
    %188 = vector.shape_cast %187 : vector<1x22x16xf32> to vector<22x16xf32>
    %189 = vector.shape_cast %186 : vector<22x16xf32> to vector<1x22x16xf32>
    tpu.vector_store %arg6[%c0_147, %c0_148, %c0_149], %189 {strides = array<i32>} : memref<14x22x16xf32, #tpu.memory_space<vmem>>, vector<1x22x16xf32>,
    %c0_150 = arith.constant 0 : index
    %c0_151 = arith.constant 0 : index
    %c1_152 = arith.constant 1 : index
    %190 = vector.load %arg4[%c0_150, %c0_151, %c1_152] : memref<2x22x22xf32, #tpu.memory_space<vmem>>, vector<1x22x16xf32>
    %191 = vector.shape_cast %190 : vector<1x22x16xf32> to vector<22x16xf32>
    %c1_153 = arith.constant 1 : index
    %c0_154 = arith.constant 0 : index
    %c0_155 = arith.constant 0 : index
    %192 = vector.load %arg6[%c1_153, %c0_154, %c0_155] : memref<14x22x16xf32, #tpu.memory_space<vmem>>, vector<1x22x16xf32>
    %193 = vector.shape_cast %192 : vector<1x22x16xf32> to vector<22x16xf32>
    %194 = vector.shape_cast %191 : vector<22x16xf32> to vector<1x22x16xf32>
    tpu.vector_store %arg6[%c1_153, %c0_154, %c0_155], %194 {strides = array<i32>} : memref<14x22x16xf32, #tpu.memory_space<vmem>>, vector<1x22x16xf32>,
    %c0_156 = arith.constant 0 : index
    %c0_157 = arith.constant 0 : index
    %c2_158 = arith.constant 2 : index
    %195 = vector.load %arg4[%c0_156, %c0_157, %c2_158] : memref<2x22x22xf32, #tpu.memory_space<vmem>>, vector<1x22x16xf32>
    %196 = vector.shape_cast %195 : vector<1x22x16xf32> to vector<22x16xf32>
    %c2_159 = arith.constant 2 : index
    %c0_160 = arith.constant 0 : index
    %c0_161 = arith.constant 0 : index
    %197 = vector.load %arg6[%c2_159, %c0_160, %c0_161] : memref<14x22x16xf32, #tpu.memory_space<vmem>>, vector<1x22x16xf32>
    %198 = vector.shape_cast %197 : vector<1x22x16xf32> to vector<22x16xf32>
    %199 = vector.shape_cast %196 : vector<22x16xf32> to vector<1x22x16xf32>
    tpu.vector_store %arg6[%c2_159, %c0_160, %c0_161], %199 {strides = array<i32>} : memref<14x22x16xf32, #tpu.memory_space<vmem>>, vector<1x22x16xf32>,
    %c0_162 = arith.constant 0 : index
    %c0_163 = arith.constant 0 : index
    %c3_164 = arith.constant 3 : index
    %200 = vector.load %arg4[%c0_162, %c0_163, %c3_164] : memref<2x22x22xf32, #tpu.memory_space<vmem>>, vector<1x22x16xf32>
    %201 = vector.shape_cast %200 : vector<1x22x16xf32> to vector<22x16xf32>
    %c3_165 = arith.constant 3 : index
    %c0_166 = arith.constant 0 : index
    %c0_167 = arith.constant 0 : index
    %202 = vector.load %arg6[%c3_165, %c0_166, %c0_167] : memref<14x22x16xf32, #tpu.memory_space<vmem>>, vector<1x22x16xf32>
    %203 = vector.shape_cast %202 : vector<1x22x16xf32> to vector<22x16xf32>
    %204 = vector.shape_cast %201 : vector<22x16xf32> to vector<1x22x16xf32>
    tpu.vector_store %arg6[%c3_165, %c0_166, %c0_167], %204 {strides = array<i32>} : memref<14x22x16xf32, #tpu.memory_space<vmem>>, vector<1x22x16xf32>,
    %c0_168 = arith.constant 0 : index
    %c0_169 = arith.constant 0 : index
    %c4_170 = arith.constant 4 : index
    %205 = vector.load %arg4[%c0_168, %c0_169, %c4_170] : memref<2x22x22xf32, #tpu.memory_space<vmem>>, vector<1x22x16xf32>
    %206 = vector.shape_cast %205 : vector<1x22x16xf32> to vector<22x16xf32>
    %c4_171 = arith.constant 4 : index
    %c0_172 = arith.constant 0 : index
    %c0_173 = arith.constant 0 : index
    %207 = vector.load %arg6[%c4_171, %c0_172, %c0_173] : memref<14x22x16xf32, #tpu.memory_space<vmem>>, vector<1x22x16xf32>
    %208 = vector.shape_cast %207 : vector<1x22x16xf32> to vector<22x16xf32>
    %209 = vector.shape_cast %206 : vector<22x16xf32> to vector<1x22x16xf32>
    tpu.vector_store %arg6[%c4_171, %c0_172, %c0_173], %209 {strides = array<i32>} : memref<14x22x16xf32, #tpu.memory_space<vmem>>, vector<1x22x16xf32>,
    %c0_174 = arith.constant 0 : index
    %c0_175 = arith.constant 0 : index
    %c5_176 = arith.constant 5 : index
    %210 = vector.load %arg4[%c0_174, %c0_175, %c5_176] : memref<2x22x22xf32, #tpu.memory_space<vmem>>, vector<1x22x16xf32>
    %211 = vector.shape_cast %210 : vector<1x22x16xf32> to vector<22x16xf32>
    %c5_177 = arith.constant 5 : index
    %c0_178 = arith.constant 0 : index
    %c0_179 = arith.constant 0 : index
    %212 = vector.load %arg6[%c5_177, %c0_178, %c0_179] : memref<14x22x16xf32, #tpu.memory_space<vmem>>, vector<1x22x16xf32>
    %213 = vector.shape_cast %212 : vector<1x22x16xf32> to vector<22x16xf32>
    %214 = vector.shape_cast %211 : vector<22x16xf32> to vector<1x22x16xf32>
    tpu.vector_store %arg6[%c5_177, %c0_178, %c0_179], %214 {strides = array<i32>} : memref<14x22x16xf32, #tpu.memory_space<vmem>>, vector<1x22x16xf32>,
    %c0_180 = arith.constant 0 : index
    %c0_181 = arith.constant 0 : index
    %c6_182 = arith.constant 6 : index
    %215 = vector.load %arg4[%c0_180, %c0_181, %c6_182] : memref<2x22x22xf32, #tpu.memory_space<vmem>>, vector<1x22x16xf32>
    %216 = vector.shape_cast %215 : vector<1x22x16xf32> to vector<22x16xf32>
    %c6_183 = arith.constant 6 : index
    %c0_184 = arith.constant 0 : index
    %c0_185 = arith.constant 0 : index
    %217 = vector.load %arg6[%c6_183, %c0_184, %c0_185] : memref<14x22x16xf32, #tpu.memory_space<vmem>>, vector<1x22x16xf32>
    %218 = vector.shape_cast %217 : vector<1x22x16xf32> to vector<22x16xf32>
    %219 = vector.shape_cast %216 : vector<22x16xf32> to vector<1x22x16xf32>
    tpu.vector_store %arg6[%c6_183, %c0_184, %c0_185], %219 {strides = array<i32>} : memref<14x22x16xf32, #tpu.memory_space<vmem>>, vector<1x22x16xf32>,
    %c1_186 = arith.constant 1 : index
    %c0_187 = arith.constant 0 : index
    %c0_188 = arith.constant 0 : index
    %220 = vector.load %arg4[%c1_186, %c0_187, %c0_188] : memref<2x22x22xf32, #tpu.memory_space<vmem>>, vector<1x22x16xf32>
    %221 = vector.shape_cast %220 : vector<1x22x16xf32> to vector<22x16xf32>
    %c7_189 = arith.constant 7 : index
    %c0_190 = arith.constant 0 : index
    %c0_191 = arith.constant 0 : index
    %222 = vector.load %arg6[%c7_189, %c0_190, %c0_191] : memref<14x22x16xf32, #tpu.memory_space<vmem>>, vector<1x22x16xf32>
    %223 = vector.shape_cast %222 : vector<1x22x16xf32> to vector<22x16xf32>
    %224 = vector.shape_cast %221 : vector<22x16xf32> to vector<1x22x16xf32>
    tpu.vector_store %arg6[%c7_189, %c0_190, %c0_191], %224 {strides = array<i32>} : memref<14x22x16xf32, #tpu.memory_space<vmem>>, vector<1x22x16xf32>,
    %c1_192 = arith.constant 1 : index
    %c0_193 = arith.constant 0 : index
    %c1_194 = arith.constant 1 : index
    %225 = vector.load %arg4[%c1_192, %c0_193, %c1_194] : memref<2x22x22xf32, #tpu.memory_space<vmem>>, vector<1x22x16xf32>
    %226 = vector.shape_cast %225 : vector<1x22x16xf32> to vector<22x16xf32>
    %c8_195 = arith.constant 8 : index
    %c0_196 = arith.constant 0 : index
    %c0_197 = arith.constant 0 : index
    %227 = vector.load %arg6[%c8_195, %c0_196, %c0_197] : memref<14x22x16xf32, #tpu.memory_space<vmem>>, vector<1x22x16xf32>
    %228 = vector.shape_cast %227 : vector<1x22x16xf32> to vector<22x16xf32>
    %229 = vector.shape_cast %226 : vector<22x16xf32> to vector<1x22x16xf32>
    tpu.vector_store %arg6[%c8_195, %c0_196, %c0_197], %229 {strides = array<i32>} : memref<14x22x16xf32, #tpu.memory_space<vmem>>, vector<1x22x16xf32>,
    %c1_198 = arith.constant 1 : index
    %c0_199 = arith.constant 0 : index
    %c2_200 = arith.constant 2 : index
    %230 = vector.load %arg4[%c1_198, %c0_199, %c2_200] : memref<2x22x22xf32, #tpu.memory_space<vmem>>, vector<1x22x16xf32>
    %231 = vector.shape_cast %230 : vector<1x22x16xf32> to vector<22x16xf32>
    %c9_201 = arith.constant 9 : index
    %c0_202 = arith.constant 0 : index
    %c0_203 = arith.constant 0 : index
    %232 = vector.load %arg6[%c9_201, %c0_202, %c0_203] : memref<14x22x16xf32, #tpu.memory_space<vmem>>, vector<1x22x16xf32>
    %233 = vector.shape_cast %232 : vector<1x22x16xf32> to vector<22x16xf32>
    %234 = vector.shape_cast %231 : vector<22x16xf32> to vector<1x22x16xf32>
    tpu.vector_store %arg6[%c9_201, %c0_202, %c0_203], %234 {strides = array<i32>} : memref<14x22x16xf32, #tpu.memory_space<vmem>>, vector<1x22x16xf32>,
    %c1_204 = arith.constant 1 : index
    %c0_205 = arith.constant 0 : index
    %c3_206 = arith.constant 3 : index
    %235 = vector.load %arg4[%c1_204, %c0_205, %c3_206] : memref<2x22x22xf32, #tpu.memory_space<vmem>>, vector<1x22x16xf32>
    %236 = vector.shape_cast %235 : vector<1x22x16xf32> to vector<22x16xf32>
    %c10_207 = arith.constant 10 : index
    %c0_208 = arith.constant 0 : index
    %c0_209 = arith.constant 0 : index
    %237 = vector.load %arg6[%c10_207, %c0_208, %c0_209] : memref<14x22x16xf32, #tpu.memory_space<vmem>>, vector<1x22x16xf32>
    %238 = vector.shape_cast %237 : vector<1x22x16xf32> to vector<22x16xf32>
    %239 = vector.shape_cast %236 : vector<22x16xf32> to vector<1x22x16xf32>
    tpu.vector_store %arg6[%c10_207, %c0_208, %c0_209], %239 {strides = array<i32>} : memref<14x22x16xf32, #tpu.memory_space<vmem>>, vector<1x22x16xf32>,
    %c1_210 = arith.constant 1 : index
    %c0_211 = arith.constant 0 : index
    %c4_212 = arith.constant 4 : index
    %240 = vector.load %arg4[%c1_210, %c0_211, %c4_212] : memref<2x22x22xf32, #tpu.memory_space<vmem>>, vector<1x22x16xf32>
    %241 = vector.shape_cast %240 : vector<1x22x16xf32> to vector<22x16xf32>
    %c11_213 = arith.constant 11 : index
    %c0_214 = arith.constant 0 : index
    %c0_215 = arith.constant 0 : index
    %242 = vector.load %arg6[%c11_213, %c0_214, %c0_215] : memref<14x22x16xf32, #tpu.memory_space<vmem>>, vector<1x22x16xf32>
    %243 = vector.shape_cast %242 : vector<1x22x16xf32> to vector<22x16xf32>
    %244 = vector.shape_cast %241 : vector<22x16xf32> to vector<1x22x16xf32>
    tpu.vector_store %arg6[%c11_213, %c0_214, %c0_215], %244 {strides = array<i32>} : memref<14x22x16xf32, #tpu.memory_space<vmem>>, vector<1x22x16xf32>,
    %c1_216 = arith.constant 1 : index
    %c0_217 = arith.constant 0 : index
    %c5_218 = arith.constant 5 : index
    %245 = vector.load %arg4[%c1_216, %c0_217, %c5_218] : memref<2x22x22xf32, #tpu.memory_space<vmem>>, vector<1x22x16xf32>
    %246 = vector.shape_cast %245 : vector<1x22x16xf32> to vector<22x16xf32>
    %c12_219 = arith.constant 12 : index
    %c0_220 = arith.constant 0 : index
    %c0_221 = arith.constant 0 : index
    %247 = vector.load %arg6[%c12_219, %c0_220, %c0_221] : memref<14x22x16xf32, #tpu.memory_space<vmem>>, vector<1x22x16xf32>
    %248 = vector.shape_cast %247 : vector<1x22x16xf32> to vector<22x16xf32>
    %249 = vector.shape_cast %246 : vector<22x16xf32> to vector<1x22x16xf32>
    tpu.vector_store %arg6[%c12_219, %c0_220, %c0_221], %249 {strides = array<i32>} : memref<14x22x16xf32, #tpu.memory_space<vmem>>, vector<1x22x16xf32>,
    %c1_222 = arith.constant 1 : index
    %c0_223 = arith.constant 0 : index
    %c6_224 = arith.constant 6 : index
    %250 = vector.load %arg4[%c1_222, %c0_223, %c6_224] : memref<2x22x22xf32, #tpu.memory_space<vmem>>, vector<1x22x16xf32>
    %251 = vector.shape_cast %250 : vector<1x22x16xf32> to vector<22x16xf32>
    %c13_225 = arith.constant 13 : index
    %c0_226 = arith.constant 0 : index
    %c0_227 = arith.constant 0 : index
    %252 = vector.load %arg6[%c13_225, %c0_226, %c0_227] : memref<14x22x16xf32, #tpu.memory_space<vmem>>, vector<1x22x16xf32>
    %253 = vector.shape_cast %252 : vector<1x22x16xf32> to vector<22x16xf32>
    %254 = vector.shape_cast %251 : vector<22x16xf32> to vector<1x22x16xf32>
    tpu.vector_store %arg6[%c13_225, %c0_226, %c0_227], %254 {strides = array<i32>} : memref<14x22x16xf32, #tpu.memory_space<vmem>>, vector<1x22x16xf32>,
    %cst_228 = arith.constant 0.000000e+00 : f32
    %255 = vector.broadcast %cst_228 : f32 to vector<16x16xf32>
    %cst_229 = arith.constant 0.000000e+00 : f32
    %256 = vector.broadcast %cst_229 : f32 to vector<16x16xf32>
    %cst_230 = arith.constant 0.000000e+00 : f32
    %257 = vector.broadcast %cst_230 : f32 to vector<16x16xf32>
    %cst_231 = arith.constant 0.000000e+00 : f32
    %258 = vector.broadcast %cst_231 : f32 to vector<16x16xf32>
    %c0_232 = arith.constant 0 : index
    %259 = memref.load %arg1[%c0_232] : memref<98xf32, #tpu.memory_space<smem>>
    %c0_233 = arith.constant 0 : index
    %c0_234 = arith.constant 0 : index
    %c0_235 = arith.constant 0 : index
    %260 = vector.load %arg6[%c0_233, %c0_234, %c0_235] : memref<14x22x16xf32, #tpu.memory_space<vmem>>, vector<1x16x16xf32>
    %261 = vector.shape_cast %260 : vector<1x16x16xf32> to vector<16x16xf32>
    %262 = vector.broadcast %259 : f32 to vector<16x16xf32>
    %263 = arith.mulf %262, %261 : vector<16x16xf32>
    %264 = arith.addf %255, %263 : vector<16x16xf32>
    %c7_236 = arith.constant 7 : index
    %265 = memref.load %arg1[%c7_236] : memref<98xf32, #tpu.memory_space<smem>>
    %c0_237 = arith.constant 0 : index
    %c1_238 = arith.constant 1 : index
    %c0_239 = arith.constant 0 : index
    %266 = vector.load %arg6[%c0_237, %c1_238, %c0_239] : memref<14x22x16xf32, #tpu.memory_space<vmem>>, vector<1x16x16xf32>
    %267 = vector.shape_cast %266 : vector<1x16x16xf32> to vector<16x16xf32>
    %268 = vector.broadcast %265 : f32 to vector<16x16xf32>
    %269 = arith.mulf %268, %267 : vector<16x16xf32>
    %270 = arith.addf %256, %269 : vector<16x16xf32>
    %c14_240 = arith.constant 14 : index
    %271 = memref.load %arg1[%c14_240] : memref<98xf32, #tpu.memory_space<smem>>
    %c0_241 = arith.constant 0 : index
    %c2_242 = arith.constant 2 : index
    %c0_243 = arith.constant 0 : index
    %272 = vector.load %arg6[%c0_241, %c2_242, %c0_243] : memref<14x22x16xf32, #tpu.memory_space<vmem>>, vector<1x16x16xf32>
    %273 = vector.shape_cast %272 : vector<1x16x16xf32> to vector<16x16xf32>
    %274 = vector.broadcast %271 : f32 to vector<16x16xf32>
    %275 = arith.mulf %274, %273 : vector<16x16xf32>
    %276 = arith.addf %257, %275 : vector<16x16xf32>
    %c21 = arith.constant 21 : index
    %277 = memref.load %arg1[%c21] : memref<98xf32, #tpu.memory_space<smem>>
    %c0_244 = arith.constant 0 : index
    %c3_245 = arith.constant 3 : index
    %c0_246 = arith.constant 0 : index
    %278 = vector.load %arg6[%c0_244, %c3_245, %c0_246] : memref<14x22x16xf32, #tpu.memory_space<vmem>>, vector<1x16x16xf32>
    %279 = vector.shape_cast %278 : vector<1x16x16xf32> to vector<16x16xf32>
    %280 = vector.broadcast %277 : f32 to vector<16x16xf32>
    %281 = arith.mulf %280, %279 : vector<16x16xf32>
    %282 = arith.addf %258, %281 : vector<16x16xf32>
    %c28 = arith.constant 28 : index
    %283 = memref.load %arg1[%c28] : memref<98xf32, #tpu.memory_space<smem>>
    %c0_247 = arith.constant 0 : index
    %c4_248 = arith.constant 4 : index
    %c0_249 = arith.constant 0 : index
    %284 = vector.load %arg6[%c0_247, %c4_248, %c0_249] : memref<14x22x16xf32, #tpu.memory_space<vmem>>, vector<1x16x16xf32>
    %285 = vector.shape_cast %284 : vector<1x16x16xf32> to vector<16x16xf32>
    %286 = vector.broadcast %283 : f32 to vector<16x16xf32>
    %287 = arith.mulf %286, %285 : vector<16x16xf32>
    %288 = arith.addf %264, %287 : vector<16x16xf32>
    %c35 = arith.constant 35 : index
    %289 = memref.load %arg1[%c35] : memref<98xf32, #tpu.memory_space<smem>>
    %c0_250 = arith.constant 0 : index
    %c5_251 = arith.constant 5 : index
    %c0_252 = arith.constant 0 : index
    %290 = vector.load %arg6[%c0_250, %c5_251, %c0_252] : memref<14x22x16xf32, #tpu.memory_space<vmem>>, vector<1x16x16xf32>
    %291 = vector.shape_cast %290 : vector<1x16x16xf32> to vector<16x16xf32>
    %292 = vector.broadcast %289 : f32 to vector<16x16xf32>
    %293 = arith.mulf %292, %291 : vector<16x16xf32>
    %294 = arith.addf %270, %293 : vector<16x16xf32>
    %c42 = arith.constant 42 : index
    %295 = memref.load %arg1[%c42] : memref<98xf32, #tpu.memory_space<smem>>
    %c0_253 = arith.constant 0 : index
    %c6_254 = arith.constant 6 : index
    %c0_255 = arith.constant 0 : index
    %296 = vector.load %arg6[%c0_253, %c6_254, %c0_255] : memref<14x22x16xf32, #tpu.memory_space<vmem>>, vector<1x16x16xf32>
    %297 = vector.shape_cast %296 : vector<1x16x16xf32> to vector<16x16xf32>
    %298 = vector.broadcast %295 : f32 to vector<16x16xf32>
    %299 = arith.mulf %298, %297 : vector<16x16xf32>
    %300 = arith.addf %276, %299 : vector<16x16xf32>
    %c1_256 = arith.constant 1 : index
    %301 = memref.load %arg1[%c1_256] : memref<98xf32, #tpu.memory_space<smem>>
    %c1_257 = arith.constant 1 : index
    %c0_258 = arith.constant 0 : index
    %c0_259 = arith.constant 0 : index
    %302 = vector.load %arg6[%c1_257, %c0_258, %c0_259] : memref<14x22x16xf32, #tpu.memory_space<vmem>>, vector<1x16x16xf32>
    %303 = vector.shape_cast %302 : vector<1x16x16xf32> to vector<16x16xf32>
    %304 = vector.broadcast %301 : f32 to vector<16x16xf32>
    %305 = arith.mulf %304, %303 : vector<16x16xf32>
    %306 = arith.addf %282, %305 : vector<16x16xf32>
    %c8_260 = arith.constant 8 : index
    %307 = memref.load %arg1[%c8_260] : memref<98xf32, #tpu.memory_space<smem>>
    %c1_261 = arith.constant 1 : index
    %c1_262 = arith.constant 1 : index
    %c0_263 = arith.constant 0 : index
    %308 = vector.load %arg6[%c1_261, %c1_262, %c0_263] : memref<14x22x16xf32, #tpu.memory_space<vmem>>, vector<1x16x16xf32>
    %309 = vector.shape_cast %308 : vector<1x16x16xf32> to vector<16x16xf32>
    %310 = vector.broadcast %307 : f32 to vector<16x16xf32>
    %311 = arith.mulf %310, %309 : vector<16x16xf32>
    %312 = arith.addf %288, %311 : vector<16x16xf32>
    %c15_264 = arith.constant 15 : index
    %313 = memref.load %arg1[%c15_264] : memref<98xf32, #tpu.memory_space<smem>>
    %c1_265 = arith.constant 1 : index
    %c2_266 = arith.constant 2 : index
    %c0_267 = arith.constant 0 : index
    %314 = vector.load %arg6[%c1_265, %c2_266, %c0_267] : memref<14x22x16xf32, #tpu.memory_space<vmem>>, vector<1x16x16xf32>
    %315 = vector.shape_cast %314 : vector<1x16x16xf32> to vector<16x16xf32>
    %316 = vector.broadcast %313 : f32 to vector<16x16xf32>
    %317 = arith.mulf %316, %315 : vector<16x16xf32>
    %318 = arith.addf %294, %317 : vector<16x16xf32>
    %c22 = arith.constant 22 : index
    %319 = memref.load %arg1[%c22] : memref<98xf32, #tpu.memory_space<smem>>
    %c1_268 = arith.constant 1 : index
    %c3_269 = arith.constant 3 : index
    %c0_270 = arith.constant 0 : index
    %320 = vector.load %arg6[%c1_268, %c3_269, %c0_270] : memref<14x22x16xf32, #tpu.memory_space<vmem>>, vector<1x16x16xf32>
    %321 = vector.shape_cast %320 : vector<1x16x16xf32> to vector<16x16xf32>
    %322 = vector.broadcast %319 : f32 to vector<16x16xf32>
    %323 = arith.mulf %322, %321 : vector<16x16xf32>
    %324 = arith.addf %300, %323 : vector<16x16xf32>
    %c29 = arith.constant 29 : index
    %325 = memref.load %arg1[%c29] : memref<98xf32, #tpu.memory_space<smem>>
    %c1_271 = arith.constant 1 : index
    %c4_272 = arith.constant 4 : index
    %c0_273 = arith.constant 0 : index
    %326 = vector.load %arg6[%c1_271, %c4_272, %c0_273] : memref<14x22x16xf32, #tpu.memory_space<vmem>>, vector<1x16x16xf32>
    %327 = vector.shape_cast %326 : vector<1x16x16xf32> to vector<16x16xf32>
    %328 = vector.broadcast %325 : f32 to vector<16x16xf32>
    %329 = arith.mulf %328, %327 : vector<16x16xf32>
    %330 = arith.addf %306, %329 : vector<16x16xf32>
    %c36 = arith.constant 36 : index
    %331 = memref.load %arg1[%c36] : memref<98xf32, #tpu.memory_space<smem>>
    %c1_274 = arith.constant 1 : index
    %c5_275 = arith.constant 5 : index
    %c0_276 = arith.constant 0 : index
    %332 = vector.load %arg6[%c1_274, %c5_275, %c0_276] : memref<14x22x16xf32, #tpu.memory_space<vmem>>, vector<1x16x16xf32>
    %333 = vector.shape_cast %332 : vector<1x16x16xf32> to vector<16x16xf32>
    %334 = vector.broadcast %331 : f32 to vector<16x16xf32>
    %335 = arith.mulf %334, %333 : vector<16x16xf32>
    %336 = arith.addf %312, %335 : vector<16x16xf32>
    %c43 = arith.constant 43 : index
    %337 = memref.load %arg1[%c43] : memref<98xf32, #tpu.memory_space<smem>>
    %c1_277 = arith.constant 1 : index
    %c6_278 = arith.constant 6 : index
    %c0_279 = arith.constant 0 : index
    %338 = vector.load %arg6[%c1_277, %c6_278, %c0_279] : memref<14x22x16xf32, #tpu.memory_space<vmem>>, vector<1x16x16xf32>
    %339 = vector.shape_cast %338 : vector<1x16x16xf32> to vector<16x16xf32>
    %340 = vector.broadcast %337 : f32 to vector<16x16xf32>
    %341 = arith.mulf %340, %339 : vector<16x16xf32>
    %342 = arith.addf %318, %341 : vector<16x16xf32>
    %c2_280 = arith.constant 2 : index
    %343 = memref.load %arg1[%c2_280] : memref<98xf32, #tpu.memory_space<smem>>
    %c2_281 = arith.constant 2 : index
    %c0_282 = arith.constant 0 : index
    %c0_283 = arith.constant 0 : index
    %344 = vector.load %arg6[%c2_281, %c0_282, %c0_283] : memref<14x22x16xf32, #tpu.memory_space<vmem>>, vector<1x16x16xf32>
    %345 = vector.shape_cast %344 : vector<1x16x16xf32> to vector<16x16xf32>
    %346 = vector.broadcast %343 : f32 to vector<16x16xf32>
    %347 = arith.mulf %346, %345 : vector<16x16xf32>
    %348 = arith.addf %324, %347 : vector<16x16xf32>
    %c9_284 = arith.constant 9 : index
    %349 = memref.load %arg1[%c9_284] : memref<98xf32, #tpu.memory_space<smem>>
    %c2_285 = arith.constant 2 : index
    %c1_286 = arith.constant 1 : index
    %c0_287 = arith.constant 0 : index
    %350 = vector.load %arg6[%c2_285, %c1_286, %c0_287] : memref<14x22x16xf32, #tpu.memory_space<vmem>>, vector<1x16x16xf32>
    %351 = vector.shape_cast %350 : vector<1x16x16xf32> to vector<16x16xf32>
    %352 = vector.broadcast %349 : f32 to vector<16x16xf32>
    %353 = arith.mulf %352, %351 : vector<16x16xf32>
    %354 = arith.addf %330, %353 : vector<16x16xf32>
    %c16_288 = arith.constant 16 : index
    %355 = memref.load %arg1[%c16_288] : memref<98xf32, #tpu.memory_space<smem>>
    %c2_289 = arith.constant 2 : index
    %c2_290 = arith.constant 2 : index
    %c0_291 = arith.constant 0 : index
    %356 = vector.load %arg6[%c2_289, %c2_290, %c0_291] : memref<14x22x16xf32, #tpu.memory_space<vmem>>, vector<1x16x16xf32>
    %357 = vector.shape_cast %356 : vector<1x16x16xf32> to vector<16x16xf32>
    %358 = vector.broadcast %355 : f32 to vector<16x16xf32>
    %359 = arith.mulf %358, %357 : vector<16x16xf32>
    %360 = arith.addf %336, %359 : vector<16x16xf32>
    %c23 = arith.constant 23 : index
    %361 = memref.load %arg1[%c23] : memref<98xf32, #tpu.memory_space<smem>>
    %c2_292 = arith.constant 2 : index
    %c3_293 = arith.constant 3 : index
    %c0_294 = arith.constant 0 : index
    %362 = vector.load %arg6[%c2_292, %c3_293, %c0_294] : memref<14x22x16xf32, #tpu.memory_space<vmem>>, vector<1x16x16xf32>
    %363 = vector.shape_cast %362 : vector<1x16x16xf32> to vector<16x16xf32>
    %364 = vector.broadcast %361 : f32 to vector<16x16xf32>
    %365 = arith.mulf %364, %363 : vector<16x16xf32>
    %366 = arith.addf %342, %365 : vector<16x16xf32>
    %c30 = arith.constant 30 : index
    %367 = memref.load %arg1[%c30] : memref<98xf32, #tpu.memory_space<smem>>
    %c2_295 = arith.constant 2 : index
    %c4_296 = arith.constant 4 : index
    %c0_297 = arith.constant 0 : index
    %368 = vector.load %arg6[%c2_295, %c4_296, %c0_297] : memref<14x22x16xf32, #tpu.memory_space<vmem>>, vector<1x16x16xf32>
    %369 = vector.shape_cast %368 : vector<1x16x16xf32> to vector<16x16xf32>
    %370 = vector.broadcast %367 : f32 to vector<16x16xf32>
    %371 = arith.mulf %370, %369 : vector<16x16xf32>
    %372 = arith.addf %348, %371 : vector<16x16xf32>
    %c37 = arith.constant 37 : index
    %373 = memref.load %arg1[%c37] : memref<98xf32, #tpu.memory_space<smem>>
    %c2_298 = arith.constant 2 : index
    %c5_299 = arith.constant 5 : index
    %c0_300 = arith.constant 0 : index
    %374 = vector.load %arg6[%c2_298, %c5_299, %c0_300] : memref<14x22x16xf32, #tpu.memory_space<vmem>>, vector<1x16x16xf32>
    %375 = vector.shape_cast %374 : vector<1x16x16xf32> to vector<16x16xf32>
    %376 = vector.broadcast %373 : f32 to vector<16x16xf32>
    %377 = arith.mulf %376, %375 : vector<16x16xf32>
    %378 = arith.addf %354, %377 : vector<16x16xf32>
    %c44 = arith.constant 44 : index
    %379 = memref.load %arg1[%c44] : memref<98xf32, #tpu.memory_space<smem>>
    %c2_301 = arith.constant 2 : index
    %c6_302 = arith.constant 6 : index
    %c0_303 = arith.constant 0 : index
    %380 = vector.load %arg6[%c2_301, %c6_302, %c0_303] : memref<14x22x16xf32, #tpu.memory_space<vmem>>, vector<1x16x16xf32>
    %381 = vector.shape_cast %380 : vector<1x16x16xf32> to vector<16x16xf32>
    %382 = vector.broadcast %379 : f32 to vector<16x16xf32>
    %383 = arith.mulf %382, %381 : vector<16x16xf32>
    %384 = arith.addf %360, %383 : vector<16x16xf32>
    %c3_304 = arith.constant 3 : index
    %385 = memref.load %arg1[%c3_304] : memref<98xf32, #tpu.memory_space<smem>>
    %c3_305 = arith.constant 3 : index
    %c0_306 = arith.constant 0 : index
    %c0_307 = arith.constant 0 : index
    %386 = vector.load %arg6[%c3_305, %c0_306, %c0_307] : memref<14x22x16xf32, #tpu.memory_space<vmem>>, vector<1x16x16xf32>
    %387 = vector.shape_cast %386 : vector<1x16x16xf32> to vector<16x16xf32>
    %388 = vector.broadcast %385 : f32 to vector<16x16xf32>
    %389 = arith.mulf %388, %387 : vector<16x16xf32>
    %390 = arith.addf %366, %389 : vector<16x16xf32>
    %c10_308 = arith.constant 10 : index
    %391 = memref.load %arg1[%c10_308] : memref<98xf32, #tpu.memory_space<smem>>
    %c3_309 = arith.constant 3 : index
    %c1_310 = arith.constant 1 : index
    %c0_311 = arith.constant 0 : index
    %392 = vector.load %arg6[%c3_309, %c1_310, %c0_311] : memref<14x22x16xf32, #tpu.memory_space<vmem>>, vector<1x16x16xf32>
    %393 = vector.shape_cast %392 : vector<1x16x16xf32> to vector<16x16xf32>
    %394 = vector.broadcast %391 : f32 to vector<16x16xf32>
    %395 = arith.mulf %394, %393 : vector<16x16xf32>
    %396 = arith.addf %372, %395 : vector<16x16xf32>
    %c17_312 = arith.constant 17 : index
    %397 = memref.load %arg1[%c17_312] : memref<98xf32, #tpu.memory_space<smem>>
    %c3_313 = arith.constant 3 : index
    %c2_314 = arith.constant 2 : index
    %c0_315 = arith.constant 0 : index
    %398 = vector.load %arg6[%c3_313, %c2_314, %c0_315] : memref<14x22x16xf32, #tpu.memory_space<vmem>>, vector<1x16x16xf32>
    %399 = vector.shape_cast %398 : vector<1x16x16xf32> to vector<16x16xf32>
    %400 = vector.broadcast %397 : f32 to vector<16x16xf32>
    %401 = arith.mulf %400, %399 : vector<16x16xf32>
    %402 = arith.addf %378, %401 : vector<16x16xf32>
    %c24 = arith.constant 24 : index
    %403 = memref.load %arg1[%c24] : memref<98xf32, #tpu.memory_space<smem>>
    %c3_316 = arith.constant 3 : index
    %c3_317 = arith.constant 3 : index
    %c0_318 = arith.constant 0 : index
    %404 = vector.load %arg6[%c3_316, %c3_317, %c0_318] : memref<14x22x16xf32, #tpu.memory_space<vmem>>, vector<1x16x16xf32>
    %405 = vector.shape_cast %404 : vector<1x16x16xf32> to vector<16x16xf32>
    %406 = vector.broadcast %403 : f32 to vector<16x16xf32>
    %407 = arith.mulf %406, %405 : vector<16x16xf32>
    %408 = arith.addf %384, %407 : vector<16x16xf32>
    %c31 = arith.constant 31 : index
    %409 = memref.load %arg1[%c31] : memref<98xf32, #tpu.memory_space<smem>>
    %c3_319 = arith.constant 3 : index
    %c4_320 = arith.constant 4 : index
    %c0_321 = arith.constant 0 : index
    %410 = vector.load %arg6[%c3_319, %c4_320, %c0_321] : memref<14x22x16xf32, #tpu.memory_space<vmem>>, vector<1x16x16xf32>
    %411 = vector.shape_cast %410 : vector<1x16x16xf32> to vector<16x16xf32>
    %412 = vector.broadcast %409 : f32 to vector<16x16xf32>
    %413 = arith.mulf %412, %411 : vector<16x16xf32>
    %414 = arith.addf %390, %413 : vector<16x16xf32>
    %c38 = arith.constant 38 : index
    %415 = memref.load %arg1[%c38] : memref<98xf32, #tpu.memory_space<smem>>
    %c3_322 = arith.constant 3 : index
    %c5_323 = arith.constant 5 : index
    %c0_324 = arith.constant 0 : index
    %416 = vector.load %arg6[%c3_322, %c5_323, %c0_324] : memref<14x22x16xf32, #tpu.memory_space<vmem>>, vector<1x16x16xf32>
    %417 = vector.shape_cast %416 : vector<1x16x16xf32> to vector<16x16xf32>
    %418 = vector.broadcast %415 : f32 to vector<16x16xf32>
    %419 = arith.mulf %418, %417 : vector<16x16xf32>
    %420 = arith.addf %396, %419 : vector<16x16xf32>
    %c45 = arith.constant 45 : index
    %421 = memref.load %arg1[%c45] : memref<98xf32, #tpu.memory_space<smem>>
    %c3_325 = arith.constant 3 : index
    %c6_326 = arith.constant 6 : index
    %c0_327 = arith.constant 0 : index
    %422 = vector.load %arg6[%c3_325, %c6_326, %c0_327] : memref<14x22x16xf32, #tpu.memory_space<vmem>>, vector<1x16x16xf32>
    %423 = vector.shape_cast %422 : vector<1x16x16xf32> to vector<16x16xf32>
    %424 = vector.broadcast %421 : f32 to vector<16x16xf32>
    %425 = arith.mulf %424, %423 : vector<16x16xf32>
    %426 = arith.addf %402, %425 : vector<16x16xf32>
    %c4_328 = arith.constant 4 : index
    %427 = memref.load %arg1[%c4_328] : memref<98xf32, #tpu.memory_space<smem>>
    %c4_329 = arith.constant 4 : index
    %c0_330 = arith.constant 0 : index
    %c0_331 = arith.constant 0 : index
    %428 = vector.load %arg6[%c4_329, %c0_330, %c0_331] : memref<14x22x16xf32, #tpu.memory_space<vmem>>, vector<1x16x16xf32>
    %429 = vector.shape_cast %428 : vector<1x16x16xf32> to vector<16x16xf32>
    %430 = vector.broadcast %427 : f32 to vector<16x16xf32>
    %431 = arith.mulf %430, %429 : vector<16x16xf32>
    %432 = arith.addf %408, %431 : vector<16x16xf32>
    %c11_332 = arith.constant 11 : index
    %433 = memref.load %arg1[%c11_332] : memref<98xf32, #tpu.memory_space<smem>>
    %c4_333 = arith.constant 4 : index
    %c1_334 = arith.constant 1 : index
    %c0_335 = arith.constant 0 : index
    %434 = vector.load %arg6[%c4_333, %c1_334, %c0_335] : memref<14x22x16xf32, #tpu.memory_space<vmem>>, vector<1x16x16xf32>
    %435 = vector.shape_cast %434 : vector<1x16x16xf32> to vector<16x16xf32>
    %436 = vector.broadcast %433 : f32 to vector<16x16xf32>
    %437 = arith.mulf %436, %435 : vector<16x16xf32>
    %438 = arith.addf %414, %437 : vector<16x16xf32>
    %c18_336 = arith.constant 18 : index
    %439 = memref.load %arg1[%c18_336] : memref<98xf32, #tpu.memory_space<smem>>
    %c4_337 = arith.constant 4 : index
    %c2_338 = arith.constant 2 : index
    %c0_339 = arith.constant 0 : index
    %440 = vector.load %arg6[%c4_337, %c2_338, %c0_339] : memref<14x22x16xf32, #tpu.memory_space<vmem>>, vector<1x16x16xf32>
    %441 = vector.shape_cast %440 : vector<1x16x16xf32> to vector<16x16xf32>
    %442 = vector.broadcast %439 : f32 to vector<16x16xf32>
    %443 = arith.mulf %442, %441 : vector<16x16xf32>
    %444 = arith.addf %420, %443 : vector<16x16xf32>
    %c25 = arith.constant 25 : index
    %445 = memref.load %arg1[%c25] : memref<98xf32, #tpu.memory_space<smem>>
    %c4_340 = arith.constant 4 : index
    %c3_341 = arith.constant 3 : index
    %c0_342 = arith.constant 0 : index
    %446 = vector.load %arg6[%c4_340, %c3_341, %c0_342] : memref<14x22x16xf32, #tpu.memory_space<vmem>>, vector<1x16x16xf32>
    %447 = vector.shape_cast %446 : vector<1x16x16xf32> to vector<16x16xf32>
    %448 = vector.broadcast %445 : f32 to vector<16x16xf32>
    %449 = arith.mulf %448, %447 : vector<16x16xf32>
    %450 = arith.addf %426, %449 : vector<16x16xf32>
    %c32_343 = arith.constant 32 : index
    %451 = memref.load %arg1[%c32_343] : memref<98xf32, #tpu.memory_space<smem>>
    %c4_344 = arith.constant 4 : index
    %c4_345 = arith.constant 4 : index
    %c0_346 = arith.constant 0 : index
    %452 = vector.load %arg6[%c4_344, %c4_345, %c0_346] : memref<14x22x16xf32, #tpu.memory_space<vmem>>, vector<1x16x16xf32>
    %453 = vector.shape_cast %452 : vector<1x16x16xf32> to vector<16x16xf32>
    %454 = vector.broadcast %451 : f32 to vector<16x16xf32>
    %455 = arith.mulf %454, %453 : vector<16x16xf32>
    %456 = arith.addf %432, %455 : vector<16x16xf32>
    %c39 = arith.constant 39 : index
    %457 = memref.load %arg1[%c39] : memref<98xf32, #tpu.memory_space<smem>>
    %c4_347 = arith.constant 4 : index
    %c5_348 = arith.constant 5 : index
    %c0_349 = arith.constant 0 : index
    %458 = vector.load %arg6[%c4_347, %c5_348, %c0_349] : memref<14x22x16xf32, #tpu.memory_space<vmem>>, vector<1x16x16xf32>
    %459 = vector.shape_cast %458 : vector<1x16x16xf32> to vector<16x16xf32>
    %460 = vector.broadcast %457 : f32 to vector<16x16xf32>
    %461 = arith.mulf %460, %459 : vector<16x16xf32>
    %462 = arith.addf %438, %461 : vector<16x16xf32>
    %c46 = arith.constant 46 : index
    %463 = memref.load %arg1[%c46] : memref<98xf32, #tpu.memory_space<smem>>
    %c4_350 = arith.constant 4 : index
    %c6_351 = arith.constant 6 : index
    %c0_352 = arith.constant 0 : index
    %464 = vector.load %arg6[%c4_350, %c6_351, %c0_352] : memref<14x22x16xf32, #tpu.memory_space<vmem>>, vector<1x16x16xf32>
    %465 = vector.shape_cast %464 : vector<1x16x16xf32> to vector<16x16xf32>
    %466 = vector.broadcast %463 : f32 to vector<16x16xf32>
    %467 = arith.mulf %466, %465 : vector<16x16xf32>
    %468 = arith.addf %444, %467 : vector<16x16xf32>
    %c5_353 = arith.constant 5 : index
    %469 = memref.load %arg1[%c5_353] : memref<98xf32, #tpu.memory_space<smem>>
    %c5_354 = arith.constant 5 : index
    %c0_355 = arith.constant 0 : index
    %c0_356 = arith.constant 0 : index
    %470 = vector.load %arg6[%c5_354, %c0_355, %c0_356] : memref<14x22x16xf32, #tpu.memory_space<vmem>>, vector<1x16x16xf32>
    %471 = vector.shape_cast %470 : vector<1x16x16xf32> to vector<16x16xf32>
    %472 = vector.broadcast %469 : f32 to vector<16x16xf32>
    %473 = arith.mulf %472, %471 : vector<16x16xf32>
    %474 = arith.addf %450, %473 : vector<16x16xf32>
    %c12_357 = arith.constant 12 : index
    %475 = memref.load %arg1[%c12_357] : memref<98xf32, #tpu.memory_space<smem>>
    %c5_358 = arith.constant 5 : index
    %c1_359 = arith.constant 1 : index
    %c0_360 = arith.constant 0 : index
    %476 = vector.load %arg6[%c5_358, %c1_359, %c0_360] : memref<14x22x16xf32, #tpu.memory_space<vmem>>, vector<1x16x16xf32>
    %477 = vector.shape_cast %476 : vector<1x16x16xf32> to vector<16x16xf32>
    %478 = vector.broadcast %475 : f32 to vector<16x16xf32>
    %479 = arith.mulf %478, %477 : vector<16x16xf32>
    %480 = arith.addf %456, %479 : vector<16x16xf32>
    %c19 = arith.constant 19 : index
    %481 = memref.load %arg1[%c19] : memref<98xf32, #tpu.memory_space<smem>>
    %c5_361 = arith.constant 5 : index
    %c2_362 = arith.constant 2 : index
    %c0_363 = arith.constant 0 : index
    %482 = vector.load %arg6[%c5_361, %c2_362, %c0_363] : memref<14x22x16xf32, #tpu.memory_space<vmem>>, vector<1x16x16xf32>
    %483 = vector.shape_cast %482 : vector<1x16x16xf32> to vector<16x16xf32>
    %484 = vector.broadcast %481 : f32 to vector<16x16xf32>
    %485 = arith.mulf %484, %483 : vector<16x16xf32>
    %486 = arith.addf %462, %485 : vector<16x16xf32>
    %c26 = arith.constant 26 : index
    %487 = memref.load %arg1[%c26] : memref<98xf32, #tpu.memory_space<smem>>
    %c5_364 = arith.constant 5 : index
    %c3_365 = arith.constant 3 : index
    %c0_366 = arith.constant 0 : index
    %488 = vector.load %arg6[%c5_364, %c3_365, %c0_366] : memref<14x22x16xf32, #tpu.memory_space<vmem>>, vector<1x16x16xf32>
    %489 = vector.shape_cast %488 : vector<1x16x16xf32> to vector<16x16xf32>
    %490 = vector.broadcast %487 : f32 to vector<16x16xf32>
    %491 = arith.mulf %490, %489 : vector<16x16xf32>
    %492 = arith.addf %468, %491 : vector<16x16xf32>
    %c33 = arith.constant 33 : index
    %493 = memref.load %arg1[%c33] : memref<98xf32, #tpu.memory_space<smem>>
    %c5_367 = arith.constant 5 : index
    %c4_368 = arith.constant 4 : index
    %c0_369 = arith.constant 0 : index
    %494 = vector.load %arg6[%c5_367, %c4_368, %c0_369] : memref<14x22x16xf32, #tpu.memory_space<vmem>>, vector<1x16x16xf32>
    %495 = vector.shape_cast %494 : vector<1x16x16xf32> to vector<16x16xf32>
    %496 = vector.broadcast %493 : f32 to vector<16x16xf32>
    %497 = arith.mulf %496, %495 : vector<16x16xf32>
    %498 = arith.addf %474, %497 : vector<16x16xf32>
    %c40 = arith.constant 40 : index
    %499 = memref.load %arg1[%c40] : memref<98xf32, #tpu.memory_space<smem>>
    %c5_370 = arith.constant 5 : index
    %c5_371 = arith.constant 5 : index
    %c0_372 = arith.constant 0 : index
    %500 = vector.load %arg6[%c5_370, %c5_371, %c0_372] : memref<14x22x16xf32, #tpu.memory_space<vmem>>, vector<1x16x16xf32>
    %501 = vector.shape_cast %500 : vector<1x16x16xf32> to vector<16x16xf32>
    %502 = vector.broadcast %499 : f32 to vector<16x16xf32>
    %503 = arith.mulf %502, %501 : vector<16x16xf32>
    %504 = arith.addf %480, %503 : vector<16x16xf32>
    %c47 = arith.constant 47 : index
    %505 = memref.load %arg1[%c47] : memref<98xf32, #tpu.memory_space<smem>>
    %c5_373 = arith.constant 5 : index
    %c6_374 = arith.constant 6 : index
    %c0_375 = arith.constant 0 : index
    %506 = vector.load %arg6[%c5_373, %c6_374, %c0_375] : memref<14x22x16xf32, #tpu.memory_space<vmem>>, vector<1x16x16xf32>
    %507 = vector.shape_cast %506 : vector<1x16x16xf32> to vector<16x16xf32>
    %508 = vector.broadcast %505 : f32 to vector<16x16xf32>
    %509 = arith.mulf %508, %507 : vector<16x16xf32>
    %510 = arith.addf %486, %509 : vector<16x16xf32>
    %c6_376 = arith.constant 6 : index
    %511 = memref.load %arg1[%c6_376] : memref<98xf32, #tpu.memory_space<smem>>
    %c6_377 = arith.constant 6 : index
    %c0_378 = arith.constant 0 : index
    %c0_379 = arith.constant 0 : index
    %512 = vector.load %arg6[%c6_377, %c0_378, %c0_379] : memref<14x22x16xf32, #tpu.memory_space<vmem>>, vector<1x16x16xf32>
    %513 = vector.shape_cast %512 : vector<1x16x16xf32> to vector<16x16xf32>
    %514 = vector.broadcast %511 : f32 to vector<16x16xf32>
    %515 = arith.mulf %514, %513 : vector<16x16xf32>
    %516 = arith.addf %492, %515 : vector<16x16xf32>
    %c13_380 = arith.constant 13 : index
    %517 = memref.load %arg1[%c13_380] : memref<98xf32, #tpu.memory_space<smem>>
    %c6_381 = arith.constant 6 : index
    %c1_382 = arith.constant 1 : index
    %c0_383 = arith.constant 0 : index
    %518 = vector.load %arg6[%c6_381, %c1_382, %c0_383] : memref<14x22x16xf32, #tpu.memory_space<vmem>>, vector<1x16x16xf32>
    %519 = vector.shape_cast %518 : vector<1x16x16xf32> to vector<16x16xf32>
    %520 = vector.broadcast %517 : f32 to vector<16x16xf32>
    %521 = arith.mulf %520, %519 : vector<16x16xf32>
    %522 = arith.addf %498, %521 : vector<16x16xf32>
    %c20 = arith.constant 20 : index
    %523 = memref.load %arg1[%c20] : memref<98xf32, #tpu.memory_space<smem>>
    %c6_384 = arith.constant 6 : index
    %c2_385 = arith.constant 2 : index
    %c0_386 = arith.constant 0 : index
    %524 = vector.load %arg6[%c6_384, %c2_385, %c0_386] : memref<14x22x16xf32, #tpu.memory_space<vmem>>, vector<1x16x16xf32>
    %525 = vector.shape_cast %524 : vector<1x16x16xf32> to vector<16x16xf32>
    %526 = vector.broadcast %523 : f32 to vector<16x16xf32>
    %527 = arith.mulf %526, %525 : vector<16x16xf32>
    %528 = arith.addf %504, %527 : vector<16x16xf32>
    %c27 = arith.constant 27 : index
    %529 = memref.load %arg1[%c27] : memref<98xf32, #tpu.memory_space<smem>>
    %c6_387 = arith.constant 6 : index
    %c3_388 = arith.constant 3 : index
    %c0_389 = arith.constant 0 : index
    %530 = vector.load %arg6[%c6_387, %c3_388, %c0_389] : memref<14x22x16xf32, #tpu.memory_space<vmem>>, vector<1x16x16xf32>
    %531 = vector.shape_cast %530 : vector<1x16x16xf32> to vector<16x16xf32>
    %532 = vector.broadcast %529 : f32 to vector<16x16xf32>
    %533 = arith.mulf %532, %531 : vector<16x16xf32>
    %534 = arith.addf %510, %533 : vector<16x16xf32>
    %c34 = arith.constant 34 : index
    %535 = memref.load %arg1[%c34] : memref<98xf32, #tpu.memory_space<smem>>
    %c6_390 = arith.constant 6 : index
    %c4_391 = arith.constant 4 : index
    %c0_392 = arith.constant 0 : index
    %536 = vector.load %arg6[%c6_390, %c4_391, %c0_392] : memref<14x22x16xf32, #tpu.memory_space<vmem>>, vector<1x16x16xf32>
    %537 = vector.shape_cast %536 : vector<1x16x16xf32> to vector<16x16xf32>
    %538 = vector.broadcast %535 : f32 to vector<16x16xf32>
    %539 = arith.mulf %538, %537 : vector<16x16xf32>
    %540 = arith.addf %516, %539 : vector<16x16xf32>
    %c41 = arith.constant 41 : index
    %541 = memref.load %arg1[%c41] : memref<98xf32, #tpu.memory_space<smem>>
    %c6_393 = arith.constant 6 : index
    %c5_394 = arith.constant 5 : index
    %c0_395 = arith.constant 0 : index
    %542 = vector.load %arg6[%c6_393, %c5_394, %c0_395] : memref<14x22x16xf32, #tpu.memory_space<vmem>>, vector<1x16x16xf32>
    %543 = vector.shape_cast %542 : vector<1x16x16xf32> to vector<16x16xf32>
    %544 = vector.broadcast %541 : f32 to vector<16x16xf32>
    %545 = arith.mulf %544, %543 : vector<16x16xf32>
    %546 = arith.addf %522, %545 : vector<16x16xf32>
    %c48_396 = arith.constant 48 : index
    %547 = memref.load %arg1[%c48_396] : memref<98xf32, #tpu.memory_space<smem>>
    %c6_397 = arith.constant 6 : index
    %c6_398 = arith.constant 6 : index
    %c0_399 = arith.constant 0 : index
    %548 = vector.load %arg6[%c6_397, %c6_398, %c0_399] : memref<14x22x16xf32, #tpu.memory_space<vmem>>, vector<1x16x16xf32>
    %549 = vector.shape_cast %548 : vector<1x16x16xf32> to vector<16x16xf32>
    %550 = vector.broadcast %547 : f32 to vector<16x16xf32>
    %551 = arith.mulf %550, %549 : vector<16x16xf32>
    %552 = arith.addf %528, %551 : vector<16x16xf32>
    %c49 = arith.constant 49 : index
    %553 = memref.load %arg1[%c49] : memref<98xf32, #tpu.memory_space<smem>>
    %c7_400 = arith.constant 7 : index
    %c0_401 = arith.constant 0 : index
    %c0_402 = arith.constant 0 : index
    %554 = vector.load %arg6[%c7_400, %c0_401, %c0_402] : memref<14x22x16xf32, #tpu.memory_space<vmem>>, vector<1x16x16xf32>
    %555 = vector.shape_cast %554 : vector<1x16x16xf32> to vector<16x16xf32>
    %556 = vector.broadcast %553 : f32 to vector<16x16xf32>
    %557 = arith.mulf %556, %555 : vector<16x16xf32>
    %558 = arith.addf %534, %557 : vector<16x16xf32>
    %c56 = arith.constant 56 : index
    %559 = memref.load %arg1[%c56] : memref<98xf32, #tpu.memory_space<smem>>
    %c7_403 = arith.constant 7 : index
    %c1_404 = arith.constant 1 : index
    %c0_405 = arith.constant 0 : index
    %560 = vector.load %arg6[%c7_403, %c1_404, %c0_405] : memref<14x22x16xf32, #tpu.memory_space<vmem>>, vector<1x16x16xf32>
    %561 = vector.shape_cast %560 : vector<1x16x16xf32> to vector<16x16xf32>
    %562 = vector.broadcast %559 : f32 to vector<16x16xf32>
    %563 = arith.mulf %562, %561 : vector<16x16xf32>
    %564 = arith.addf %540, %563 : vector<16x16xf32>
    %c63 = arith.constant 63 : index
    %565 = memref.load %arg1[%c63] : memref<98xf32, #tpu.memory_space<smem>>
    %c7_406 = arith.constant 7 : index
    %c2_407 = arith.constant 2 : index
    %c0_408 = arith.constant 0 : index
    %566 = vector.load %arg6[%c7_406, %c2_407, %c0_408] : memref<14x22x16xf32, #tpu.memory_space<vmem>>, vector<1x16x16xf32>
    %567 = vector.shape_cast %566 : vector<1x16x16xf32> to vector<16x16xf32>
    %568 = vector.broadcast %565 : f32 to vector<16x16xf32>
    %569 = arith.mulf %568, %567 : vector<16x16xf32>
    %570 = arith.addf %546, %569 : vector<16x16xf32>
    %c70 = arith.constant 70 : index
    %571 = memref.load %arg1[%c70] : memref<98xf32, #tpu.memory_space<smem>>
    %c7_409 = arith.constant 7 : index
    %c3_410 = arith.constant 3 : index
    %c0_411 = arith.constant 0 : index
    %572 = vector.load %arg6[%c7_409, %c3_410, %c0_411] : memref<14x22x16xf32, #tpu.memory_space<vmem>>, vector<1x16x16xf32>
    %573 = vector.shape_cast %572 : vector<1x16x16xf32> to vector<16x16xf32>
    %574 = vector.broadcast %571 : f32 to vector<16x16xf32>
    %575 = arith.mulf %574, %573 : vector<16x16xf32>
    %576 = arith.addf %552, %575 : vector<16x16xf32>
    %c77 = arith.constant 77 : index
    %577 = memref.load %arg1[%c77] : memref<98xf32, #tpu.memory_space<smem>>
    %c7_412 = arith.constant 7 : index
    %c4_413 = arith.constant 4 : index
    %c0_414 = arith.constant 0 : index
    %578 = vector.load %arg6[%c7_412, %c4_413, %c0_414] : memref<14x22x16xf32, #tpu.memory_space<vmem>>, vector<1x16x16xf32>
    %579 = vector.shape_cast %578 : vector<1x16x16xf32> to vector<16x16xf32>
    %580 = vector.broadcast %577 : f32 to vector<16x16xf32>
    %581 = arith.mulf %580, %579 : vector<16x16xf32>
    %582 = arith.addf %558, %581 : vector<16x16xf32>
    %c84 = arith.constant 84 : index
    %583 = memref.load %arg1[%c84] : memref<98xf32, #tpu.memory_space<smem>>
    %c7_415 = arith.constant 7 : index
    %c5_416 = arith.constant 5 : index
    %c0_417 = arith.constant 0 : index
    %584 = vector.load %arg6[%c7_415, %c5_416, %c0_417] : memref<14x22x16xf32, #tpu.memory_space<vmem>>, vector<1x16x16xf32>
    %585 = vector.shape_cast %584 : vector<1x16x16xf32> to vector<16x16xf32>
    %586 = vector.broadcast %583 : f32 to vector<16x16xf32>
    %587 = arith.mulf %586, %585 : vector<16x16xf32>
    %588 = arith.addf %564, %587 : vector<16x16xf32>
    %c91 = arith.constant 91 : index
    %589 = memref.load %arg1[%c91] : memref<98xf32, #tpu.memory_space<smem>>
    %c7_418 = arith.constant 7 : index
    %c6_419 = arith.constant 6 : index
    %c0_420 = arith.constant 0 : index
    %590 = vector.load %arg6[%c7_418, %c6_419, %c0_420] : memref<14x22x16xf32, #tpu.memory_space<vmem>>, vector<1x16x16xf32>
    %591 = vector.shape_cast %590 : vector<1x16x16xf32> to vector<16x16xf32>
    %592 = vector.broadcast %589 : f32 to vector<16x16xf32>
    %593 = arith.mulf %592, %591 : vector<16x16xf32>
    %594 = arith.addf %570, %593 : vector<16x16xf32>
    %c50 = arith.constant 50 : index
    %595 = memref.load %arg1[%c50] : memref<98xf32, #tpu.memory_space<smem>>
    %c8_421 = arith.constant 8 : index
    %c0_422 = arith.constant 0 : index
    %c0_423 = arith.constant 0 : index
    %596 = vector.load %arg6[%c8_421, %c0_422, %c0_423] : memref<14x22x16xf32, #tpu.memory_space<vmem>>, vector<1x16x16xf32>
    %597 = vector.shape_cast %596 : vector<1x16x16xf32> to vector<16x16xf32>
    %598 = vector.broadcast %595 : f32 to vector<16x16xf32>
    %599 = arith.mulf %598, %597 : vector<16x16xf32>
    %600 = arith.addf %576, %599 : vector<16x16xf32>
    %c57 = arith.constant 57 : index
    %601 = memref.load %arg1[%c57] : memref<98xf32, #tpu.memory_space<smem>>
    %c8_424 = arith.constant 8 : index
    %c1_425 = arith.constant 1 : index
    %c0_426 = arith.constant 0 : index
    %602 = vector.load %arg6[%c8_424, %c1_425, %c0_426] : memref<14x22x16xf32, #tpu.memory_space<vmem>>, vector<1x16x16xf32>
    %603 = vector.shape_cast %602 : vector<1x16x16xf32> to vector<16x16xf32>
    %604 = vector.broadcast %601 : f32 to vector<16x16xf32>
    %605 = arith.mulf %604, %603 : vector<16x16xf32>
    %606 = arith.addf %582, %605 : vector<16x16xf32>
    %c64_427 = arith.constant 64 : index
    %607 = memref.load %arg1[%c64_427] : memref<98xf32, #tpu.memory_space<smem>>
    %c8_428 = arith.constant 8 : index
    %c2_429 = arith.constant 2 : index
    %c0_430 = arith.constant 0 : index
    %608 = vector.load %arg6[%c8_428, %c2_429, %c0_430] : memref<14x22x16xf32, #tpu.memory_space<vmem>>, vector<1x16x16xf32>
    %609 = vector.shape_cast %608 : vector<1x16x16xf32> to vector<16x16xf32>
    %610 = vector.broadcast %607 : f32 to vector<16x16xf32>
    %611 = arith.mulf %610, %609 : vector<16x16xf32>
    %612 = arith.addf %588, %611 : vector<16x16xf32>
    %c71 = arith.constant 71 : index
    %613 = memref.load %arg1[%c71] : memref<98xf32, #tpu.memory_space<smem>>
    %c8_431 = arith.constant 8 : index
    %c3_432 = arith.constant 3 : index
    %c0_433 = arith.constant 0 : index
    %614 = vector.load %arg6[%c8_431, %c3_432, %c0_433] : memref<14x22x16xf32, #tpu.memory_space<vmem>>, vector<1x16x16xf32>
    %615 = vector.shape_cast %614 : vector<1x16x16xf32> to vector<16x16xf32>
    %616 = vector.broadcast %613 : f32 to vector<16x16xf32>
    %617 = arith.mulf %616, %615 : vector<16x16xf32>
    %618 = arith.addf %594, %617 : vector<16x16xf32>
    %c78 = arith.constant 78 : index
    %619 = memref.load %arg1[%c78] : memref<98xf32, #tpu.memory_space<smem>>
    %c8_434 = arith.constant 8 : index
    %c4_435 = arith.constant 4 : index
    %c0_436 = arith.constant 0 : index
    %620 = vector.load %arg6[%c8_434, %c4_435, %c0_436] : memref<14x22x16xf32, #tpu.memory_space<vmem>>, vector<1x16x16xf32>
    %621 = vector.shape_cast %620 : vector<1x16x16xf32> to vector<16x16xf32>
    %622 = vector.broadcast %619 : f32 to vector<16x16xf32>
    %623 = arith.mulf %622, %621 : vector<16x16xf32>
    %624 = arith.addf %600, %623 : vector<16x16xf32>
    %c85 = arith.constant 85 : index
    %625 = memref.load %arg1[%c85] : memref<98xf32, #tpu.memory_space<smem>>
    %c8_437 = arith.constant 8 : index
    %c5_438 = arith.constant 5 : index
    %c0_439 = arith.constant 0 : index
    %626 = vector.load %arg6[%c8_437, %c5_438, %c0_439] : memref<14x22x16xf32, #tpu.memory_space<vmem>>, vector<1x16x16xf32>
    %627 = vector.shape_cast %626 : vector<1x16x16xf32> to vector<16x16xf32>
    %628 = vector.broadcast %625 : f32 to vector<16x16xf32>
    %629 = arith.mulf %628, %627 : vector<16x16xf32>
    %630 = arith.addf %606, %629 : vector<16x16xf32>
    %c92 = arith.constant 92 : index
    %631 = memref.load %arg1[%c92] : memref<98xf32, #tpu.memory_space<smem>>
    %c8_440 = arith.constant 8 : index
    %c6_441 = arith.constant 6 : index
    %c0_442 = arith.constant 0 : index
    %632 = vector.load %arg6[%c8_440, %c6_441, %c0_442] : memref<14x22x16xf32, #tpu.memory_space<vmem>>, vector<1x16x16xf32>
    %633 = vector.shape_cast %632 : vector<1x16x16xf32> to vector<16x16xf32>
    %634 = vector.broadcast %631 : f32 to vector<16x16xf32>
    %635 = arith.mulf %634, %633 : vector<16x16xf32>
    %636 = arith.addf %612, %635 : vector<16x16xf32>
    %c51 = arith.constant 51 : index
    %637 = memref.load %arg1[%c51] : memref<98xf32, #tpu.memory_space<smem>>
    %c9_443 = arith.constant 9 : index
    %c0_444 = arith.constant 0 : index
    %c0_445 = arith.constant 0 : index
    %638 = vector.load %arg6[%c9_443, %c0_444, %c0_445] : memref<14x22x16xf32, #tpu.memory_space<vmem>>, vector<1x16x16xf32>
    %639 = vector.shape_cast %638 : vector<1x16x16xf32> to vector<16x16xf32>
    %640 = vector.broadcast %637 : f32 to vector<16x16xf32>
    %641 = arith.mulf %640, %639 : vector<16x16xf32>
    %642 = arith.addf %618, %641 : vector<16x16xf32>
    %c58 = arith.constant 58 : index
    %643 = memref.load %arg1[%c58] : memref<98xf32, #tpu.memory_space<smem>>
    %c9_446 = arith.constant 9 : index
    %c1_447 = arith.constant 1 : index
    %c0_448 = arith.constant 0 : index
    %644 = vector.load %arg6[%c9_446, %c1_447, %c0_448] : memref<14x22x16xf32, #tpu.memory_space<vmem>>, vector<1x16x16xf32>
    %645 = vector.shape_cast %644 : vector<1x16x16xf32> to vector<16x16xf32>
    %646 = vector.broadcast %643 : f32 to vector<16x16xf32>
    %647 = arith.mulf %646, %645 : vector<16x16xf32>
    %648 = arith.addf %624, %647 : vector<16x16xf32>
    %c65 = arith.constant 65 : index
    %649 = memref.load %arg1[%c65] : memref<98xf32, #tpu.memory_space<smem>>
    %c9_449 = arith.constant 9 : index
    %c2_450 = arith.constant 2 : index
    %c0_451 = arith.constant 0 : index
    %650 = vector.load %arg6[%c9_449, %c2_450, %c0_451] : memref<14x22x16xf32, #tpu.memory_space<vmem>>, vector<1x16x16xf32>
    %651 = vector.shape_cast %650 : vector<1x16x16xf32> to vector<16x16xf32>
    %652 = vector.broadcast %649 : f32 to vector<16x16xf32>
    %653 = arith.mulf %652, %651 : vector<16x16xf32>
    %654 = arith.addf %630, %653 : vector<16x16xf32>
    %c72 = arith.constant 72 : index
    %655 = memref.load %arg1[%c72] : memref<98xf32, #tpu.memory_space<smem>>
    %c9_452 = arith.constant 9 : index
    %c3_453 = arith.constant 3 : index
    %c0_454 = arith.constant 0 : index
    %656 = vector.load %arg6[%c9_452, %c3_453, %c0_454] : memref<14x22x16xf32, #tpu.memory_space<vmem>>, vector<1x16x16xf32>
    %657 = vector.shape_cast %656 : vector<1x16x16xf32> to vector<16x16xf32>
    %658 = vector.broadcast %655 : f32 to vector<16x16xf32>
    %659 = arith.mulf %658, %657 : vector<16x16xf32>
    %660 = arith.addf %636, %659 : vector<16x16xf32>
    %c79 = arith.constant 79 : index
    %661 = memref.load %arg1[%c79] : memref<98xf32, #tpu.memory_space<smem>>
    %c9_455 = arith.constant 9 : index
    %c4_456 = arith.constant 4 : index
    %c0_457 = arith.constant 0 : index
    %662 = vector.load %arg6[%c9_455, %c4_456, %c0_457] : memref<14x22x16xf32, #tpu.memory_space<vmem>>, vector<1x16x16xf32>
    %663 = vector.shape_cast %662 : vector<1x16x16xf32> to vector<16x16xf32>
    %664 = vector.broadcast %661 : f32 to vector<16x16xf32>
    %665 = arith.mulf %664, %663 : vector<16x16xf32>
    %666 = arith.addf %642, %665 : vector<16x16xf32>
    %c86 = arith.constant 86 : index
    %667 = memref.load %arg1[%c86] : memref<98xf32, #tpu.memory_space<smem>>
    %c9_458 = arith.constant 9 : index
    %c5_459 = arith.constant 5 : index
    %c0_460 = arith.constant 0 : index
    %668 = vector.load %arg6[%c9_458, %c5_459, %c0_460] : memref<14x22x16xf32, #tpu.memory_space<vmem>>, vector<1x16x16xf32>
    %669 = vector.shape_cast %668 : vector<1x16x16xf32> to vector<16x16xf32>
    %670 = vector.broadcast %667 : f32 to vector<16x16xf32>
    %671 = arith.mulf %670, %669 : vector<16x16xf32>
    %672 = arith.addf %648, %671 : vector<16x16xf32>
    %c93 = arith.constant 93 : index
    %673 = memref.load %arg1[%c93] : memref<98xf32, #tpu.memory_space<smem>>
    %c9_461 = arith.constant 9 : index
    %c6_462 = arith.constant 6 : index
    %c0_463 = arith.constant 0 : index
    %674 = vector.load %arg6[%c9_461, %c6_462, %c0_463] : memref<14x22x16xf32, #tpu.memory_space<vmem>>, vector<1x16x16xf32>
    %675 = vector.shape_cast %674 : vector<1x16x16xf32> to vector<16x16xf32>
    %676 = vector.broadcast %673 : f32 to vector<16x16xf32>
    %677 = arith.mulf %676, %675 : vector<16x16xf32>
    %678 = arith.addf %654, %677 : vector<16x16xf32>
    %c52 = arith.constant 52 : index
    %679 = memref.load %arg1[%c52] : memref<98xf32, #tpu.memory_space<smem>>
    %c10_464 = arith.constant 10 : index
    %c0_465 = arith.constant 0 : index
    %c0_466 = arith.constant 0 : index
    %680 = vector.load %arg6[%c10_464, %c0_465, %c0_466] : memref<14x22x16xf32, #tpu.memory_space<vmem>>, vector<1x16x16xf32>
    %681 = vector.shape_cast %680 : vector<1x16x16xf32> to vector<16x16xf32>
    %682 = vector.broadcast %679 : f32 to vector<16x16xf32>
    %683 = arith.mulf %682, %681 : vector<16x16xf32>
    %684 = arith.addf %660, %683 : vector<16x16xf32>
    %c59 = arith.constant 59 : index
    %685 = memref.load %arg1[%c59] : memref<98xf32, #tpu.memory_space<smem>>
    %c10_467 = arith.constant 10 : index
    %c1_468 = arith.constant 1 : index
    %c0_469 = arith.constant 0 : index
    %686 = vector.load %arg6[%c10_467, %c1_468, %c0_469] : memref<14x22x16xf32, #tpu.memory_space<vmem>>, vector<1x16x16xf32>
    %687 = vector.shape_cast %686 : vector<1x16x16xf32> to vector<16x16xf32>
    %688 = vector.broadcast %685 : f32 to vector<16x16xf32>
    %689 = arith.mulf %688, %687 : vector<16x16xf32>
    %690 = arith.addf %666, %689 : vector<16x16xf32>
    %c66 = arith.constant 66 : index
    %691 = memref.load %arg1[%c66] : memref<98xf32, #tpu.memory_space<smem>>
    %c10_470 = arith.constant 10 : index
    %c2_471 = arith.constant 2 : index
    %c0_472 = arith.constant 0 : index
    %692 = vector.load %arg6[%c10_470, %c2_471, %c0_472] : memref<14x22x16xf32, #tpu.memory_space<vmem>>, vector<1x16x16xf32>
    %693 = vector.shape_cast %692 : vector<1x16x16xf32> to vector<16x16xf32>
    %694 = vector.broadcast %691 : f32 to vector<16x16xf32>
    %695 = arith.mulf %694, %693 : vector<16x16xf32>
    %696 = arith.addf %672, %695 : vector<16x16xf32>
    %c73 = arith.constant 73 : index
    %697 = memref.load %arg1[%c73] : memref<98xf32, #tpu.memory_space<smem>>
    %c10_473 = arith.constant 10 : index
    %c3_474 = arith.constant 3 : index
    %c0_475 = arith.constant 0 : index
    %698 = vector.load %arg6[%c10_473, %c3_474, %c0_475] : memref<14x22x16xf32, #tpu.memory_space<vmem>>, vector<1x16x16xf32>
    %699 = vector.shape_cast %698 : vector<1x16x16xf32> to vector<16x16xf32>
    %700 = vector.broadcast %697 : f32 to vector<16x16xf32>
    %701 = arith.mulf %700, %699 : vector<16x16xf32>
    %702 = arith.addf %678, %701 : vector<16x16xf32>
    %c80_476 = arith.constant 80 : index
    %703 = memref.load %arg1[%c80_476] : memref<98xf32, #tpu.memory_space<smem>>
    %c10_477 = arith.constant 10 : index
    %c4_478 = arith.constant 4 : index
    %c0_479 = arith.constant 0 : index
    %704 = vector.load %arg6[%c10_477, %c4_478, %c0_479] : memref<14x22x16xf32, #tpu.memory_space<vmem>>, vector<1x16x16xf32>
    %705 = vector.shape_cast %704 : vector<1x16x16xf32> to vector<16x16xf32>
    %706 = vector.broadcast %703 : f32 to vector<16x16xf32>
    %707 = arith.mulf %706, %705 : vector<16x16xf32>
    %708 = arith.addf %684, %707 : vector<16x16xf32>
    %c87 = arith.constant 87 : index
    %709 = memref.load %arg1[%c87] : memref<98xf32, #tpu.memory_space<smem>>
    %c10_480 = arith.constant 10 : index
    %c5_481 = arith.constant 5 : index
    %c0_482 = arith.constant 0 : index
    %710 = vector.load %arg6[%c10_480, %c5_481, %c0_482] : memref<14x22x16xf32, #tpu.memory_space<vmem>>, vector<1x16x16xf32>
    %711 = vector.shape_cast %710 : vector<1x16x16xf32> to vector<16x16xf32>
    %712 = vector.broadcast %709 : f32 to vector<16x16xf32>
    %713 = arith.mulf %712, %711 : vector<16x16xf32>
    %714 = arith.addf %690, %713 : vector<16x16xf32>
    %c94 = arith.constant 94 : index
    %715 = memref.load %arg1[%c94] : memref<98xf32, #tpu.memory_space<smem>>
    %c10_483 = arith.constant 10 : index
    %c6_484 = arith.constant 6 : index
    %c0_485 = arith.constant 0 : index
    %716 = vector.load %arg6[%c10_483, %c6_484, %c0_485] : memref<14x22x16xf32, #tpu.memory_space<vmem>>, vector<1x16x16xf32>
    %717 = vector.shape_cast %716 : vector<1x16x16xf32> to vector<16x16xf32>
    %718 = vector.broadcast %715 : f32 to vector<16x16xf32>
    %719 = arith.mulf %718, %717 : vector<16x16xf32>
    %720 = arith.addf %696, %719 : vector<16x16xf32>
    %c53 = arith.constant 53 : index
    %721 = memref.load %arg1[%c53] : memref<98xf32, #tpu.memory_space<smem>>
    %c11_486 = arith.constant 11 : index
    %c0_487 = arith.constant 0 : index
    %c0_488 = arith.constant 0 : index
    %722 = vector.load %arg6[%c11_486, %c0_487, %c0_488] : memref<14x22x16xf32, #tpu.memory_space<vmem>>, vector<1x16x16xf32>
    %723 = vector.shape_cast %722 : vector<1x16x16xf32> to vector<16x16xf32>
    %724 = vector.broadcast %721 : f32 to vector<16x16xf32>
    %725 = arith.mulf %724, %723 : vector<16x16xf32>
    %726 = arith.addf %702, %725 : vector<16x16xf32>
    %c60 = arith.constant 60 : index
    %727 = memref.load %arg1[%c60] : memref<98xf32, #tpu.memory_space<smem>>
    %c11_489 = arith.constant 11 : index
    %c1_490 = arith.constant 1 : index
    %c0_491 = arith.constant 0 : index
    %728 = vector.load %arg6[%c11_489, %c1_490, %c0_491] : memref<14x22x16xf32, #tpu.memory_space<vmem>>, vector<1x16x16xf32>
    %729 = vector.shape_cast %728 : vector<1x16x16xf32> to vector<16x16xf32>
    %730 = vector.broadcast %727 : f32 to vector<16x16xf32>
    %731 = arith.mulf %730, %729 : vector<16x16xf32>
    %732 = arith.addf %708, %731 : vector<16x16xf32>
    %c67 = arith.constant 67 : index
    %733 = memref.load %arg1[%c67] : memref<98xf32, #tpu.memory_space<smem>>
    %c11_492 = arith.constant 11 : index
    %c2_493 = arith.constant 2 : index
    %c0_494 = arith.constant 0 : index
    %734 = vector.load %arg6[%c11_492, %c2_493, %c0_494] : memref<14x22x16xf32, #tpu.memory_space<vmem>>, vector<1x16x16xf32>
    %735 = vector.shape_cast %734 : vector<1x16x16xf32> to vector<16x16xf32>
    %736 = vector.broadcast %733 : f32 to vector<16x16xf32>
    %737 = arith.mulf %736, %735 : vector<16x16xf32>
    %738 = arith.addf %714, %737 : vector<16x16xf32>
    %c74 = arith.constant 74 : index
    %739 = memref.load %arg1[%c74] : memref<98xf32, #tpu.memory_space<smem>>
    %c11_495 = arith.constant 11 : index
    %c3_496 = arith.constant 3 : index
    %c0_497 = arith.constant 0 : index
    %740 = vector.load %arg6[%c11_495, %c3_496, %c0_497] : memref<14x22x16xf32, #tpu.memory_space<vmem>>, vector<1x16x16xf32>
    %741 = vector.shape_cast %740 : vector<1x16x16xf32> to vector<16x16xf32>
    %742 = vector.broadcast %739 : f32 to vector<16x16xf32>
    %743 = arith.mulf %742, %741 : vector<16x16xf32>
    %744 = arith.addf %720, %743 : vector<16x16xf32>
    %c81 = arith.constant 81 : index
    %745 = memref.load %arg1[%c81] : memref<98xf32, #tpu.memory_space<smem>>
    %c11_498 = arith.constant 11 : index
    %c4_499 = arith.constant 4 : index
    %c0_500 = arith.constant 0 : index
    %746 = vector.load %arg6[%c11_498, %c4_499, %c0_500] : memref<14x22x16xf32, #tpu.memory_space<vmem>>, vector<1x16x16xf32>
    %747 = vector.shape_cast %746 : vector<1x16x16xf32> to vector<16x16xf32>
    %748 = vector.broadcast %745 : f32 to vector<16x16xf32>
    %749 = arith.mulf %748, %747 : vector<16x16xf32>
    %750 = arith.addf %726, %749 : vector<16x16xf32>
    %c88 = arith.constant 88 : index
    %751 = memref.load %arg1[%c88] : memref<98xf32, #tpu.memory_space<smem>>
    %c11_501 = arith.constant 11 : index
    %c5_502 = arith.constant 5 : index
    %c0_503 = arith.constant 0 : index
    %752 = vector.load %arg6[%c11_501, %c5_502, %c0_503] : memref<14x22x16xf32, #tpu.memory_space<vmem>>, vector<1x16x16xf32>
    %753 = vector.shape_cast %752 : vector<1x16x16xf32> to vector<16x16xf32>
    %754 = vector.broadcast %751 : f32 to vector<16x16xf32>
    %755 = arith.mulf %754, %753 : vector<16x16xf32>
    %756 = arith.addf %732, %755 : vector<16x16xf32>
    %c95 = arith.constant 95 : index
    %757 = memref.load %arg1[%c95] : memref<98xf32, #tpu.memory_space<smem>>
    %c11_504 = arith.constant 11 : index
    %c6_505 = arith.constant 6 : index
    %c0_506 = arith.constant 0 : index
    %758 = vector.load %arg6[%c11_504, %c6_505, %c0_506] : memref<14x22x16xf32, #tpu.memory_space<vmem>>, vector<1x16x16xf32>
    %759 = vector.shape_cast %758 : vector<1x16x16xf32> to vector<16x16xf32>
    %760 = vector.broadcast %757 : f32 to vector<16x16xf32>
    %761 = arith.mulf %760, %759 : vector<16x16xf32>
    %762 = arith.addf %738, %761 : vector<16x16xf32>
    %c54 = arith.constant 54 : index
    %763 = memref.load %arg1[%c54] : memref<98xf32, #tpu.memory_space<smem>>
    %c12_507 = arith.constant 12 : index
    %c0_508 = arith.constant 0 : index
    %c0_509 = arith.constant 0 : index
    %764 = vector.load %arg6[%c12_507, %c0_508, %c0_509] : memref<14x22x16xf32, #tpu.memory_space<vmem>>, vector<1x16x16xf32>
    %765 = vector.shape_cast %764 : vector<1x16x16xf32> to vector<16x16xf32>
    %766 = vector.broadcast %763 : f32 to vector<16x16xf32>
    %767 = arith.mulf %766, %765 : vector<16x16xf32>
    %768 = arith.addf %744, %767 : vector<16x16xf32>
    %c61 = arith.constant 61 : index
    %769 = memref.load %arg1[%c61] : memref<98xf32, #tpu.memory_space<smem>>
    %c12_510 = arith.constant 12 : index
    %c1_511 = arith.constant 1 : index
    %c0_512 = arith.constant 0 : index
    %770 = vector.load %arg6[%c12_510, %c1_511, %c0_512] : memref<14x22x16xf32, #tpu.memory_space<vmem>>, vector<1x16x16xf32>
    %771 = vector.shape_cast %770 : vector<1x16x16xf32> to vector<16x16xf32>
    %772 = vector.broadcast %769 : f32 to vector<16x16xf32>
    %773 = arith.mulf %772, %771 : vector<16x16xf32>
    %774 = arith.addf %750, %773 : vector<16x16xf32>
    %c68 = arith.constant 68 : index
    %775 = memref.load %arg1[%c68] : memref<98xf32, #tpu.memory_space<smem>>
    %c12_513 = arith.constant 12 : index
    %c2_514 = arith.constant 2 : index
    %c0_515 = arith.constant 0 : index
    %776 = vector.load %arg6[%c12_513, %c2_514, %c0_515] : memref<14x22x16xf32, #tpu.memory_space<vmem>>, vector<1x16x16xf32>
    %777 = vector.shape_cast %776 : vector<1x16x16xf32> to vector<16x16xf32>
    %778 = vector.broadcast %775 : f32 to vector<16x16xf32>
    %779 = arith.mulf %778, %777 : vector<16x16xf32>
    %780 = arith.addf %756, %779 : vector<16x16xf32>
    %c75 = arith.constant 75 : index
    %781 = memref.load %arg1[%c75] : memref<98xf32, #tpu.memory_space<smem>>
    %c12_516 = arith.constant 12 : index
    %c3_517 = arith.constant 3 : index
    %c0_518 = arith.constant 0 : index
    %782 = vector.load %arg6[%c12_516, %c3_517, %c0_518] : memref<14x22x16xf32, #tpu.memory_space<vmem>>, vector<1x16x16xf32>
    %783 = vector.shape_cast %782 : vector<1x16x16xf32> to vector<16x16xf32>
    %784 = vector.broadcast %781 : f32 to vector<16x16xf32>
    %785 = arith.mulf %784, %783 : vector<16x16xf32>
    %786 = arith.addf %762, %785 : vector<16x16xf32>
    %c82 = arith.constant 82 : index
    %787 = memref.load %arg1[%c82] : memref<98xf32, #tpu.memory_space<smem>>
    %c12_519 = arith.constant 12 : index
    %c4_520 = arith.constant 4 : index
    %c0_521 = arith.constant 0 : index
    %788 = vector.load %arg6[%c12_519, %c4_520, %c0_521] : memref<14x22x16xf32, #tpu.memory_space<vmem>>, vector<1x16x16xf32>
    %789 = vector.shape_cast %788 : vector<1x16x16xf32> to vector<16x16xf32>
    %790 = vector.broadcast %787 : f32 to vector<16x16xf32>
    %791 = arith.mulf %790, %789 : vector<16x16xf32>
    %792 = arith.addf %768, %791 : vector<16x16xf32>
    %c89 = arith.constant 89 : index
    %793 = memref.load %arg1[%c89] : memref<98xf32, #tpu.memory_space<smem>>
    %c12_522 = arith.constant 12 : index
    %c5_523 = arith.constant 5 : index
    %c0_524 = arith.constant 0 : index
    %794 = vector.load %arg6[%c12_522, %c5_523, %c0_524] : memref<14x22x16xf32, #tpu.memory_space<vmem>>, vector<1x16x16xf32>
    %795 = vector.shape_cast %794 : vector<1x16x16xf32> to vector<16x16xf32>
    %796 = vector.broadcast %793 : f32 to vector<16x16xf32>
    %797 = arith.mulf %796, %795 : vector<16x16xf32>
    %798 = arith.addf %774, %797 : vector<16x16xf32>
    %c96_525 = arith.constant 96 : index
    %799 = memref.load %arg1[%c96_525] : memref<98xf32, #tpu.memory_space<smem>>
    %c12_526 = arith.constant 12 : index
    %c6_527 = arith.constant 6 : index
    %c0_528 = arith.constant 0 : index
    %800 = vector.load %arg6[%c12_526, %c6_527, %c0_528] : memref<14x22x16xf32, #tpu.memory_space<vmem>>, vector<1x16x16xf32>
    %801 = vector.shape_cast %800 : vector<1x16x16xf32> to vector<16x16xf32>
    %802 = vector.broadcast %799 : f32 to vector<16x16xf32>
    %803 = arith.mulf %802, %801 : vector<16x16xf32>
    %804 = arith.addf %780, %803 : vector<16x16xf32>
    %c55 = arith.constant 55 : index
    %805 = memref.load %arg1[%c55] : memref<98xf32, #tpu.memory_space<smem>>
    %c13_529 = arith.constant 13 : index
    %c0_530 = arith.constant 0 : index
    %c0_531 = arith.constant 0 : index
    %806 = vector.load %arg6[%c13_529, %c0_530, %c0_531] : memref<14x22x16xf32, #tpu.memory_space<vmem>>, vector<1x16x16xf32>
    %807 = vector.shape_cast %806 : vector<1x16x16xf32> to vector<16x16xf32>
    %808 = vector.broadcast %805 : f32 to vector<16x16xf32>
    %809 = arith.mulf %808, %807 : vector<16x16xf32>
    %810 = arith.addf %786, %809 : vector<16x16xf32>
    %c62 = arith.constant 62 : index
    %811 = memref.load %arg1[%c62] : memref<98xf32, #tpu.memory_space<smem>>
    %c13_532 = arith.constant 13 : index
    %c1_533 = arith.constant 1 : index
    %c0_534 = arith.constant 0 : index
    %812 = vector.load %arg6[%c13_532, %c1_533, %c0_534] : memref<14x22x16xf32, #tpu.memory_space<vmem>>, vector<1x16x16xf32>
    %813 = vector.shape_cast %812 : vector<1x16x16xf32> to vector<16x16xf32>
    %814 = vector.broadcast %811 : f32 to vector<16x16xf32>
    %815 = arith.mulf %814, %813 : vector<16x16xf32>
    %816 = arith.addf %792, %815 : vector<16x16xf32>
    %c69 = arith.constant 69 : index
    %817 = memref.load %arg1[%c69] : memref<98xf32, #tpu.memory_space<smem>>
    %c13_535 = arith.constant 13 : index
    %c2_536 = arith.constant 2 : index
    %c0_537 = arith.constant 0 : index
    %818 = vector.load %arg6[%c13_535, %c2_536, %c0_537] : memref<14x22x16xf32, #tpu.memory_space<vmem>>, vector<1x16x16xf32>
    %819 = vector.shape_cast %818 : vector<1x16x16xf32> to vector<16x16xf32>
    %820 = vector.broadcast %817 : f32 to vector<16x16xf32>
    %821 = arith.mulf %820, %819 : vector<16x16xf32>
    %822 = arith.addf %798, %821 : vector<16x16xf32>
    %c76 = arith.constant 76 : index
    %823 = memref.load %arg1[%c76] : memref<98xf32, #tpu.memory_space<smem>>
    %c13_538 = arith.constant 13 : index
    %c3_539 = arith.constant 3 : index
    %c0_540 = arith.constant 0 : index
    %824 = vector.load %arg6[%c13_538, %c3_539, %c0_540] : memref<14x22x16xf32, #tpu.memory_space<vmem>>, vector<1x16x16xf32>
    %825 = vector.shape_cast %824 : vector<1x16x16xf32> to vector<16x16xf32>
    %826 = vector.broadcast %823 : f32 to vector<16x16xf32>
    %827 = arith.mulf %826, %825 : vector<16x16xf32>
    %828 = arith.addf %804, %827 : vector<16x16xf32>
    %c83 = arith.constant 83 : index
    %829 = memref.load %arg1[%c83] : memref<98xf32, #tpu.memory_space<smem>>
    %c13_541 = arith.constant 13 : index
    %c4_542 = arith.constant 4 : index
    %c0_543 = arith.constant 0 : index
    %830 = vector.load %arg6[%c13_541, %c4_542, %c0_543] : memref<14x22x16xf32, #tpu.memory_space<vmem>>, vector<1x16x16xf32>
    %831 = vector.shape_cast %830 : vector<1x16x16xf32> to vector<16x16xf32>
    %832 = vector.broadcast %829 : f32 to vector<16x16xf32>
    %833 = arith.mulf %832, %831 : vector<16x16xf32>
    %834 = arith.addf %810, %833 : vector<16x16xf32>
    %c90 = arith.constant 90 : index
    %835 = memref.load %arg1[%c90] : memref<98xf32, #tpu.memory_space<smem>>
    %c13_544 = arith.constant 13 : index
    %c5_545 = arith.constant 5 : index
    %c0_546 = arith.constant 0 : index
    %836 = vector.load %arg6[%c13_544, %c5_545, %c0_546] : memref<14x22x16xf32, #tpu.memory_space<vmem>>, vector<1x16x16xf32>
    %837 = vector.shape_cast %836 : vector<1x16x16xf32> to vector<16x16xf32>
    %838 = vector.broadcast %835 : f32 to vector<16x16xf32>
    %839 = arith.mulf %838, %837 : vector<16x16xf32>
    %840 = arith.addf %816, %839 : vector<16x16xf32>
    %c97 = arith.constant 97 : index
    %841 = memref.load %arg1[%c97] : memref<98xf32, #tpu.memory_space<smem>>
    %c13_547 = arith.constant 13 : index
    %c6_548 = arith.constant 6 : index
    %c0_549 = arith.constant 0 : index
    %842 = vector.load %arg6[%c13_547, %c6_548, %c0_549] : memref<14x22x16xf32, #tpu.memory_space<vmem>>, vector<1x16x16xf32>
    %843 = vector.shape_cast %842 : vector<1x16x16xf32> to vector<16x16xf32>
    %844 = vector.broadcast %841 : f32 to vector<16x16xf32>
    %845 = arith.mulf %844, %843 : vector<16x16xf32>
    %846 = arith.addf %822, %845 : vector<16x16xf32>
    %847 = arith.addf %840, %846 : vector<16x16xf32>
    %848 = arith.addf %828, %834 : vector<16x16xf32>
    %849 = arith.addf %847, %848 : vector<16x16xf32>
    %cst_550 = arith.constant 0.000000e+00 : f32
    %850 = vector.broadcast %cst_550 : f32 to vector<16x16xf32>
    %851 = arith.subf %850, %849 : vector<16x16xf32>
    %852 = math.exp %851 : vector<16x16xf32>
    %cst_551 = arith.constant 1.000000e+00 : f32
    %853 = vector.broadcast %cst_551 : f32 to vector<16x16xf32>
    %854 = arith.addf %853, %852 : vector<16x16xf32>
    %855 = tpu.reciprocal %854 {approx = true} : vector<16x16xf32> -> vector<16x16xf32>
    %c0_552 = arith.constant 0 : index
    %c0_553 = arith.constant 0 : index
    %856 = vector.load %arg7[%c0_552, %c0_553] : memref<16x16xf32, #tpu.memory_space<vmem>>, vector<16x16xf32>
    tpu.vector_store %arg7[%c0_552, %c0_553], %855 {strides = array<i32>} : memref<16x16xf32, #tpu.memory_space<vmem>>, vector<16x16xf32>,
    %c0_554 = arith.constant 0 : index
    %c0_555 = arith.constant 0 : index
    %857 = vector.load %arg7[%c0_554, %c0_555] : memref<16x16xf32, #tpu.memory_space<vmem>>, vector<1x16xf32>
    %858 = vector.shape_cast %857 : vector<1x16xf32> to vector<16xf32>
    %c0_556 = arith.constant 0 : index
    %c0_557 = arith.constant 0 : index
    %c0_558 = arith.constant 0 : index
    %859 = vector.load %arg3[%c0_556, %c0_557, %c0_558] : memref<1x1x256xf32, #tpu.memory_space<vmem>>, vector<1x1x16xf32>
    %860 = vector.shape_cast %859 : vector<1x1x16xf32> to vector<16xf32>
    %861 = vector.shape_cast %858 : vector<16xf32> to vector<1x1x16xf32>
    tpu.vector_store %arg3[%c0_556, %c0_557, %c0_558], %861 {strides = array<i32>} : memref<1x1x256xf32, #tpu.memory_space<vmem>>, vector<1x1x16xf32>,
    %c1_559 = arith.constant 1 : index
    %c0_560 = arith.constant 0 : index
    %862 = vector.load %arg7[%c1_559, %c0_560] : memref<16x16xf32, #tpu.memory_space<vmem>>, vector<1x16xf32>
    %863 = vector.shape_cast %862 : vector<1x16xf32> to vector<16xf32>
    %c0_561 = arith.constant 0 : index
    %c0_562 = arith.constant 0 : index
    %c16_563 = arith.constant 16 : index
    %864 = vector.load %arg3[%c0_561, %c0_562, %c16_563] : memref<1x1x256xf32, #tpu.memory_space<vmem>>, vector<1x1x16xf32>
    %865 = vector.shape_cast %864 : vector<1x1x16xf32> to vector<16xf32>
    %866 = vector.shape_cast %863 : vector<16xf32> to vector<1x1x16xf32>
    tpu.vector_store %arg3[%c0_561, %c0_562, %c16_563], %866 {strides = array<i32>} : memref<1x1x256xf32, #tpu.memory_space<vmem>>, vector<1x1x16xf32>,
    %c2_564 = arith.constant 2 : index
    %c0_565 = arith.constant 0 : index
    %867 = vector.load %arg7[%c2_564, %c0_565] : memref<16x16xf32, #tpu.memory_space<vmem>>, vector<1x16xf32>
    %868 = vector.shape_cast %867 : vector<1x16xf32> to vector<16xf32>
    %c0_566 = arith.constant 0 : index
    %c0_567 = arith.constant 0 : index
    %c32_568 = arith.constant 32 : index
    %869 = vector.load %arg3[%c0_566, %c0_567, %c32_568] : memref<1x1x256xf32, #tpu.memory_space<vmem>>, vector<1x1x16xf32>
    %870 = vector.shape_cast %869 : vector<1x1x16xf32> to vector<16xf32>
    %871 = vector.shape_cast %868 : vector<16xf32> to vector<1x1x16xf32>
    tpu.vector_store %arg3[%c0_566, %c0_567, %c32_568], %871 {strides = array<i32>} : memref<1x1x256xf32, #tpu.memory_space<vmem>>, vector<1x1x16xf32>,
    %c3_569 = arith.constant 3 : index
    %c0_570 = arith.constant 0 : index
    %872 = vector.load %arg7[%c3_569, %c0_570] : memref<16x16xf32, #tpu.memory_space<vmem>>, vector<1x16xf32>
    %873 = vector.shape_cast %872 : vector<1x16xf32> to vector<16xf32>
    %c0_571 = arith.constant 0 : index
    %c0_572 = arith.constant 0 : index
    %c48_573 = arith.constant 48 : index
    %874 = vector.load %arg3[%c0_571, %c0_572, %c48_573] : memref<1x1x256xf32, #tpu.memory_space<vmem>>, vector<1x1x16xf32>
    %875 = vector.shape_cast %874 : vector<1x1x16xf32> to vector<16xf32>
    %876 = vector.shape_cast %873 : vector<16xf32> to vector<1x1x16xf32>
    tpu.vector_store %arg3[%c0_571, %c0_572, %c48_573], %876 {strides = array<i32>} : memref<1x1x256xf32, #tpu.memory_space<vmem>>, vector<1x1x16xf32>,
    %c4_574 = arith.constant 4 : index
    %c0_575 = arith.constant 0 : index
    %877 = vector.load %arg7[%c4_574, %c0_575] : memref<16x16xf32, #tpu.memory_space<vmem>>, vector<1x16xf32>
    %878 = vector.shape_cast %877 : vector<1x16xf32> to vector<16xf32>
    %c0_576 = arith.constant 0 : index
    %c0_577 = arith.constant 0 : index
    %c64_578 = arith.constant 64 : index
    %879 = vector.load %arg3[%c0_576, %c0_577, %c64_578] : memref<1x1x256xf32, #tpu.memory_space<vmem>>, vector<1x1x16xf32>
    %880 = vector.shape_cast %879 : vector<1x1x16xf32> to vector<16xf32>
    %881 = vector.shape_cast %878 : vector<16xf32> to vector<1x1x16xf32>
    tpu.vector_store %arg3[%c0_576, %c0_577, %c64_578], %881 {strides = array<i32>} : memref<1x1x256xf32, #tpu.memory_space<vmem>>, vector<1x1x16xf32>,
    %c5_579 = arith.constant 5 : index
    %c0_580 = arith.constant 0 : index
    %882 = vector.load %arg7[%c5_579, %c0_580] : memref<16x16xf32, #tpu.memory_space<vmem>>, vector<1x16xf32>
    %883 = vector.shape_cast %882 : vector<1x16xf32> to vector<16xf32>
    %c0_581 = arith.constant 0 : index
    %c0_582 = arith.constant 0 : index
    %c80_583 = arith.constant 80 : index
    %884 = vector.load %arg3[%c0_581, %c0_582, %c80_583] : memref<1x1x256xf32, #tpu.memory_space<vmem>>, vector<1x1x16xf32>
    %885 = vector.shape_cast %884 : vector<1x1x16xf32> to vector<16xf32>
    %886 = vector.shape_cast %883 : vector<16xf32> to vector<1x1x16xf32>
    tpu.vector_store %arg3[%c0_581, %c0_582, %c80_583], %886 {strides = array<i32>} : memref<1x1x256xf32, #tpu.memory_space<vmem>>, vector<1x1x16xf32>,
    %c6_584 = arith.constant 6 : index
    %c0_585 = arith.constant 0 : index
    %887 = vector.load %arg7[%c6_584, %c0_585] : memref<16x16xf32, #tpu.memory_space<vmem>>, vector<1x16xf32>
    %888 = vector.shape_cast %887 : vector<1x16xf32> to vector<16xf32>
    %c0_586 = arith.constant 0 : index
    %c0_587 = arith.constant 0 : index
    %c96_588 = arith.constant 96 : index
    %889 = vector.load %arg3[%c0_586, %c0_587, %c96_588] : memref<1x1x256xf32, #tpu.memory_space<vmem>>, vector<1x1x16xf32>
    %890 = vector.shape_cast %889 : vector<1x1x16xf32> to vector<16xf32>
    %891 = vector.shape_cast %888 : vector<16xf32> to vector<1x1x16xf32>
    tpu.vector_store %arg3[%c0_586, %c0_587, %c96_588], %891 {strides = array<i32>} : memref<1x1x256xf32, #tpu.memory_space<vmem>>, vector<1x1x16xf32>,
    %c7_589 = arith.constant 7 : index
    %c0_590 = arith.constant 0 : index
    %892 = vector.load %arg7[%c7_589, %c0_590] : memref<16x16xf32, #tpu.memory_space<vmem>>, vector<1x16xf32>
    %893 = vector.shape_cast %892 : vector<1x16xf32> to vector<16xf32>
    %c0_591 = arith.constant 0 : index
    %c0_592 = arith.constant 0 : index
    %c112_593 = arith.constant 112 : index
    %894 = vector.load %arg3[%c0_591, %c0_592, %c112_593] : memref<1x1x256xf32, #tpu.memory_space<vmem>>, vector<1x1x16xf32>
    %895 = vector.shape_cast %894 : vector<1x1x16xf32> to vector<16xf32>
    %896 = vector.shape_cast %893 : vector<16xf32> to vector<1x1x16xf32>
    tpu.vector_store %arg3[%c0_591, %c0_592, %c112_593], %896 {strides = array<i32>} : memref<1x1x256xf32, #tpu.memory_space<vmem>>, vector<1x1x16xf32>,
    %c8_594 = arith.constant 8 : index
    %c0_595 = arith.constant 0 : index
    %897 = vector.load %arg7[%c8_594, %c0_595] : memref<16x16xf32, #tpu.memory_space<vmem>>, vector<1x16xf32>
    %898 = vector.shape_cast %897 : vector<1x16xf32> to vector<16xf32>
    %c0_596 = arith.constant 0 : index
    %c0_597 = arith.constant 0 : index
    %c128_598 = arith.constant 128 : index
    %899 = vector.load %arg3[%c0_596, %c0_597, %c128_598] : memref<1x1x256xf32, #tpu.memory_space<vmem>>, vector<1x1x16xf32>
    %900 = vector.shape_cast %899 : vector<1x1x16xf32> to vector<16xf32>
    %901 = vector.shape_cast %898 : vector<16xf32> to vector<1x1x16xf32>
    tpu.vector_store %arg3[%c0_596, %c0_597, %c128_598], %901 {strides = array<i32>} : memref<1x1x256xf32, #tpu.memory_space<vmem>>, vector<1x1x16xf32>,
    %c9_599 = arith.constant 9 : index
    %c0_600 = arith.constant 0 : index
    %902 = vector.load %arg7[%c9_599, %c0_600] : memref<16x16xf32, #tpu.memory_space<vmem>>, vector<1x16xf32>
    %903 = vector.shape_cast %902 : vector<1x16xf32> to vector<16xf32>
    %c0_601 = arith.constant 0 : index
    %c0_602 = arith.constant 0 : index
    %c144_603 = arith.constant 144 : index
    %904 = vector.load %arg3[%c0_601, %c0_602, %c144_603] : memref<1x1x256xf32, #tpu.memory_space<vmem>>, vector<1x1x16xf32>
    %905 = vector.shape_cast %904 : vector<1x1x16xf32> to vector<16xf32>
    %906 = vector.shape_cast %903 : vector<16xf32> to vector<1x1x16xf32>
    tpu.vector_store %arg3[%c0_601, %c0_602, %c144_603], %906 {strides = array<i32>} : memref<1x1x256xf32, #tpu.memory_space<vmem>>, vector<1x1x16xf32>,
    %c10_604 = arith.constant 10 : index
    %c0_605 = arith.constant 0 : index
    %907 = vector.load %arg7[%c10_604, %c0_605] : memref<16x16xf32, #tpu.memory_space<vmem>>, vector<1x16xf32>
    %908 = vector.shape_cast %907 : vector<1x16xf32> to vector<16xf32>
    %c0_606 = arith.constant 0 : index
    %c0_607 = arith.constant 0 : index
    %c160_608 = arith.constant 160 : index
    %909 = vector.load %arg3[%c0_606, %c0_607, %c160_608] : memref<1x1x256xf32, #tpu.memory_space<vmem>>, vector<1x1x16xf32>
    %910 = vector.shape_cast %909 : vector<1x1x16xf32> to vector<16xf32>
    %911 = vector.shape_cast %908 : vector<16xf32> to vector<1x1x16xf32>
    tpu.vector_store %arg3[%c0_606, %c0_607, %c160_608], %911 {strides = array<i32>} : memref<1x1x256xf32, #tpu.memory_space<vmem>>, vector<1x1x16xf32>,
    %c11_609 = arith.constant 11 : index
    %c0_610 = arith.constant 0 : index
    %912 = vector.load %arg7[%c11_609, %c0_610] : memref<16x16xf32, #tpu.memory_space<vmem>>, vector<1x16xf32>
    %913 = vector.shape_cast %912 : vector<1x16xf32> to vector<16xf32>
    %c0_611 = arith.constant 0 : index
    %c0_612 = arith.constant 0 : index
    %c176_613 = arith.constant 176 : index
    %914 = vector.load %arg3[%c0_611, %c0_612, %c176_613] : memref<1x1x256xf32, #tpu.memory_space<vmem>>, vector<1x1x16xf32>
    %915 = vector.shape_cast %914 : vector<1x1x16xf32> to vector<16xf32>
    %916 = vector.shape_cast %913 : vector<16xf32> to vector<1x1x16xf32>
    tpu.vector_store %arg3[%c0_611, %c0_612, %c176_613], %916 {strides = array<i32>} : memref<1x1x256xf32, #tpu.memory_space<vmem>>, vector<1x1x16xf32>,
    %c12_614 = arith.constant 12 : index
    %c0_615 = arith.constant 0 : index
    %917 = vector.load %arg7[%c12_614, %c0_615] : memref<16x16xf32, #tpu.memory_space<vmem>>, vector<1x16xf32>
    %918 = vector.shape_cast %917 : vector<1x16xf32> to vector<16xf32>
    %c0_616 = arith.constant 0 : index
    %c0_617 = arith.constant 0 : index
    %c192_618 = arith.constant 192 : index
    %919 = vector.load %arg3[%c0_616, %c0_617, %c192_618] : memref<1x1x256xf32, #tpu.memory_space<vmem>>, vector<1x1x16xf32>
    %920 = vector.shape_cast %919 : vector<1x1x16xf32> to vector<16xf32>
    %921 = vector.shape_cast %918 : vector<16xf32> to vector<1x1x16xf32>
    tpu.vector_store %arg3[%c0_616, %c0_617, %c192_618], %921 {strides = array<i32>} : memref<1x1x256xf32, #tpu.memory_space<vmem>>, vector<1x1x16xf32>,
    %c13_619 = arith.constant 13 : index
    %c0_620 = arith.constant 0 : index
    %922 = vector.load %arg7[%c13_619, %c0_620] : memref<16x16xf32, #tpu.memory_space<vmem>>, vector<1x16xf32>
    %923 = vector.shape_cast %922 : vector<1x16xf32> to vector<16xf32>
    %c0_621 = arith.constant 0 : index
    %c0_622 = arith.constant 0 : index
    %c208_623 = arith.constant 208 : index
    %924 = vector.load %arg3[%c0_621, %c0_622, %c208_623] : memref<1x1x256xf32, #tpu.memory_space<vmem>>, vector<1x1x16xf32>
    %925 = vector.shape_cast %924 : vector<1x1x16xf32> to vector<16xf32>
    %926 = vector.shape_cast %923 : vector<16xf32> to vector<1x1x16xf32>
    tpu.vector_store %arg3[%c0_621, %c0_622, %c208_623], %926 {strides = array<i32>} : memref<1x1x256xf32, #tpu.memory_space<vmem>>, vector<1x1x16xf32>,
    %c14_624 = arith.constant 14 : index
    %c0_625 = arith.constant 0 : index
    %927 = vector.load %arg7[%c14_624, %c0_625] : memref<16x16xf32, #tpu.memory_space<vmem>>, vector<1x16xf32>
    %928 = vector.shape_cast %927 : vector<1x16xf32> to vector<16xf32>
    %c0_626 = arith.constant 0 : index
    %c0_627 = arith.constant 0 : index
    %c224_628 = arith.constant 224 : index
    %929 = vector.load %arg3[%c0_626, %c0_627, %c224_628] : memref<1x1x256xf32, #tpu.memory_space<vmem>>, vector<1x1x16xf32>
    %930 = vector.shape_cast %929 : vector<1x1x16xf32> to vector<16xf32>
    %931 = vector.shape_cast %928 : vector<16xf32> to vector<1x1x16xf32>
    tpu.vector_store %arg3[%c0_626, %c0_627, %c224_628], %931 {strides = array<i32>} : memref<1x1x256xf32, #tpu.memory_space<vmem>>, vector<1x1x16xf32>,
    %c15_629 = arith.constant 15 : index
    %c0_630 = arith.constant 0 : index
    %932 = vector.load %arg7[%c15_629, %c0_630] : memref<16x16xf32, #tpu.memory_space<vmem>>, vector<1x16xf32>
    %933 = vector.shape_cast %932 : vector<1x16xf32> to vector<16xf32>
    %c0_631 = arith.constant 0 : index
    %c0_632 = arith.constant 0 : index
    %c240_633 = arith.constant 240 : index
    %934 = vector.load %arg3[%c0_631, %c0_632, %c240_633] : memref<1x1x256xf32, #tpu.memory_space<vmem>>, vector<1x1x16xf32>
    %935 = vector.shape_cast %934 : vector<1x1x16xf32> to vector<16xf32>
    %936 = vector.shape_cast %933 : vector<16xf32> to vector<1x1x16xf32>
    tpu.vector_store %arg3[%c0_631, %c0_632, %c240_633], %936 {strides = array<i32>} : memref<1x1x256xf32, #tpu.memory_space<vmem>>, vector<1x1x16xf32>,
    return
  }
  func.func @transform_0(%arg0: i32) -> i32 {
    %c0_i32 = arith.constant 0 : i32
    %c0_i32_0 = arith.constant 0 : i32
    return %c0_i32 : i32
  }
  func.func @transform_1(%arg0: i32) -> (i32, i32, i32) {
    %c0_i32 = arith.constant 0 : i32
    %c0_i32_0 = arith.constant 0 : i32
    %c0_i32_1 = arith.constant 0 : i32
    return %arg0, %c0_i32, %c0_i32_0 : i32, i32, i32
  }
  func.func @transform_2(%arg0: i32) -> (i32, i32, i32) {
    %c0_i32 = arith.constant 0 : i32
    %c0_i32_0 = arith.constant 0 : i32
    %c0_i32_1 = arith.constant 0 : i32
    return %arg0, %c0_i32, %c0_i32_0 : i32, i32, i32
  }
}

</mosaic_0001>

<bundles_post_ra>
// kernel: spatial_attention_pallas.1
= control target key start
LH: loop header
LB: loop body
LE: loop exit
PB: predicated region body
PF: predicated region fallthrough
CT: control target
= control target key end

     0   :  { %s3218_s0 = inlined_call_operand.vmem [shape: f32[98], index: 0, kind: input, shape index: {}]   ;;  %s3219_s1 = inlined_call_operand.vmem [shape: f32[2,4,256], index: 1, kind: input, shape index: {}]   ;;  %s3220_s2 = inlined_call_operand.vmem [shape: f32[2,1,256], index: 2, kind: output, shape index: {}]  }
   0x1   :  { %3320 = sst [smem:[#allocation96_spill]] %s3218_s0 }
   0x2   :  { %3321 = sst [smem:[#allocation97_spill]] %s3219_s1 }
   0x3   :  { %3322 = sst [smem:[#allocation98_spill]] %s3220_s2 }
   0x4   :  { %7 = vsyncpa [#allocation7], 0  ;;  %s2204_s9 = smov 0  }
   0x5 LB: > { %3323 = sst [smem:[#allocation9_spill]] %s2163_s9  ;;  %s2210_s10 = sadd.s32 4294967295, %s2163_s9   ;;  %s2163_s9 = sphi %s2204_s9, %s13_s9  }
   0x6   : > { %p1930_p0 = scmp.ge.s32.totalorder %s2163_s9, 1  ;;  %p91_p1 = scmp.lt.s32.totalorder %s2163_s9, 3 }
   0x7   : > { %s3324_s0 = sld [smem:[#allocation96_spill]]  ;;  %p2096_p4 = scmp.eq.s32.totalorder %s2210_s10, 0 }
   0x8   : > { %p2218_p3 = pnand %p1930_p0, %p91_p1 }
   0xa   : > { %p2092_p5 = pneg %p2218_p3 }
   0xc   : > { %p2093_p6 = pnand %p2096_p4, %p2092_p5 }
   0xd   : > { %s104_s13 = sshll.u32 %s3324_s0, 4  ;;  %s105_s13 = int_to_ptr.vmem [resolvable:$true] %s104_s13 }
   0xe   : > { %s2138_s15 = scalar_lea.vmem %s105_s13, 16  ;;  %p2140_p8 = pneg %p2093_p6 }
   0xf   : > { %p2139_p7 = scmp.ne.s32.totalorder %s105_s13, %s2138_s15  ;;  %p2146_p11 = scmp.lt.s32.totalorder %s105_s13, %s105_s13 }
  0x10   : > { %p2147_p12 = scmp.lt.s32.totalorder %s2138_s15, %s2138_s15 }
  0x11   : > { %p2141_p9 = pnand %p2140_p8, %p2139_p7 }
  0x12   : > { %p2148_p13 = por %p2147_p12, %p2146_p11 }
  0x13   : > { %p2142_p10 = pneg %p2141_p9 }
  0x15   : > { %p2149_p2 = pnand %p2148_p13, %p2142_p10 }
  0x17   : > { %2152 = shalt.err (!%p2149_p2)
}
  0x18   : > { %s2165_s16 = smov [#allocation6]   ;;  %125 = sbr.rel (%p2218_p3) target bundleno = 678 (0x2a6), region = 28 }
  0x19   : > { %2095 = dma.vmem_to_smem (!%p2093_p6), %s105_s13, 16, %s2165_s16, [#allocation7]  }
  0x1f   : > { %2158 = dma.done.wait (%p2096_p4), [#allocation7], 16  }
  0x20   : > { %2160 = vsyncadd (%p2096_p4), [#allocation7], 4294967280 }
  0x21   : > { %131 = sfence }
  0x22   : > { %p147_p0 = scmp.lt.s32.totalorder %s2210_s10, 1  ;;  %s3326_s1 = sld [smem:[#allocation97_spill]] }
  0x23   : > { %s3327_s2 = sld [smem:[#allocation98_spill]]  ;;  %p3329_p1 = scmp.ne.s32.totalorder %s2210_s10, 0 }
  0x24   : > { %s148_s17 = scalar_select %p147_p0, %s2210_s10, 1 }
  0x25   : > { %159 = sbr.rel (%p3329_p1) target bundleno = 44 (0x2c), region = 36  ;;  %vm160_vm0 = vcmask (!%p3329_p1), 179200   ;;  %vm163_vm1 = vcmask (!%p3329_p1), 177152   ;;  %v2166_v0 = vmov (!%p3329_p1), 0.0  }
  0x26   : > { %s2087_s18 = sshll.u32 %s148_s17, 3  ;;  %s1937_s19 = sshll.u32 %s148_s17, 1  ;;  %161 = vst.msk [vmem:[#allocation2] sm:$0xff] (!%p3329_p1), %vm160_vm0, %v2166_v0  ;;  %162 = vst.msk [vmem:[#allocation2 + $0x8] sm:$0xff] (!%p3329_p1), %vm160_vm0, %v2166_v0 }
  0x27   : > { %165 = vst.msk [vmem:[#allocation2 + $0x18] sm:$0xff] (!%p3329_p1), %vm160_vm0, %v2166_v0  ;;  %166 = vst.msk [vmem:[#allocation2 + $0x20] sm:$0xff] (!%p3329_p1), %vm160_vm0, %v2166_v0 }
  0x28   : > { %s151_s22 = scalar_lea.vmem %s3326_s1, %s2087_s18  ;;  %164 = vst.msk [vmem:[#allocation2 + $0x10] sm:$0x3f] (!%p3329_p1), %vm163_vm1, %v2166_v0  ;;  %167 = vst.msk [vmem:[#allocation2 + $0x28] sm:$0x3f] (!%p3329_p1), %vm163_vm1, %v2166_v0 }
  0x29   : > { %s2241_s25 = scalar_lea.vmem %s3327_s2, %s1937_s19 }
  0x2a   : > { %3328 = sst [smem:[#allocation10_spill]] %s2241_s25 }
  0x2c PF: > { %v168_v1 = vld [vmem:[%s151_s22] ss:$4 sm:$0x3]  ;;  %v1939_v2 = vld [vmem:[%s151_s22 + $0x1] ss:$4 sm:$0x3]  ;;  %v3300_v7 = vlaneseq }
  0x2d   : > { %v171_v3 = vadd.f32 %v1939_v2, %v168_v1  ;;  %v1940_v4 = vld [vmem:[%s151_s22 + $0x2] ss:$4 sm:$0x3]  ;;  %v172_v5 = vmax.f32 %v168_v1, %v1939_v2  ;;  %v1941_v6 = vld [vmem:[%s151_s22 + $0x3] ss:$4 sm:$0x3] }
  0x2e   : > { %vm184_vm2 = vcmp.lt.s32.totalorder %v3300_v7, 256  ;;  %s2167_s26 = smov 99   ;;  %s2168_s27 = smov 3   ;;  %vm198_vm3 = vcmask 147480   ;;  %vm514_vm4 = vcmask 130048   ;;  %vm517_vm5 = vcmask 128000  }
  0x2f   : > { %v175_v8 = vadd.f32 %v1940_v4, %v171_v3  ;;  %v176_v9 = vmax.f32 %v172_v5, %v1940_v4  ;;  %s2169_s28 = smov 83   ;;  %s2170_s29 = smov 115  }
  0x30   : > { %s2171_s30 = smov 51   ;;  %s2172_s3 = smov 67  }
  0x31   : > { %v179_v10 = vadd.f32 %v1941_v6, %v175_v8  ;;  %v180_v11 = vmax.f32 %v176_v9, %v1941_v6  ;;  %s2173_s4 = smov 19   ;;  %s2174_s5 = smov 35  }
  0x32   : > { %s2175_s6 = smov 127   ;;  %s2176_s7 = smov 126  }
  0x33   : > { %v181_v12 = vmul.f32 0.25, %v179_v10  ;;  %188 = vst.msk [vmem:[#allocation3 + $0x1] ss:$2 sm:$0x3] %vm184_vm2, %v180_v11  ;;  %s2177_s8 = smov 125   ;;  %s2178_s10 = smov 124  }
  0x34   : > { %s2179_s11 = smov 123   ;;  %s2180_s12 = smov 122  }
  0x35   : > { %186 = vst.msk [vmem:[#allocation3] ss:$2 sm:$0x3] %vm184_vm2, %v181_v12  ;;  %s2337_s13 = sld [smem:[#allocation6 + $0x15]]  ;;  %s2339_s14 = sld [smem:[#allocation6]] }
  0x36   : > { %s2341_s15 = sld [smem:[#allocation6 + $0x7]]  ;;  %s2343_s16 = sld [smem:[#allocation6 + $0xe]] }
  0x37   : > { %s2345_s17 = sld [smem:[#allocation6 + $0x1c]]  ;;  %s2347_s18 = sld [smem:[#allocation6 + $0x23]] }
  0x38   : > { %s2349_s19 = sld [smem:[#allocation6 + $0x2a]]  ;;  %s2351_s20 = sld [smem:[#allocation6 + $0x31]] }
  0x39   : > { %s2353_s21 = sld [smem:[#allocation6 + $0x38]]  ;;  %s2355_s22 = sld [smem:[#allocation6 + $0x3f]] }
  0x3a   : > { %v1959_v15 = vld [vmem:[#allocation3 + $0x1] ss:$0 sm:$0xff]  ;;  %v1967_v16 = vld [vmem:[#allocation3 + $0x3] ss:$0 sm:$0xff]  ;;  %s2357_s23 = sld [smem:[#allocation6 + $0x46]]  ;;  %s2359_s24 = sld [smem:[#allocation6 + $0x4d]] }
  0x3b   : > { %s2389_s0 = sld [smem:[#allocation6 + $0x56]]  ;;  %s2391_s1 = sld [smem:[#allocation6 + $0x5d]] }
  0x3c   : > { %v1944_v13 = vld [vmem:[#allocation3] ss:$0 sm:$0xff]  ;;  %v1951_v14 = vld [vmem:[#allocation3 + $0x2] ss:$0 sm:$0xff]  ;;  %s2393_s2 = sld [smem:[#allocation6 + $0x1]]  ;;  %s2395_s9 = sld [smem:[#allocation6 + $0x8]]  ;;  %v765_v8 = vstv %s2341_s15  ;;  %v773_v9 = vstv %s2343_s16 }
  0x3d   : > { %216 = vrot.lane.b32.xlu1 %v1944_v13, %s2167_s26  ;;  %195 = vrot.lane.b32.xlu0 %v1944_v13, %s2168_s27  ;;  %s2397_s25 = sld [smem:[#allocation6 + $0xf]]  ;;  %v789_v12 = vstv %s2345_s17  ;;  %s2444_s15 = sld [smem:[#allocation6 + $0xb]] }
  0x3e   : > { %s2446_s16 = sld [smem:[#allocation6 + $0x12]]  ;;  %s2449_s17 = sld [smem:[#allocation6 + $0x19]] }
  0x41   : > { %226 = vrot.lane.b32.xlu1 %v1944_v13, %s2169_s28  ;;  %206 = vrot.lane.b32.xlu0 %v1944_v13, %s2170_s29  ;;  %3342 = sst [smem:[#allocation23_spill]] %s2389_s0  ;;  %s2409_s0 = sld [smem:[#allocation6 + $0x9]] }
  0x42   : > { %3343 = sst [smem:[#allocation24_spill]] %s2391_s1  ;;  %s2411_s1 = sld [smem:[#allocation6 + $0x10]] }
  0x43   : > { %3344 = sst [smem:[#allocation25_spill]] %s2393_s2  ;;  %s2413_s2 = sld [smem:[#allocation6 + $0x17]] }
  0x44   : > { %3345 = sst [smem:[#allocation26_spill]] %s2395_s9  ;;  %s2415_s9 = sld [smem:[#allocation6 + $0x1e]] }
  0x45   : > { %246 = vrot.lane.b32.xlu1 %v1944_v13, %s2171_s30  ;;  %236 = vrot.lane.b32.xlu0 %v1944_v13, %s2172_s3  ;;  %3346 = sst [smem:[#allocation27_spill]] %s2397_s25  ;;  %s2417_s25 = sld [smem:[#allocation6 + $0x25]] }
  0x46   : > { %3366 = sst [smem:[#allocation47_spill]] %s2444_s15  ;;  %s2506_s15 = sld [smem:[#allocation6 + $0x1b]] }
  0x47   : > { %3352 = sst [smem:[#allocation33_spill]] %s2409_s0  ;;  %s2653_s0 = sld [smem:[#allocation6 + $0x3e]] }
  0x48   : > { %3353 = sst [smem:[#allocation34_spill]] %s2411_s1 }
  0x49   : > { %266 = vrot.lane.b32.xlu1 %v1944_v13, %s2173_s4  ;;  %256 = vrot.lane.b32.xlu0 %v1944_v13, %s2174_s5  ;;  %3354 = sst [smem:[#allocation35_spill]] %s2413_s2  ;;  %s2425_s1 = sld [smem:[#allocation6 + $0x11]]  ;;  %v797_v13 = vstv %s2347_s18 }
  0x4a   : > { %3355 = sst [smem:[#allocation36_spill]] %s2415_s9  ;;  %s2427_s9 = sld [smem:[#allocation6 + $0x18]] }
  0x4b   : > { %3356 = sst [smem:[#allocation37_spill]] %s2417_s25  ;;  %s2433_s25 = sld [smem:[#allocation6 + $0x26]] }
  0x4c   : > { %3367 = sst [smem:[#allocation48_spill]] %s2446_s16  ;;  %s2451_s18 = sld [smem:[#allocation6 + $0x20]] }
  0x4d   : > { %286 = vrot.lane.b32.xlu1 %v1951_v14, %s2170_s29  ;;  %276 = vrot.lane.b32.xlu0 %v1951_v14, %s2168_s27  ;;  %3368 = sst [smem:[#allocation49_spill]] %s2449_s17  ;;  %s2464_s17 = sld [smem:[#allocation6 + $0x13]] }
  0x4e   : > { %s2466_s16 = sld [smem:[#allocation6 + $0x1a]]  ;;  %3388 = sst [smem:[#allocation63_spill]] %s2506_s15 }
  0x4f   : > { %3360 = sst [smem:[#allocation41_spill]] %s2425_s1  ;;  %s2440_s1 = sld [smem:[#allocation6 + $0x4]] }
  0x50   : > { %3361 = sst [smem:[#allocation42_spill]] %s2427_s9 }
  0x51   : > { %306 = vrot.lane.b32.xlu1 %v1951_v14, %s2169_s28  ;;  %296 = vrot.lane.b32.xlu0 %v1951_v14, %s2167_s26  ;;  %3363 = sst [smem:[#allocation44_spill]] %s2433_s25  ;;  %s2673_s9 = sld [smem:[#allocation6 + $0x61]] }
  0x52   : > { %3369 = sst [smem:[#allocation50_spill]] %s2451_s18  ;;  %s2462_s18 = sld [smem:[#allocation6 + $0xc]] }
  0x53   : > { %3374 = sst [smem:[#allocation55_spill]] %s2464_s17 }
  0x54   : > { %3375 = sst [smem:[#allocation56_spill]] %s2466_s16  ;;  %s2489_s16 = sld [smem:[#allocation6 + $0x6]] }
  0x55   : > { %326 = vrot.lane.b32.xlu1 %v1951_v14, %s2171_s30  ;;  %316 = vrot.lane.b32.xlu0 %v1951_v14, %s2172_s3  ;;  %3365 = sst [smem:[#allocation46_spill]] %s2440_s1  ;;  %s2508_s1 = sld [smem:[#allocation6 + $0x22]] }
  0x58   : > { %3373 = sst [smem:[#allocation54_spill]] %s2462_s18 }
  0x59   : > { %346 = vrot.lane.b32.xlu1 %v1951_v14, %s2173_s4  ;;  %336 = vrot.lane.b32.xlu0 %v1951_v14, %s2174_s5  ;;  %v805_v14 = vstv %s2349_s19  ;;  %s2460_s19 = sld [smem:[#allocation6 + $0x5]] }
  0x5a   : > { %3379 = sst [smem:[#allocation60_spill]] %s2489_s16  ;;  %s2498_s18 = sld [smem:[#allocation6 + $0xd]] }
  0x5d   : > { %367 = vrot.lane.b32.xlu1 %v1959_v15, %s2170_s29  ;;  %356 = vrot.lane.b32.xlu0 %v1959_v15, %s2168_s27 }
  0x5f   : > { %3372 = sst [smem:[#allocation53_spill]] %s2460_s19 }
  0x60   : > { %3383 = sst [smem:[#allocation61_spill]] %s2498_s18  ;;  %s3500_s18 = sld [smem:[#allocation34_spill]] }
  0x61   : > { %387 = vrot.lane.b32.xlu1 %v1959_v15, %s2169_s28  ;;  %377 = vrot.lane.b32.xlu0 %v1959_v15, %s2167_s26  ;;  %s2500_s19 = sld [smem:[#allocation6 + $0x14]] }
  0x65   : > { %407 = vrot.lane.b32.xlu1 %v1959_v15, %s2171_s30  ;;  %397 = vrot.lane.b32.xlu0 %v1959_v15, %s2172_s3 }
  0x67   : > { %3384 = sst [smem:[#allocation62_spill]] %s2500_s19  ;;  %s3501_s19 = sld [smem:[#allocation35_spill]] }
  0x69   : > { %427 = vrot.lane.b32.xlu1 %v1959_v15, %s2173_s4  ;;  %417 = vrot.lane.b32.xlu0 %v1959_v15, %s2174_s5 }
  0x6d   : > { %447 = vrot.lane.b32.xlu1 %v1967_v16, %s2170_s29  ;;  %437 = vrot.lane.b32.xlu0 %v1967_v16, %s2168_s27  ;;  %s2363_s27 = sld [smem:[#allocation6 + $0x5b]]  ;;  %s2367_s29 = sld [smem:[#allocation6 + $0x39]] }
  0x71   : > { %467 = vrot.lane.b32.xlu1 %v1967_v16, %s2169_s28  ;;  %457 = vrot.lane.b32.xlu0 %v1967_v16, %s2167_s26  ;;  %s2361_s26 = sld [smem:[#allocation6 + $0x54]]  ;;  %s2365_s28 = sld [smem:[#allocation6 + $0x32]] }
  0x73   : > { %3331 = sst [smem:[#allocation12_spill]] %s2367_s29 }
  0x75   : > { %487 = vrot.lane.b32.xlu1 %v1967_v16, %s2171_s30  ;;  %477 = vrot.lane.b32.xlu0 %v1967_v16, %s2172_s3  ;;  %s2369_s30 = sld [smem:[#allocation6 + $0x40]]  ;;  %s2371_s3 = sld [smem:[#allocation6 + $0x47]] }
  0x77   : > { %3330 = sst [smem:[#allocation11_spill]] %s2365_s28 }
  0x79   : > { %507 = vrot.lane.b32.xlu1 %v1967_v16, %s2173_s4  ;;  %497 = vrot.lane.b32.xlu0 %v1967_v16, %s2174_s5  ;;  %s2373_s4 = sld [smem:[#allocation6 + $0x4e]]  ;;  %s2375_s5 = sld [smem:[#allocation6 + $0x55]] }
  0x7b   : > { %3332 = sst [smem:[#allocation13_spill]] %s2369_s30 }
  0x7c   : > { %3333 = sst [smem:[#allocation14_spill]] %s2371_s3 }
  0x7f   : > { %3334 = sst [smem:[#allocation15_spill]] %s2373_s4 }
  0x80   : > { %3335 = sst [smem:[#allocation16_spill]] %s2375_s5 }
  0xaf   : > { %v217_v17 = vpop.permute.xlu1 %216  ;;  %v196_v18 = vpop.permute.xlu0 %195 }
  0xb0   : > { %219 = vst.msk [vmem:[#allocation2 + $0x5] sm:$0x1] %vm198_vm3, %v217_v17  ;;  %199 = vst.msk [vmem:[#allocation2 + $0x3] sm:$0x1] %vm198_vm3, %v196_v18  ;;  %v781_v17 = vstv %s2337_s13  ;;  %v757_v18 = vstv %s2339_s14  ;;  %s2456_s13 = sld [smem:[#allocation6 + $0x27]]  ;;  %s2458_s14 = sld [smem:[#allocation6 + $0x2e]] }
  0xb3   : > { %v227_v19 = vpop.permute.xlu1 %226  ;;  %v207_v20 = vpop.permute.xlu0 %206 }
  0xb4   : > { %229 = vst.msk [vmem:[#allocation2 + $0x6] sm:$0x1] %vm198_vm3, %v227_v19  ;;  %209 = vst.msk [vmem:[#allocation2 + $0x4] sm:$0x1] %vm198_vm3, %v207_v20 }
  0xb6   : > { %3370 = sst [smem:[#allocation51_spill]] %s2456_s13  ;;  %s2476_s13 = sld [smem:[#allocation6 + $0x28]] }
  0xb7   : > { %v247_v21 = vpop.permute.xlu1 %246  ;;  %v237_v22 = vpop.permute.xlu0 %236  ;;  %3371 = sst [smem:[#allocation52_spill]] %s2458_s14  ;;  %s2474_s14 = sld [smem:[#allocation6 + $0x21]] }
  0xb8   : > { %249 = vst.msk [vmem:[#allocation2 + $0x8] sm:$0x1] %vm198_vm3, %v247_v21  ;;  %239 = vst.msk [vmem:[#allocation2 + $0x7] sm:$0x1] %vm198_vm3, %v237_v22  ;;  %v1149_v21 = vstv %s2351_s20 }
  0xbb   : > { %v267_v23 = vpop.permute.xlu1 %266  ;;  %v257_v24 = vpop.permute.xlu0 %256 }
  0xbc   : > { %269 = vst.msk [vmem:[#allocation2 + $0xa] sm:$0x1] %vm198_vm3, %v267_v23  ;;  %259 = vst.msk [vmem:[#allocation2 + $0x9] sm:$0x1] %vm198_vm3, %v257_v24  ;;  %3377 = sst [smem:[#allocation58_spill]] %s2476_s13 }
  0xbd   : > { %3376 = sst [smem:[#allocation57_spill]] %s2474_s14 }
  0xbf   : > { %v2274_v25 = vld [vmem:[#allocation2] sm:$0xff]  ;;  %v287_v26 = vpop.permute.xlu1 %286  ;;  %v277_v27 = vpop.permute.xlu0 %276 }
  0xc0   : > { %515 = vst.msk [vmem:[#allocation4] sm:$0xff] %vm514_vm4, %v2274_v25 }
  0xc1   : > { %289 = vst.msk [vmem:[#allocation2 + $0xc] sm:$0x1] %vm198_vm3, %v287_v26  ;;  %279 = vst.msk [vmem:[#allocation2 + $0xb] sm:$0x1] %vm198_vm3, %v277_v27  ;;  %v1157_v26 = vstv %s2353_s21  ;;  %v1165_v27 = vstv %s2355_s22  ;;  %s2598_s21 = sld [smem:[#allocation6 + $0x4a]]  ;;  %s2600_s22 = sld [smem:[#allocation6 + $0x51]] }
  0xc3   : > { %v307_v28 = vpop.permute.xlu1 %306  ;;  %v297_v29 = vpop.permute.xlu0 %296 }
  0xc4   : > { %309 = vst.msk [vmem:[#allocation2 + $0xe] sm:$0x1] %vm198_vm3, %v307_v28  ;;  %299 = vst.msk [vmem:[#allocation2 + $0xd] sm:$0x1] %vm198_vm3, %v297_v29 }
  0xc7   : > { %v327_v30 = vpop.permute.xlu1 %326  ;;  %v317_v31 = vpop.permute.xlu0 %316  ;;  %v755_v23 = vld [vmem:[#allocation4] sm:$0xff]  ;;  %3406 = sst [smem:[#allocation70_spill]] %s2598_s21  ;;  %s2639_s21 = sld [smem:[#allocation6 + $0x59]] }
  0xc8   : > { %329 = vst.msk [vmem:[#allocation2 + $0x10] sm:$0x1] %vm198_vm3, %v327_v30  ;;  %319 = vst.msk [vmem:[#allocation2 + $0xf] sm:$0x1] %vm198_vm3, %v317_v31  ;;  %3407 = sst [smem:[#allocation71_spill]] %s2600_s22  ;;  %s2655_s22 = sld [smem:[#allocation6 + $0x45]] }
  0xc9   : > { %s3442_s20 = sld [smem:[#allocation71_spill]] }
  0xcb   : > { %v347_v32 = vpop.permute.xlu1 %346  ;;  %v337_v33 = vpop.permute.xlu0 %336 }
  0xcc   : > { %349 = vst.msk [vmem:[#allocation2 + $0x12] sm:$0x1] %vm198_vm3, %v347_v32  ;;  %339 = vst.msk [vmem:[#allocation2 + $0x11] sm:$0x1] %vm198_vm3, %v337_v33 }
  0xcd   : > { %3427 = sst [smem:[#allocation79_spill]] %s2639_s21  ;;  %s3476_s21 = sld [smem:[#allocation27_spill]] }
  0xcf   : > { %v2286_v34 = vld [vmem:[#allocation2 + $0x8] sm:$0xff]  ;;  %v368_v35 = vpop.permute.xlu1 %367  ;;  %v357_v36 = vpop.permute.xlu0 %356 }
  0xd0   : > { %516 = vst.msk [vmem:[#allocation4 + $0x8] sm:$0xff] %vm514_vm4, %v2286_v34 }
  0xd1   : > { %370 = vst.msk [vmem:[#allocation2 + $0x1c] sm:$0x1] %vm198_vm3, %v368_v35  ;;  %360 = vst.msk [vmem:[#allocation2 + $0x1b] sm:$0x1] %vm198_vm3, %v357_v36 }
  0xd3   : > { %v513_v37 = vld [vmem:[#allocation2 + $0x10] sm:$0x3f]  ;;  %v388_v38 = vpop.permute.xlu1 %387  ;;  %v378_v39 = vpop.permute.xlu0 %377 }
  0xd4   : > { %518 = vst.msk [vmem:[#allocation4 + $0x10] sm:$0x3f] %vm517_vm5, %v513_v37  ;;  %v521_v57 = vld [vmem:[#allocation2 + $0x10] sm:$0x3f] }
  0xd5   : > { %390 = vst.msk [vmem:[#allocation2 + $0x1e] sm:$0x1] %vm198_vm3, %v388_v38  ;;  %380 = vst.msk [vmem:[#allocation2 + $0x1d] sm:$0x1] %vm198_vm3, %v378_v39  ;;  %v540_v58 = vld [vmem:[#allocation2 + $0x10] sm:$0x3f]  ;;  %v758_v39 = vmul.f32 %v757_v18, %v755_v23 }
  0xd6   : > { %v559_v59 = vld [vmem:[#allocation2 + $0x10] sm:$0x3f] }
  0xd7   : > { %v408_v40 = vpop.permute.xlu1 %407  ;;  %v398_v41 = vpop.permute.xlu0 %397  ;;  %v578_v60 = vld [vmem:[#allocation2 + $0x10] sm:$0x3f]  ;;  %v771_v4 = vld [vmem:[#allocation4 + $0x2] sm:$0xff] }
  0xd8   : > { %410 = vst.msk [vmem:[#allocation2 + $0x20] sm:$0x1] %vm198_vm3, %v408_v40  ;;  %400 = vst.msk [vmem:[#allocation2 + $0x1f] sm:$0x1] %vm198_vm3, %v398_v41  ;;  %v597_v61 = vld [vmem:[#allocation2 + $0x10] sm:$0x3f]  ;;  %v1173_v40 = vstv %s2357_s23  ;;  %v1181_v41 = vstv %s2359_s24 }
  0xd9   : > { %v616_v62 = vld [vmem:[#allocation2 + $0x10] sm:$0x3f]  ;;  %v787_v5 = vld [vmem:[#allocation4 + $0x4] sm:$0xff]  ;;  %s2612_s23 = sld [smem:[#allocation6 + $0x58]]  ;;  %s2614_s24 = sld [smem:[#allocation6 + $0x5f]] }
  0xda   : > { %v763_v3 = vld [vmem:[#allocation4 + $0x1] sm:$0xff]  ;;  %v790_v29 = vmul.f32 %v789_v12, %v787_v5 }
  0xdb   : > { %v428_v42 = vpop.permute.xlu1 %427  ;;  %v418_v43 = vpop.permute.xlu0 %417  ;;  %v795_v6 = vld [vmem:[#allocation4 + $0x5] sm:$0xff]  ;;  %v796_v19 = vld [vmem:[#allocation4 + $0xd] sm:$0xff]  ;;  %v766_v24 = vmul.f32 %v765_v8, %v763_v3 }
  0xdc   : > { %430 = vst.msk [vmem:[#allocation2 + $0x22] sm:$0x1] %vm198_vm3, %v428_v42  ;;  %420 = vst.msk [vmem:[#allocation2 + $0x21] sm:$0x1] %vm198_vm3, %v418_v43  ;;  %v803_v10 = vld [vmem:[#allocation4 + $0x6] sm:$0xff]  ;;  %v804_v20 = vld [vmem:[#allocation4 + $0xe] sm:$0xff]  ;;  %v798_v30 = vmul.f32 %v797_v13, %v795_v6  ;;  %v799_v37 = vmul.f32 %v797_v13, %v796_v19  ;;  %v1189_v42 = vstv %s2361_s26  ;;  %v1205_v43 = vstv %s2365_s28 }
  0xdd   : > { %v764_v11 = vld [vmem:[#allocation4 + $0x9] sm:$0xff]  ;;  %v806_v31 = vmul.f32 %v805_v14, %v803_v10  ;;  %v807_v38 = vmul.f32 %v805_v14, %v804_v20  ;;  %s2487_s28 = sld [smem:[#allocation6 + $0x2f]] }
  0xde   : > { %v772_v15 = vld [vmem:[#allocation4 + $0xa] sm:$0xff]  ;;  %v767_v33 = vmul.f32 %v765_v8, %v764_v11 }
  0xdf   : > { %v2299_v44 = vld [vmem:[#allocation2 + $0x18] sm:$0xff]  ;;  %v448_v45 = vpop.permute.xlu1 %447  ;;  %v438_v46 = vpop.permute.xlu0 %437  ;;  %v788_v16 = vld [vmem:[#allocation4 + $0xc] sm:$0xff]  ;;  %v775_v35 = vmul.f32 %v773_v9, %v772_v15  ;;  %3410 = sst [smem:[#allocation72_spill]] %s2612_s23  ;;  %s2665_s23 = sld [smem:[#allocation6 + $0x53]] }
  0xe0   : > { %637 = vst.msk [vmem:[#allocation4 + $0xa8] sm:$0xff] %vm514_vm4, %v2299_v44  ;;  %646 = vrot.lane.b32.xlu0 %v2299_v44, %s2175_s6  ;;  %v779_v28 = vld [vmem:[#allocation4 + $0x3] sm:$0xff]  ;;  %v791_v36 = vmul.f32 %v789_v12, %v788_v16  ;;  %3411 = sst [smem:[#allocation73_spill]] %s2614_s24  ;;  %s2629_s24 = sld [smem:[#allocation6 + $0x44]] }
  0xe1   : > { %450 = vst.msk [vmem:[#allocation2 + $0x24] sm:$0x1] %vm198_vm3, %v448_v45  ;;  %440 = vst.msk [vmem:[#allocation2 + $0x23] sm:$0x1] %vm198_vm3, %v438_v46  ;;  %v756_v32 = vld [vmem:[#allocation4 + $0x8] sm:$0xff]  ;;  %v1197_v46 = vstv %s2363_s27  ;;  %s2622_s27 = sld [smem:[#allocation6 + $0x3d]] }
  0xe2   : > { %v759_v45 = vmul.f32 %v757_v18, %v756_v32 }
  0xe3   : > { %v468_v47 = vpop.permute.xlu1 %467  ;;  %v458_v48 = vpop.permute.xlu0 %457  ;;  %3378 = sst [smem:[#allocation59_spill]] %s2487_s28  ;;  %s3387_s28 = sld [smem:[#allocation23_spill]] }
  0xe4   : > { %470 = vst.msk [vmem:[#allocation2 + $0x26] sm:$0x1] %vm198_vm3, %v468_v47  ;;  %460 = vst.msk [vmem:[#allocation2 + $0x25] sm:$0x1] %vm198_vm3, %v458_v48  ;;  %v2481_v48 = vadd.f32 %v790_v29, %v758_v39  ;;  %s3432_s25 = sld [smem:[#allocation59_spill]] }
  0xe6   : > { %3420 = sst [smem:[#allocation76_spill]] %s2629_s24 }
  0xe7   : > { %v488_v49 = vpop.permute.xlu1 %487  ;;  %v478_v50 = vpop.permute.xlu0 %477  ;;  %3417 = sst [smem:[#allocation75_spill]] %s2622_s27 }
  0xe8   : > { %490 = vst.msk [vmem:[#allocation2 + $0x28] sm:$0x1] %vm198_vm3, %v488_v49  ;;  %480 = vst.msk [vmem:[#allocation2 + $0x27] sm:$0x1] %vm198_vm3, %v478_v50  ;;  %v2483_v49 = vadd.f32 %v798_v30, %v766_v24  ;;  %s2637_s27 = sld [smem:[#allocation6 + $0x52]] }
  0xe9   : > { %v1301_v11 = vstv %s3387_s28  ;;  %s2542_s28 = sld [smem:[#allocation6 + $0x42]] }
  0xeb   : > { %v508_v51 = vpop.permute.xlu1 %507  ;;  %v498_v52 = vpop.permute.xlu0 %497 }
  0xec   : > { %510 = vst.msk [vmem:[#allocation2 + $0x2a] sm:$0x1] %vm198_vm3, %v508_v51  ;;  %500 = vst.msk [vmem:[#allocation2 + $0x29] sm:$0x1] %vm198_vm3, %v498_v52  ;;  %v1147_v51 = vld [vmem:[#allocation4 + $0xa8] sm:$0xff] }
  0xee   : > { %3426 = sst [smem:[#allocation78_spill]] %s2637_s27 }
  0xef   : > { %v634_v53 = vld [vmem:[#allocation2 + $0x20] sm:$0xff]  ;;  %3396 = sst [smem:[#allocation67_spill]] %s2542_s28  ;;  %s2620_s28 = sld [smem:[#allocation6 + $0x36]] }
  0xf0   : > { %638 = vst.msk [vmem:[#allocation4 + $0xb0] sm:$0xff] %vm514_vm4, %v634_v53  ;;  %648 = vrot.lane.b32.xlu1 %v634_v53, %s2175_s6 }
  0xf3   : > { %v635_v54 = vld [vmem:[#allocation2 + $0x28] sm:$0x3f] }
  0xf4   : > { %v642_v55 = vld [vmem:[#allocation2 + $0x28] sm:$0x3f]  ;;  %639 = vst.msk [vmem:[#allocation4 + $0xb8] sm:$0x3f] %vm517_vm5, %v635_v54  ;;  %665 = vrot.lane.b32.xlu1 %v2299_v44, %s2176_s7  ;;  %v2492_v54 = vadd.f32 %v791_v36, %v759_v45 }
  0xf5   : > { %650 = vrot.lane.b32.xlu0 %v642_v55, %s2175_s6  ;;  %v661_v56 = vld [vmem:[#allocation2 + $0x28] sm:$0x3f]  ;;  %v2494_v55 = vadd.f32 %v799_v37, %v767_v33  ;;  %3415 = sst [smem:[#allocation74_spill]] %s2620_s28  ;;  %s3436_s28 = sld [smem:[#allocation67_spill]] }
  0xf6   : > { %v680_v63 = vld [vmem:[#allocation2 + $0x28] sm:$0x3f] }
  0xf7   : > { %v699_v0 = vld [vmem:[#allocation2 + $0x28] sm:$0x3f] }
  0xf8   : > { %669 = vrot.lane.b32.xlu1 %v661_v56, %s2176_s7  ;;  %v718_v1 = vld [vmem:[#allocation2 + $0x28] sm:$0x3f]  ;;  %v2496_v56 = vadd.f32 %v807_v38, %v775_v35 }
  0xf9   : > { %667 = vrot.lane.b32.xlu0 %v634_v53, %s2176_s7  ;;  %v737_v2 = vld [vmem:[#allocation2 + $0x28] sm:$0x3f] }
  0xfa   : > { %v1148_v52 = vld [vmem:[#allocation4 + $0xb0] sm:$0xff] }
  0xfb   : > { %v1187_v5 = vld [vmem:[#allocation4 + $0xad] sm:$0xff]  ;;  %v2532_v13 = vmul.f32 %v1149_v21, %v1148_v52  ;;  %v1188_v30 = vld [vmem:[#allocation4 + $0xb5] sm:$0xff] }
  0xfc   : > { %527 = vrot.lane.b32.xlu1 %v2286_v34, %s2175_s6  ;;  %v1195_v6 = vld [vmem:[#allocation4 + $0xae] sm:$0xff]  ;;  %v2606_v45 = vmul.f32 %v1189_v42, %v1188_v30 }
  0xfd   : > { %525 = vrot.lane.b32.xlu0 %v2274_v25, %s2175_s6  ;;  %v1156_v14 = vld [vmem:[#allocation4 + $0xb1] sm:$0xff]  ;;  %v2560_v23 = vmul.f32 %v1197_v46, %v1195_v6 }
  0xfe   : > { %v1164_v16 = vld [vmem:[#allocation4 + $0xb2] sm:$0xff] }
  0xff   : > { %v1172_v18 = vld [vmem:[#allocation4 + $0xb3] sm:$0xff]  ;;  %v2582_v35 = vmul.f32 %v1165_v27, %v1164_v16 }
 0x100   : > { %544 = vrot.lane.b32.xlu1 %v2274_v25, %s2176_s7  ;;  %v1180_v20 = vld [vmem:[#allocation4 + $0xb4] sm:$0xff]  ;;  %v2592_v38 = vmul.f32 %v1173_v40, %v1172_v18 }
 0x101   : > { %529 = vrot.lane.b32.xlu0 %v521_v57, %s2175_s6  ;;  %s2377_s6 = sld [smem:[#allocation6 + $0x5c]]  ;;  %v1155_v57 = vld [vmem:[#allocation4 + $0xa9] sm:$0xff]  ;;  %v2596_v39 = vmul.f32 %v1181_v41, %v1180_v20 }
 0x102   : > { %v2536_v15 = vmul.f32 %v1157_v26, %v1155_v57 }
 0x104   : > { %548 = vrot.lane.b32.xlu1 %v540_v58, %s2176_s7  ;;  %v1163_v58 = vld [vmem:[#allocation4 + $0xaa] sm:$0xff] }
 0x105   : > { %546 = vrot.lane.b32.xlu0 %v2286_v34, %s2176_s7  ;;  %s2379_s7 = sld [smem:[#allocation6 + $0x33]] }
 0x107   : > { %3336 = sst [smem:[#allocation17_spill]] %s2377_s6  ;;  %s2399_s6 = sld [smem:[#allocation6 + $0x16]] }
 0x108   : > { %565 = vrot.lane.b32.xlu1 %v2286_v34, %s2177_s8  ;;  %s3380_s13 = sld [smem:[#allocation17_spill]] }
 0x109   : > { %563 = vrot.lane.b32.xlu0 %v2274_v25, %s2177_s8 }
 0x10b   : > { %3337 = sst [smem:[#allocation18_spill]] %s2379_s7  ;;  %s2401_s7 = sld [smem:[#allocation6 + $0x1d]] }
 0x10c   : > { %582 = vrot.lane.b32.xlu1 %v2274_v25, %s2178_s10  ;;  %s3381_s14 = sld [smem:[#allocation18_spill]] }
 0x10d   : > { %567 = vrot.lane.b32.xlu0 %v559_v59, %s2177_s8  ;;  %3347 = sst [smem:[#allocation28_spill]] %s2399_s6  ;;  %v1221_v59 = vstv %s2369_s30  ;;  %s2513_s30 = sld [smem:[#allocation6 + $0x29]] }
 0x10e   : > { %s2584_s6 = sld [smem:[#allocation6 + $0x3c]]  ;;  %s3477_s24 = sld [smem:[#allocation28_spill]] }
 0x110   : > { %586 = vrot.lane.b32.xlu1 %v578_v60, %s2178_s10  ;;  %v1229_v60 = vstv %s2371_s3  ;;  %s2515_s3 = sld [smem:[#allocation6 + $0x30]] }
 0x111   : > { %584 = vrot.lane.b32.xlu0 %v2286_v34, %s2178_s10  ;;  %3348 = sst [smem:[#allocation29_spill]] %s2401_s7 }
 0x112   : > { %s2419_s7 = sld [smem:[#allocation6 + $0x2c]] }
 0x114   : > { %603 = vrot.lane.b32.xlu1 %v2286_v34, %s2179_s11 }
 0x115   : > { %601 = vrot.lane.b32.xlu0 %v2274_v25, %s2179_s11 }
 0x116   : > { %3390 = sst [smem:[#allocation64_spill]] %s2515_s3  ;;  %s3497_s3 = sld [smem:[#allocation33_spill]] }
 0x118   : > { %620 = vrot.lane.b32.xlu1 %v2274_v25, %s2180_s12  ;;  %3357 = sst [smem:[#allocation38_spill]] %s2419_s7  ;;  %s2431_s7 = sld [smem:[#allocation6 + $0x1f]]  ;;  %v774_v25 = vmul.f32 %v773_v9, %v771_v4  ;;  %v2519_v4 = vmul.f32 %v1149_v21, %v1147_v51 }
 0x119   : > { %605 = vrot.lane.b32.xlu0 %v597_v61, %s2179_s11  ;;  %v1237_v61 = vstv %s2373_s4  ;;  %s2631_s4 = sld [smem:[#allocation6 + $0x4b]] }
 0x11a   : > { %v2485_v50 = vadd.f32 %v806_v31, %v774_v25  ;;  %v1196_v31 = vld [vmem:[#allocation4 + $0xb6] sm:$0xff] }
 0x11b   : > { %v2610_v51 = vmul.f32 %v1197_v46, %v1196_v31 }
 0x11c   : > { %624 = vrot.lane.b32.xlu1 %v616_v62, %s2180_s12  ;;  %v1245_v62 = vstv %s2375_s5  ;;  %s2586_s5 = sld [smem:[#allocation6 + $0x43]] }
 0x11d   : > { %622 = vrot.lane.b32.xlu0 %v2286_v34, %s2180_s12  ;;  %v780_v34 = vld [vmem:[#allocation4 + $0xb] sm:$0xff] }
 0x11e   : > { %3362 = sst [smem:[#allocation43_spill]] %s2431_s7  ;;  %v2479_v47 = vmul.f32 %v781_v17, %v780_v34  ;;  %v2578_v34 = vmul.f32 %v1157_v26, %v1156_v14  ;;  %s2647_s7 = sld [smem:[#allocation6 + $0x37]] }
 0x11f   : > { %3422 = sst [smem:[#allocation77_spill]] %s2631_s4  ;;  %s2645_s4 = sld [smem:[#allocation6 + $0x60]] }
 0x120   : > { %686 = vrot.lane.b32.xlu1 %v634_v53, %s2177_s8 }
 0x121   : > { %684 = vrot.lane.b32.xlu0 %v2299_v44, %s2177_s8 }
 0x124   : > { %703 = vrot.lane.b32.xlu1 %v2299_v44, %s2178_s10 }
 0x125   : > { %688 = vrot.lane.b32.xlu0 %v680_v63, %s2177_s8  ;;  %s2381_s8 = sld [smem:[#allocation6 + $0x3a]]  ;;  %v1171_v63 = vld [vmem:[#allocation4 + $0xab] sm:$0xff] }
 0x126   : > { %v2548_v19 = vmul.f32 %v1173_v40, %v1171_v63 }
 0x128   : > { %707 = vrot.lane.b32.xlu1 %v699_v0, %s2178_s10  ;;  %v1179_v0 = vld [vmem:[#allocation4 + $0xac] sm:$0xff] }
 0x129   : > { %705 = vrot.lane.b32.xlu0 %v634_v53, %s2178_s10  ;;  %s2383_s10 = sld [smem:[#allocation6 + $0x41]]  ;;  %v2552_v21 = vmul.f32 %v1181_v41, %v1179_v0 }
 0x12b   : > { %3338 = sst [smem:[#allocation19_spill]] %s2381_s8  ;;  %s2403_s8 = sld [smem:[#allocation6 + $0x24]] }
 0x12c   : > { %724 = vrot.lane.b32.xlu1 %v634_v53, %s2179_s11  ;;  %s3382_s17 = sld [smem:[#allocation19_spill]] }
 0x12d   : > { %722 = vrot.lane.b32.xlu0 %v2299_v44, %s2179_s11 }
 0x12f   : > { %3339 = sst [smem:[#allocation20_spill]] %s2383_s10 }
 0x130   : > { %741 = vrot.lane.b32.xlu1 %v2299_v44, %s2180_s12  ;;  %s2405_s10 = sld [smem:[#allocation6 + $0x2b]]  ;;  %v2472_v44 = vmul.f32 %v781_v17, %v779_v28  ;;  %v2540_v17 = vmul.f32 %v1165_v27, %v1163_v58 }
 0x131   : > { %726 = vrot.lane.b32.xlu0 %v718_v1, %s2179_s11  ;;  %s2385_s11 = sld [smem:[#allocation6 + $0x48]]  ;;  %3349 = sst [smem:[#allocation30_spill]] %s2403_s8  ;;  %v1253_v1 = vstv %s3380_s13 }
 0x132   : > { %s3385_s16 = sld [smem:[#allocation20_spill]]  ;;  %v1269_v3 = vstv %s3382_s17  ;;  %s3393_s13 = sld [smem:[#allocation25_spill]] }
 0x133   : > { %s2527_s17 = sld [smem:[#allocation6 + $0x3b]]  ;;  %s3481_s27 = sld [smem:[#allocation30_spill]] }
 0x134   : > { %745 = vrot.lane.b32.xlu1 %v737_v2, %s2180_s12  ;;  %v1261_v2 = vstv %s3381_s14  ;;  %s2525_s14 = sld [smem:[#allocation6 + $0x34]] }
 0x135   : > { %743 = vrot.lane.b32.xlu0 %v634_v53, %s2180_s12  ;;  %s2387_s12 = sld [smem:[#allocation6 + $0x4f]]  ;;  %v1213_v53 = vstv %s2367_s29 }
 0x136   : > { %3350 = sst [smem:[#allocation31_spill]] %s2405_s10  ;;  %s2421_s10 = sld [smem:[#allocation6 + $0x3]] }
 0x137   : > { %3340 = sst [smem:[#allocation21_spill]] %s2385_s11  ;;  %v1285_v9 = vstv %s2385_s11  ;;  %s3486_s11 = sld [smem:[#allocation31_spill]] }
 0x138   : > { %v1277_v8 = vstv %s3385_s16  ;;  %s2564_s16 = sld [smem:[#allocation6 + $0x57]]  ;;  %v813_v24 = vstv %s3393_s13  ;;  %s2663_s13 = sld [smem:[#allocation6 + $0x4c]] }
 0x139   : > { %3392 = sst [smem:[#allocation66_spill]] %s2527_s17  ;;  %s2570_s17 = sld [smem:[#allocation6 + $0x5e]] }
 0x13a   : > { %3391 = sst [smem:[#allocation65_spill]] %s2525_s14  ;;  %s2572_s14 = sld [smem:[#allocation6 + $0x35]] }
 0x13b   : > { %3341 = sst [smem:[#allocation22_spill]] %s2387_s12  ;;  %s2407_s12 = sld [smem:[#allocation6 + $0x2]] }
 0x13c   : > { %3358 = sst [smem:[#allocation39_spill]] %s2421_s10  ;;  %s3386_s29 = sld [smem:[#allocation22_spill]] }
 0x13d   : > { %s3434_s2 = sld [smem:[#allocation65_spill]]  ;;  %s3441_s10 = sld [smem:[#allocation70_spill]] }
 0x13e   : > { %3440 = sst [smem:[#allocation65_spill]] %s2673_s9  ;;  %s3475_s9 = sld [smem:[#allocation26_spill]] }
 0x13f   : > { %3402 = sst [smem:[#allocation69_spill]] %s2570_s17  ;;  %s3435_s17 = sld [smem:[#allocation66_spill]] }
 0x140   : > { %s3439_s8 = sld [smem:[#allocation69_spill]] }
 0x141   : > { %3351 = sst [smem:[#allocation32_spill]] %s2407_s12  ;;  %s2423_s12 = sld [smem:[#allocation6 + $0xa]] }
 0x142   : > { %v1293_v10 = vstv %s3386_s29  ;;  %s2544_s29 = sld [smem:[#allocation6 + $0x49]]  ;;  %s3487_s15 = sld [smem:[#allocation32_spill]] }
 0x147   : > { %3359 = sst [smem:[#allocation40_spill]] %s2423_s12  ;;  %s2438_s12 = sld [smem:[#allocation6 + $0x2d]] }
 0x148   : > { %3397 = sst [smem:[#allocation68_spill]] %s2544_s29  ;;  %s2671_s29 = sld [smem:[#allocation6 + $0x5a]] }
 0x149   : > { %s3437_s26 = sld [smem:[#allocation68_spill]] }
 0x14d   : > { %3364 = sst [smem:[#allocation45_spill]] %s2438_s12  ;;  %s3389_s12 = sld [smem:[#allocation24_spill]] }
 0x14e   : > { %3438 = sst [smem:[#allocation59_spill]] %s2671_s29  ;;  %s3480_s29 = sld [smem:[#allocation29_spill]] }
 0x152   : > { %v647_v22 = vpop.permute.xlu0 %646 }
 0x153   : > { %656 = vst.msk [vmem:[#allocation4 + $0xc0] sm:$0xff] %vm514_vm4, %v647_v22  ;;  %v1309_v12 = vstv %s3389_s12  ;;  %v2556_v22 = vmul.f32 %v1189_v42, %v1187_v5  ;;  %s2562_s12 = sld [smem:[#allocation6 + $0x50]] }
 0x162   : > { %v649_v40 = vpop.permute.xlu1 %648 }
 0x163   : > { %657 = vst.msk [vmem:[#allocation4 + $0xc8] sm:$0xff] %vm514_vm4, %v649_v40 }
 0x166   : > { %v666_v40 = vpop.permute.xlu1 %665 }
 0x167   : > { %v651_v7 = vpop.permute.xlu0 %650  ;;  %675 = vst.msk [vmem:[#allocation4 + $0xd8] sm:$0xff] %vm514_vm4, %v666_v40  ;;  %v1203_v40 = vld [vmem:[#allocation4 + $0xc0] sm:$0xff] }
 0x168   : > { %658 = vst.msk [vmem:[#allocation4 + $0xd0] sm:$0x3f] %vm517_vm5, %v651_v7 }
 0x16a   : > { %v670_v6 = vpop.permute.xlu1 %669  ;;  %v1204_v5 = vld [vmem:[#allocation4 + $0xc8] sm:$0xff] }
 0x16b   : > { %v668_v18 = vpop.permute.xlu0 %667  ;;  %677 = vst.msk [vmem:[#allocation4 + $0xe8] sm:$0x3f] %vm517_vm5, %v670_v6  ;;  %v1211_v46 = vld [vmem:[#allocation4 + $0xc1] sm:$0xff] }
 0x16c   : > { %676 = vst.msk [vmem:[#allocation4 + $0xe0] sm:$0xff] %vm514_vm4, %v668_v18  ;;  %v1219_v7 = vld [vmem:[#allocation4 + $0xc2] sm:$0xff]  ;;  %v2721_v31 = vmul.f32 %v1213_v53, %v1211_v46 }
 0x16d   : > { %v1227_v0 = vld [vmem:[#allocation4 + $0xc3] sm:$0xff]  ;;  %v2725_v52 = vmul.f32 %v1221_v59, %v1219_v7 }
 0x16e   : > { %v1235_v30 = vld [vmem:[#allocation4 + $0xc4] sm:$0xff]  ;;  %v528_v63 = vpop.permute.xlu1 %527  ;;  %v1259_v18 = vld [vmem:[#allocation4 + $0xd8] sm:$0xff]  ;;  %v2729_v36 = vmul.f32 %v1229_v60, %v1227_v0 }
 0x16f   : > { %v526_v16 = vpop.permute.xlu0 %525  ;;  %v1243_v6 = vld [vmem:[#allocation4 + $0xc5] sm:$0xff]  ;;  %536 = vst.msk [vmem:[#allocation4 + $0x20] sm:$0xff] %vm514_vm4, %v528_v63  ;;  %v2713_v63 = vmul.f32 %v1205_v43, %v1203_v40  ;;  %v1244_v26 = vld [vmem:[#allocation4 + $0xcd] sm:$0xff]  ;;  %v2733_v40 = vmul.f32 %v1237_v61, %v1235_v30  ;;  %v2745_v0 = vmul.f32 %v1261_v2, %v1259_v18 }
 0x170   : > { %v1251_v58 = vld [vmem:[#allocation4 + $0xc6] sm:$0xff]  ;;  %535 = vst.msk [vmem:[#allocation4 + $0x18] sm:$0xff] %vm514_vm4, %v526_v16  ;;  %v2717_v16 = vmul.f32 %v1205_v43, %v1204_v5  ;;  %v1252_v37 = vld [vmem:[#allocation4 + $0xce] sm:$0xff]  ;;  %v2737_v43 = vmul.f32 %v1245_v62, %v1243_v6 }
 0x171   : > { %v1212_v14 = vld [vmem:[#allocation4 + $0xc9] sm:$0xff]  ;;  %v2741_v46 = vmul.f32 %v1253_v1, %v1251_v58 }
 0x172   : > { %v1220_v57 = vld [vmem:[#allocation4 + $0xca] sm:$0xff]  ;;  %v545_v42 = vpop.permute.xlu1 %544  ;;  %v2749_v30 = vmul.f32 %v1213_v53, %v1212_v14 }
 0x173   : > { %v1228_v41 = vld [vmem:[#allocation4 + $0xcb] sm:$0xff]  ;;  %v1260_v5 = vld [vmem:[#allocation4 + $0xe0] sm:$0xff]  ;;  %v530_v33 = vpop.permute.xlu0 %529  ;;  %v2753_v6 = vmul.f32 %v1221_v59, %v1220_v57  ;;  %554 = vst.msk [vmem:[#allocation4 + $0x30] sm:$0xff] %vm514_vm4, %v545_v42  ;;  %v2767_v59 = vmul.f32 %v1245_v62, %v1244_v26 }
 0x174   : > { %v1236_v27 = vld [vmem:[#allocation4 + $0xcc] sm:$0xff]  ;;  %v1267_v7 = vld [vmem:[#allocation4 + $0xd9] sm:$0xff]  ;;  %v1268_v20 = vld [vmem:[#allocation4 + $0xe1] sm:$0xff]  ;;  %v2757_v58 = vmul.f32 %v1229_v60, %v1228_v41  ;;  %537 = vst.msk [vmem:[#allocation4 + $0x28] sm:$0x3f] %vm517_vm5, %v530_v33  ;;  %v2771_v60 = vmul.f32 %v1253_v1, %v1252_v37  ;;  %v2775_v41 = vmul.f32 %v1261_v2, %v1260_v5 }
 0x175   : > { %v1275_v32 = vld [vmem:[#allocation4 + $0xda] sm:$0xff]  ;;  %v1276_v29 = vld [vmem:[#allocation4 + $0xe2] sm:$0xff]  ;;  %v2763_v53 = vmul.f32 %v1237_v61, %v1236_v27  ;;  %3462 = vst [vmem:[#allocation82_spill] sm:$0xff] %v2767_v59  ;;  %v2779_v33 = vmul.f32 %v1269_v3, %v1267_v7  ;;  %v2783_v61 = vmul.f32 %v1269_v3, %v1268_v20 }
 0x176   : > { %3458 = vst [vmem:[#allocation80_spill] sm:$0xff] %v2757_v58  ;;  %v1283_v28 = vld [vmem:[#allocation4 + $0xdb] sm:$0xff]  ;;  %3463 = vst [vmem:[#allocation83_spill] sm:$0xff] %v2775_v41  ;;  %v1284_v57 = vld [vmem:[#allocation4 + $0xe3] sm:$0xff]  ;;  %v2787_v62 = vmul.f32 %v1277_v8, %v1275_v32  ;;  %v2791_v1 = vmul.f32 %v1277_v8, %v1276_v29  ;;  %v549_v5 = vpop.permute.xlu1 %548  ;;  %v3489_v41 = vstv %s3480_s29 }
 0x177   : > { %3460 = vst [vmem:[#allocation81_spill] sm:$0xff] %v2763_v53  ;;  %v1291_v42 = vld [vmem:[#allocation4 + $0xdc] sm:$0xff]  ;;  %v1292_v14 = vld [vmem:[#allocation4 + $0xe4] sm:$0xff]  ;;  %3464 = vst [vmem:[#allocation84_spill] sm:$0xff] %v2779_v33  ;;  %v2795_v27 = vmul.f32 %v1285_v9, %v1283_v28  ;;  %v2799_v18 = vmul.f32 %v1285_v9, %v1284_v57  ;;  %v547_v7 = vpop.permute.xlu0 %546 }
 0x178   : > { %3466 = vst [vmem:[#allocation85_spill] sm:$0xff] %v2783_v61  ;;  %3467 = vst [vmem:[#allocation86_spill] sm:$0xff] %v2787_v62  ;;  %v1299_v2 = vld [vmem:[#allocation4 + $0xdd] sm:$0xff]  ;;  %v1300_v37 = vld [vmem:[#allocation4 + $0xe5] sm:$0xff]  ;;  %v2803_v3 = vmul.f32 %v1293_v10, %v1291_v42  ;;  %v2807_v32 = vmul.f32 %v1293_v10, %v1292_v14 }
 0x179   : > { %3469 = vst [vmem:[#allocation87_spill] sm:$0xff] %v2791_v1  ;;  %v1307_v26 = vld [vmem:[#allocation4 + $0xde] sm:$0xff]  ;;  %3470 = vst [vmem:[#allocation88_spill] sm:$0xff] %v2795_v27  ;;  %v1308_v8 = vld [vmem:[#allocation4 + $0xe6] sm:$0xff]  ;;  %v2811_v28 = vmul.f32 %v1301_v11, %v1299_v2  ;;  %v2815_v9 = vmul.f32 %v1301_v11, %v1300_v37  ;;  %v3484_v11 = vstv %s3476_s21 }
 0x17a   : > { %3471 = vst [vmem:[#allocation89_spill] sm:$0xff] %v2799_v18  ;;  %3472 = vst [vmem:[#allocation90_spill] sm:$0xff] %v2803_v3  ;;  %v812_v29 = vld [vmem:[#allocation4 + $0x20] sm:$0xff]  ;;  %v811_v20 = vld [vmem:[#allocation4 + $0x18] sm:$0xff]  ;;  %v2825_v2 = vmul.f32 %v1309_v12, %v1307_v26 }
 0x17b   : > { %3474 = vst [vmem:[#allocation91_spill] sm:$0xff] %v2807_v32  ;;  %3478 = vst [vmem:[#allocation92_spill] sm:$0xff] %v2811_v28  ;;  %v815_v57 = vmul.f32 %v813_v24, %v812_v29  ;;  %v814_v10 = vmul.f32 %v813_v24, %v811_v20  ;;  %v819_v42 = vld [vmem:[#allocation4 + $0x19] sm:$0xff]  ;;  %v3483_v32 = vstv %s3475_s9  ;;  %v867_v59 = vld [vmem:[#allocation4 + $0x30] sm:$0xff] }
 0x17c   : > { %3479 = vst [vmem:[#allocation93_spill] sm:$0xff] %v2815_v9  ;;  %v827_v14 = vld [vmem:[#allocation4 + $0x1a] sm:$0xff]  ;;  %556 = vst.msk [vmem:[#allocation4 + $0x40] sm:$0x3f] %vm517_vm5, %v549_v5  ;;  %v822_v1 = vmul.f32 %v3483_v32, %v819_v42  ;;  %v3485_v9 = vstv %s3477_s24  ;;  %v2835_v5 = vmul.f32 %v1309_v12, %v1308_v8  ;;  %v828_v12 = vld [vmem:[#allocation4 + $0x22] sm:$0xff]  ;;  %v566_v8 = vpop.permute.xlu1 %565 }
 0x17d   : > { %v835_v25 = vld [vmem:[#allocation4 + $0x1b] sm:$0xff]  ;;  %555 = vst.msk [vmem:[#allocation4 + $0x38] sm:$0xff] %vm514_vm4, %v547_v7  ;;  %3482 = vst [vmem:[#allocation94_spill] sm:$0xff] %v2825_v2  ;;  %v830_v37 = vmul.f32 %v3484_v11, %v827_v14  ;;  %v817_v7 = vadd.f32 %v815_v57, %v2479_v47  ;;  %v816_v26 = vadd.f32 %v814_v10, %v2472_v44  ;;  %v3490_v14 = vstv %s3481_s27 }
 0x17e   : > { %v838_v29 = vmul.f32 %v3485_v9, %v835_v25  ;;  %v843_v61 = vld [vmem:[#allocation4 + $0x1c] sm:$0xff]  ;;  %3488 = vst [vmem:[#allocation95_spill] sm:$0xff] %v2835_v5  ;;  %v824_v42 = vadd.f32 %v822_v1, %v2481_v48  ;;  %v564_v5 = vpop.permute.xlu0 %563  ;;  %v3491_v47 = vstv %s3486_s11  ;;  %v3492_v44 = vstv %s3487_s15  ;;  %574 = vst.msk [vmem:[#allocation4 + $0x50] sm:$0xff] %vm514_vm4, %v566_v8 }
 0x17f   : > { %v851_v24 = vld [vmem:[#allocation4 + $0x1d] sm:$0xff]  ;;  %v846_v32 = vmul.f32 %v3489_v41, %v843_v61  ;;  %v832_v25 = vadd.f32 %v830_v37, %v2483_v49  ;;  %v870_v10 = vmul.f32 %v3492_v44, %v867_v59  ;;  %v3493_v41 = vstv %s3475_s9  ;;  %v852_v37 = vld [vmem:[#allocation4 + $0x25] sm:$0xff]  ;;  %573 = vst.msk [vmem:[#allocation4 + $0x48] sm:$0xff] %vm514_vm4, %v564_v5  ;;  %s3507_s9 = sld [smem:[#allocation36_spill]] }
 0x180   : > { %v859_v20 = vld [vmem:[#allocation4 + $0x1e] sm:$0xff]  ;;  %v840_v9 = vadd.f32 %v838_v29, %v2485_v50  ;;  %v854_v11 = vmul.f32 %v3490_v14, %v851_v24  ;;  %v3494_v61 = vstv %s3476_s21  ;;  %v3495_v14 = vstv %s3477_s24  ;;  %v860_v59 = vld [vmem:[#allocation4 + $0x26] sm:$0xff]  ;;  %s3510_s21 = sld [smem:[#allocation37_spill]]  ;;  %s3511_s24 = sld [smem:[#allocation38_spill]] }
 0x181   : > { %v820_v53 = vld [vmem:[#allocation4 + $0x21] sm:$0xff]  ;;  %v862_v57 = vmul.f32 %v3491_v47, %v859_v20  ;;  %v831_v49 = vmul.f32 %v3494_v61, %v828_v12  ;;  %v848_v29 = vadd.f32 %v846_v32, %v816_v26  ;;  %v3496_v20 = vstv %s3480_s29  ;;  %s3513_s29 = sld [smem:[#allocation39_spill]] }
 0x182   : > { %v823_v48 = vmul.f32 %v3493_v41, %v820_v53  ;;  %v836_v1 = vld [vmem:[#allocation4 + $0x23] sm:$0xff]  ;;  %v856_v24 = vadd.f32 %v854_v11, %v824_v42  ;;  %v3498_v41 = vstv %s3481_s27  ;;  %v872_v8 = vadd.f32 %v870_v10, %v840_v9  ;;  %s3518_s27 = sld [smem:[#allocation40_spill]] }
 0x183   : > { %v844_v50 = vld [vmem:[#allocation4 + $0x24] sm:$0xff]  ;;  %v839_v58 = vmul.f32 %v3495_v14, %v836_v1  ;;  %v864_v53 = vadd.f32 %v862_v57, %v832_v25  ;;  %v833_v44 = vadd.f32 %v831_v49, %v2494_v55  ;;  %v855_v61 = vmul.f32 %v3498_v41, %v852_v37  ;;  %v583_v25 = vpop.permute.xlu1 %582  ;;  %v568_v57 = vpop.permute.xlu0 %567 }
 0x184   : > { %v847_v47 = vmul.f32 %v3496_v20, %v844_v50  ;;  %v825_v12 = vadd.f32 %v823_v48, %v2492_v54  ;;  %v3499_v32 = vstv %s3486_s11  ;;  %v868_v11 = vld [vmem:[#allocation4 + $0x38] sm:$0xff]  ;;  %v3502_v54 = vstv %s3487_s15  ;;  %592 = vst.msk [vmem:[#allocation4 + $0x60] sm:$0xff] %vm514_vm4, %v583_v25  ;;  %s3521_s11 = sld [smem:[#allocation41_spill]]  ;;  %s3522_s15 = sld [smem:[#allocation42_spill]] }
 0x185   : > { %v841_v5 = vadd.f32 %v839_v58, %v2496_v56  ;;  %v863_v42 = vmul.f32 %v3499_v32, %v860_v59  ;;  %v875_v1 = vld [vmem:[#allocation4 + $0x31] sm:$0xff]  ;;  %v876_v50 = vld [vmem:[#allocation4 + $0x39] sm:$0xff]  ;;  %v871_v48 = vmul.f32 %v3502_v54, %v868_v11  ;;  %v3503_v55 = vstv %s3497_s3  ;;  %575 = vst.msk [vmem:[#allocation4 + $0x58] sm:$0x3f] %vm517_vm5, %v568_v57  ;;  %s3523_s3 = sld [smem:[#allocation43_spill]] }
 0x186   : > { %v849_v26 = vadd.f32 %v847_v47, %v817_v7  ;;  %v857_v14 = vadd.f32 %v855_v61, %v825_v12  ;;  %v878_v49 = vmul.f32 %v3503_v55, %v875_v1  ;;  %v3504_v37 = vmov %v3503_v55  ;;  %v883_v56 = vld [vmem:[#allocation4 + $0x32] sm:$0xff]  ;;  %v884_v58 = vld [vmem:[#allocation4 + $0x3a] sm:$0xff] }
 0x187   : > { %v879_v9 = vmul.f32 %v3504_v37, %v876_v50  ;;  %v891_v7 = vld [vmem:[#allocation4 + $0x33] sm:$0xff]  ;;  %v865_v10 = vadd.f32 %v863_v42, %v833_v44  ;;  %v3505_v20 = vstv %s3500_s18  ;;  %v892_v41 = vld [vmem:[#allocation4 + $0x3b] sm:$0xff]  ;;  %v3508_v61 = vstv %s3501_s19  ;;  %s3526_s18 = sld [smem:[#allocation44_spill]]  ;;  %s3527_s19 = sld [smem:[#allocation45_spill]] }
 0x188   : > { %v886_v47 = vmul.f32 %v3505_v20, %v883_v56  ;;  %v3506_v59 = vmov %v3505_v20  ;;  %v894_v32 = vmul.f32 %v3508_v61, %v891_v7  ;;  %v899_v11 = vld [vmem:[#allocation4 + $0x34] sm:$0xff]  ;;  %v900_v1 = vld [vmem:[#allocation4 + $0x3c] sm:$0xff]  ;;  %v873_v50 = vadd.f32 %v871_v48, %v841_v5  ;;  %v587_v48 = vpop.permute.xlu1 %586 }
 0x189   : > { %v887_v12 = vmul.f32 %v3506_v59, %v884_v58  ;;  %v880_v54 = vadd.f32 %v878_v49, %v848_v29  ;;  %v881_v55 = vadd.f32 %v879_v9, %v849_v26  ;;  %v3509_v37 = vmov %v3508_v61  ;;  %v907_v57 = vld [vmem:[#allocation4 + $0x35] sm:$0xff]  ;;  %v908_v44 = vld [vmem:[#allocation4 + $0x3d] sm:$0xff]  ;;  %v923_v29 = vld [vmem:[#allocation4 + $0x48] sm:$0xff]  ;;  %v585_v26 = vpop.permute.xlu0 %584  ;;  %594 = vst.msk [vmem:[#allocation4 + $0x70] sm:$0x3f] %vm517_vm5, %v587_v48 }
 0x18a   : > { %v895_v25 = vmul.f32 %v3509_v37, %v892_v41  ;;  %v915_v42 = vld [vmem:[#allocation4 + $0x36] sm:$0xff]  ;;  %v888_v56 = vadd.f32 %v886_v47, %v856_v24  ;;  %v896_v58 = vadd.f32 %v894_v32, %v864_v53  ;;  %v3512_v59 = vstv %s3507_s9  ;;  %v916_v61 = vld [vmem:[#allocation4 + $0x3e] sm:$0xff]  ;;  %593 = vst.msk [vmem:[#allocation4 + $0x68] sm:$0xff] %vm514_vm4, %v585_v26  ;;  %v963_v26 = vld [vmem:[#allocation4 + $0x4d] sm:$0xff]  ;;  %s3528_s9 = sld [smem:[#allocation46_spill]] }
 0x18b   : > { %v889_v20 = vadd.f32 %v887_v12, %v857_v14  ;;  %v902_v7 = vmul.f32 %v3512_v59, %v899_v11  ;;  %v924_v5 = vld [vmem:[#allocation4 + $0x50] sm:$0xff]  ;;  %v3514_v9 = vmov %v3512_v59  ;;  %v3515_v37 = vstv %s3510_s21  ;;  %s3539_s21 = sld [smem:[#allocation47_spill]] }
 0x18c   : > { %v897_v49 = vadd.f32 %v895_v25, %v865_v10  ;;  %v903_v41 = vmul.f32 %v3514_v9, %v900_v1  ;;  %v910_v28 = vmul.f32 %v3515_v37, %v907_v57  ;;  %v3516_v2 = vmov %v3515_v37  ;;  %v931_v14 = vld [vmem:[#allocation4 + $0x49] sm:$0xff]  ;;  %v972_v18 = vld [vmem:[#allocation4 + $0x56] sm:$0xff] }
 0x18d   : > { %v911_v24 = vmul.f32 %v3516_v2, %v908_v44  ;;  %v904_v53 = vadd.f32 %v902_v7, %v872_v8  ;;  %v3517_v47 = vstv %s3511_s24  ;;  %v3520_v59 = vstv %s3513_s29  ;;  %v939_v25 = vld [vmem:[#allocation4 + $0x4a] sm:$0xff]  ;;  %s3541_s24 = sld [smem:[#allocation48_spill]]  ;;  %s3542_s29 = sld [smem:[#allocation49_spill]] }
 0x18e   : > { %v918_v12 = vmul.f32 %v3517_v47, %v915_v42  ;;  %v3519_v32 = vmov %v3517_v47  ;;  %v927_v10 = vmul.f32 %v3520_v59, %v924_v5  ;;  %v947_v1 = vld [vmem:[#allocation4 + $0x4b] sm:$0xff]  ;;  %v905_v57 = vadd.f32 %v903_v41, %v873_v50  ;;  %v979_v5 = vld [vmem:[#allocation4 + $0x60] sm:$0xff]  ;;  %v602_v50 = vpop.permute.xlu0 %601 }
 0x18f   : > { %v919_v11 = vmul.f32 %v3519_v32, %v916_v61  ;;  %v955_v9 = vld [vmem:[#allocation4 + $0x4c] sm:$0xff]  ;;  %v912_v2 = vadd.f32 %v910_v28, %v880_v54  ;;  %v913_v44 = vadd.f32 %v911_v24, %v881_v55  ;;  %v3524_v48 = vmov %v3520_v59  ;;  %v604_v59 = vpop.permute.xlu1 %603  ;;  %611 = vst.msk [vmem:[#allocation4 + $0x78] sm:$0xff] %vm514_vm4, %v602_v50 }
 0x190   : > { %v926_v37 = vmul.f32 %v3524_v48, %v923_v29  ;;  %v971_v8 = vld [vmem:[#allocation4 + $0x4e] sm:$0xff]  ;;  %v920_v7 = vadd.f32 %v918_v12, %v888_v56  ;;  %v929_v42 = vadd.f32 %v927_v10, %v897_v49  ;;  %v3525_v47 = vstv %s3518_s27  ;;  %612 = vst.msk [vmem:[#allocation4 + $0x80] sm:$0xff] %vm514_vm4, %v604_v59 }
 0x191   : > { %v921_v3 = vadd.f32 %v919_v11, %v889_v20  ;;  %v934_v61 = vmul.f32 %v3525_v47, %v931_v14  ;;  %v932_v32 = vld [vmem:[#allocation4 + $0x51] sm:$0xff]  ;;  %v3529_v28 = vstv %s3521_s11  ;;  %v3530_v55 = vstv %s3522_s15 }
 0x192   : > { %v928_v41 = vadd.f32 %v926_v37, %v896_v58  ;;  %v942_v54 = vmul.f32 %v3529_v28, %v939_v25  ;;  %v950_v29 = vmul.f32 %v3530_v55, %v947_v1  ;;  %v3531_v24 = vstv %s3523_s3  ;;  %v940_v56 = vld [vmem:[#allocation4 + $0x52] sm:$0xff] }
 0x193   : > { %v958_v48 = vmul.f32 %v3531_v24, %v955_v9  ;;  %v948_v20 = vld [vmem:[#allocation4 + $0x53] sm:$0xff]  ;;  %v936_v14 = vadd.f32 %v934_v61, %v904_v53  ;;  %v3532_v12 = vstv %s3526_s18  ;;  %v3533_v11 = vstv %s3527_s19 }
 0x194   : > { %v956_v49 = vld [vmem:[#allocation4 + $0x54] sm:$0xff]  ;;  %v966_v58 = vmul.f32 %v3532_v12, %v963_v26  ;;  %v974_v10 = vmul.f32 %v3533_v11, %v971_v8  ;;  %v3534_v25 = vstv %s3528_s9  ;;  %v944_v47 = vadd.f32 %v942_v54, %v912_v2  ;;  %v980_v26 = vld [vmem:[#allocation4 + $0x68] sm:$0xff]  ;;  %v606_v11 = vpop.permute.xlu0 %605  ;;  %s3564_s9 = sld [smem:[#allocation56_spill]] }
 0x195   : > { %v982_v37 = vmul.f32 %v3534_v25, %v979_v5  ;;  %v964_v1 = vld [vmem:[#allocation4 + $0x55] sm:$0xff]  ;;  %v952_v9 = vadd.f32 %v950_v29, %v920_v7  ;;  %v960_v28 = vadd.f32 %v958_v48, %v928_v41  ;;  %v3535_v55 = vstv %s3518_s27  ;;  %v987_v12 = vld [vmem:[#allocation4 + $0x61] sm:$0xff]  ;;  %v988_v8 = vld [vmem:[#allocation4 + $0x69] sm:$0xff]  ;;  %v621_v5 = vpop.permute.xlu1 %620  ;;  %613 = vst.msk [vmem:[#allocation4 + $0x88] sm:$0x3f] %vm517_vm5, %v606_v11  ;;  %s3550_s27 = sld [smem:[#allocation50_spill]] }
 0x196   : > { %v935_v24 = vmul.f32 %v3535_v55, %v932_v32  ;;  %v968_v27 = vadd.f32 %v966_v58, %v936_v14  ;;  %v3536_v33 = vstv %s3521_s11  ;;  %v3537_v62 = vstv %s3522_s15  ;;  %v995_v29 = vld [vmem:[#allocation4 + $0x62] sm:$0xff]  ;;  %630 = vst.msk [vmem:[#allocation4 + $0x90] sm:$0xff] %vm514_vm4, %v621_v5  ;;  %v1004_v58 = vld [vmem:[#allocation4 + $0x6b] sm:$0xff]  ;;  %s3551_s11 = sld [smem:[#allocation51_spill]]  ;;  %s3553_s15 = sld [smem:[#allocation52_spill]] }
 0x197   : > { %v943_v59 = vmul.f32 %v3536_v33, %v940_v56  ;;  %v951_v50 = vmul.f32 %v3537_v62, %v948_v20  ;;  %v3538_v53 = vstv %s3523_s3  ;;  %v976_v2 = vadd.f32 %v974_v10, %v944_v47  ;;  %v996_v33 = vld [vmem:[#allocation4 + $0x6a] sm:$0xff]  ;;  %s3554_s3 = sld [smem:[#allocation53_spill]] }
 0x198   : > { %v959_v61 = vmul.f32 %v3538_v53, %v956_v49  ;;  %v984_v7 = vadd.f32 %v982_v37, %v952_v9  ;;  %v937_v32 = vadd.f32 %v935_v24, %v905_v57  ;;  %v3540_v41 = vstv %s3526_s18  ;;  %v1003_v62 = vld [vmem:[#allocation4 + $0x63] sm:$0xff]  ;;  %s3562_s18 = sld [smem:[#allocation54_spill]] }
 0x199   : > { %v967_v54 = vmul.f32 %v3540_v41, %v964_v1  ;;  %v945_v48 = vadd.f32 %v943_v59, %v913_v44  ;;  %v953_v56 = vadd.f32 %v951_v50, %v921_v3  ;;  %v3543_v49 = vstv %s3527_s19  ;;  %v1011_v55 = vld [vmem:[#allocation4 + $0x64] sm:$0xff]  ;;  %v625_v50 = vpop.permute.xlu1 %624  ;;  %s3563_s19 = sld [smem:[#allocation55_spill]] }
 0x19a   : > { %v961_v20 = vadd.f32 %v959_v61, %v929_v42  ;;  %v975_v14 = vmul.f32 %v3543_v49, %v972_v18  ;;  %v3544_v57 = vmov %v3534_v25  ;;  %v3545_v37 = vstv %s3539_s21  ;;  %v1012_v42 = vld [vmem:[#allocation4 + $0x6c] sm:$0xff]  ;;  %v623_v61 = vpop.permute.xlu0 %622  ;;  %632 = vst.msk [vmem:[#allocation4 + $0xa0] sm:$0x3f] %vm517_vm5, %v625_v50  ;;  %s3565_s21 = sld [smem:[#allocation57_spill]] }
 0x19b   : > { %v969_v10 = vadd.f32 %v967_v54, %v937_v32  ;;  %v983_v25 = vmul.f32 %v3544_v57, %v980_v26  ;;  %v990_v1 = vmul.f32 %v3545_v37, %v987_v12  ;;  %v3546_v47 = vmov %v3545_v37  ;;  %v1019_v59 = vld [vmem:[#allocation4 + $0x65] sm:$0xff]  ;;  %v1020_v18 = vld [vmem:[#allocation4 + $0x6d] sm:$0xff]  ;;  %631 = vst.msk [vmem:[#allocation4 + $0x98] sm:$0xff] %vm514_vm4, %v623_v61 }
 0x19c   : > { %v991_v9 = vmul.f32 %v3546_v47, %v988_v8  ;;  %v977_v24 = vadd.f32 %v975_v14, %v945_v48  ;;  %v3547_v53 = vstv %s3541_s24  ;;  %v3549_v44 = vstv %s3542_s29  ;;  %v1027_v48 = vld [vmem:[#allocation4 + $0x66] sm:$0xff]  ;;  %s3567_s24 = sld [smem:[#allocation58_spill]]  ;;  %s3568_s29 = sld [smem:[#allocation60_spill]] }
 0x19d   : > { %v998_v5 = vmul.f32 %v3547_v53, %v995_v29  ;;  %v3548_v41 = vmov %v3547_v53  ;;  %v1006_v3 = vmul.f32 %v3549_v44, %v1003_v62  ;;  %v985_v26 = vadd.f32 %v983_v25, %v953_v56  ;;  %v1028_v29 = vld [vmem:[#allocation4 + $0x6e] sm:$0xff]  ;;  %v1043_v53 = vld [vmem:[#allocation4 + $0x79] sm:$0xff] }
 0x19e   : > { %v999_v11 = vmul.f32 %v3548_v41, %v996_v33  ;;  %v992_v12 = vadd.f32 %v990_v1, %v960_v28  ;;  %v993_v8 = vadd.f32 %v991_v9, %v961_v20  ;;  %v3552_v32 = vmov %v3549_v44  ;;  %v1036_v33 = vld [vmem:[#allocation4 + $0x80] sm:$0xff]  ;;  %v1035_v28 = vld [vmem:[#allocation4 + $0x78] sm:$0xff] }
 0x19f   : > { %v1007_v54 = vmul.f32 %v3552_v32, %v1004_v58  ;;  %v1000_v62 = vadd.f32 %v998_v5, %v968_v27  ;;  %v1008_v14 = vadd.f32 %v1006_v3, %v976_v2  ;;  %v3555_v56 = vstv %s3550_s27  ;;  %v1051_v2 = vld [vmem:[#allocation4 + $0x7a] sm:$0xff]  ;;  %s3580_s27 = sld [smem:[#allocation61_spill]] }
 0x1a0   : > { %v1001_v49 = vadd.f32 %v999_v11, %v969_v10  ;;  %v1014_v57 = vmul.f32 %v3555_v56, %v1011_v55  ;;  %v3556_v20 = vmov %v3555_v56  ;;  %v3557_v58 = vstv %s3551_s11  ;;  %v1059_v5 = vld [vmem:[#allocation4 + $0x7b] sm:$0xff]  ;;  %v685_v11 = vpop.permute.xlu0 %684  ;;  %v1091_v56 = vld [vmem:[#allocation4 + $0x90] sm:$0xff]  ;;  %s3582_s11 = sld [smem:[#allocation62_spill]] }
 0x1a1   : > { %v1009_v25 = vadd.f32 %v1007_v54, %v977_v24  ;;  %v1015_v37 = vmul.f32 %v3556_v20, %v1012_v42  ;;  %v1022_v1 = vmul.f32 %v3557_v58, %v1019_v59  ;;  %v3558_v47 = vmov %v3557_v58  ;;  %v1067_v55 = vld [vmem:[#allocation4 + $0x7c] sm:$0xff]  ;;  %v687_v24 = vpop.permute.xlu1 %686  ;;  %694 = vst.msk [vmem:[#allocation4 + $0xf0] sm:$0xff] %vm514_vm4, %v685_v11 }
 0x1a2   : > { %v1023_v9 = vmul.f32 %v3558_v47, %v1020_v18  ;;  %v1016_v41 = vadd.f32 %v1014_v57, %v984_v7  ;;  %v3559_v44 = vstv %s3553_s15  ;;  %v3561_v27 = vstv %s3554_s3  ;;  %v1075_v54 = vld [vmem:[#allocation4 + $0x7d] sm:$0xff]  ;;  %695 = vst.msk [vmem:[#allocation4 + $0xf8] sm:$0xff] %vm514_vm4, %v687_v24  ;;  %s3583_s15 = sld [smem:[#allocation63_spill]] }
 0x1a3   : > { %v1030_v50 = vmul.f32 %v3559_v44, %v1027_v48  ;;  %v3560_v32 = vmov %v3559_v44  ;;  %v1039_v10 = vmul.f32 %v3561_v27, %v1036_v33  ;;  %v1017_v3 = vadd.f32 %v1015_v37, %v985_v26  ;;  %v1083_v48 = vld [vmem:[#allocation4 + $0x7e] sm:$0xff] }
 0x1a4   : > { %v1031_v61 = vmul.f32 %v3560_v32, %v1028_v29  ;;  %v1024_v42 = vadd.f32 %v1022_v1, %v992_v12  ;;  %v1025_v59 = vadd.f32 %v1023_v9, %v993_v8  ;;  %v3566_v18 = vmov %v3561_v27  ;;  %v1044_v12 = vld [vmem:[#allocation4 + $0x81] sm:$0xff] }
 0x1a5   : > { %v1038_v7 = vmul.f32 %v3566_v18, %v1035_v28  ;;  %v1032_v29 = vadd.f32 %v1030_v50, %v1000_v62  ;;  %v1041_v57 = vadd.f32 %v1039_v10, %v1009_v25  ;;  %v3569_v26 = vstv %s3562_s18  ;;  %v1052_v44 = vld [vmem:[#allocation4 + $0x82] sm:$0xff]  ;;  %v689_v10 = vpop.permute.xlu0 %688 }
 0x1a6   : > { %v1033_v33 = vadd.f32 %v1031_v61, %v1001_v49  ;;  %v1046_v20 = vmul.f32 %v3569_v26, %v1043_v53  ;;  %v3570_v8 = vstv %s3563_s19  ;;  %v3571_v28 = vstv %s3564_s9  ;;  %v1060_v32 = vld [vmem:[#allocation4 + $0x83] sm:$0xff]  ;;  %v704_v61 = vpop.permute.xlu1 %703  ;;  %696 = vst.msk [vmem:[#allocation4 + $0x100] sm:$0x3f] %vm517_vm5, %v689_v10 }
 0x1a7   : > { %v1040_v37 = vadd.f32 %v1038_v7, %v1008_v14  ;;  %v1054_v58 = vmul.f32 %v3570_v8, %v1051_v2  ;;  %v1062_v1 = vmul.f32 %v3571_v28, %v1059_v5  ;;  %v3572_v47 = vstv %s3565_s21  ;;  %v1068_v27 = vld [vmem:[#allocation4 + $0x84] sm:$0xff]  ;;  %713 = vst.msk [vmem:[#allocation4 + $0x108] sm:$0xff] %vm514_vm4, %v704_v61  ;;  %v1116_v61 = vld [vmem:[#allocation4 + $0x9b] sm:$0xff] }
 0x1a8   : > { %v1070_v9 = vmul.f32 %v3572_v47, %v1067_v55  ;;  %v1048_v24 = vadd.f32 %v1046_v20, %v1016_v41  ;;  %v3573_v11 = vstv %s3567_s24  ;;  %v3574_v49 = vstv %s3432_s25  ;;  %v1076_v50 = vld [vmem:[#allocation4 + $0x85] sm:$0xff]  ;;  %s3591_s25 = sld [smem:[#allocation64_spill]] }
 0x1a9   : > { %v1078_v62 = vmul.f32 %v3573_v11, %v1075_v54  ;;  %v1086_v25 = vmul.f32 %v3574_v49, %v1083_v48  ;;  %v3575_v53 = vstv %s3568_s29  ;;  %v1056_v2 = vadd.f32 %v1054_v58, %v1024_v42  ;;  %v1099_v42 = vld [vmem:[#allocation4 + $0x91] sm:$0xff] }
 0x1aa   : > { %v1094_v14 = vmul.f32 %v3575_v53, %v1091_v56  ;;  %v1064_v5 = vadd.f32 %v1062_v1, %v1032_v29  ;;  %v1072_v55 = vadd.f32 %v1070_v9, %v1040_v37  ;;  %v3576_v18 = vmov %v3569_v26  ;;  %v1084_v26 = vld [vmem:[#allocation4 + $0x86] sm:$0xff]  ;;  %v1100_v29 = vld [vmem:[#allocation4 + $0x99] sm:$0xff]  ;;  %v708_v10 = vpop.permute.xlu1 %707 }
 0x1ab   : > { %v1047_v7 = vmul.f32 %v3576_v18, %v1044_v12  ;;  %v1080_v41 = vadd.f32 %v1078_v62, %v1048_v24  ;;  %v3577_v54 = vmov %v3570_v8  ;;  %v3578_v48 = vmov %v3571_v28  ;;  %v1108_v24 = vld [vmem:[#allocation4 + $0x9a] sm:$0xff]  ;;  %715 = vst.msk [vmem:[#allocation4 + $0x118] sm:$0x3f] %vm517_vm5, %v708_v10 }
 0x1ac   : > { %v1055_v20 = vmul.f32 %v3577_v54, %v1052_v44  ;;  %v1063_v56 = vmul.f32 %v3578_v48, %v1060_v32  ;;  %v3579_v8 = vmov %v3572_v47  ;;  %v1092_v47 = vld [vmem:[#allocation4 + $0x98] sm:$0xff]  ;;  %v1088_v37 = vadd.f32 %v1086_v25, %v1056_v2  ;;  %v706_v25 = vpop.permute.xlu0 %705 }
 0x1ad   : > { %v1071_v28 = vmul.f32 %v3579_v8, %v1068_v27  ;;  %v1096_v12 = vadd.f32 %v1094_v14, %v1064_v5  ;;  %v1049_v58 = vadd.f32 %v1047_v7, %v1017_v3  ;;  %v3581_v1 = vmov %v3573_v11  ;;  %v1107_v11 = vld [vmem:[#allocation4 + $0x92] sm:$0xff]  ;;  %714 = vst.msk [vmem:[#allocation4 + $0x110] sm:$0xff] %vm514_vm4, %v706_v25  ;;  %v1124_v8 = vld [vmem:[#allocation4 + $0x9c] sm:$0xff] }
 0x1ae   : > { %v1079_v9 = vmul.f32 %v3581_v1, %v1076_v50  ;;  %v1115_v62 = vld [vmem:[#allocation4 + $0x93] sm:$0xff]  ;;  %v1057_v44 = vadd.f32 %v1055_v20, %v1025_v59  ;;  %v1065_v32 = vadd.f32 %v1063_v56, %v1033_v33  ;;  %v1087_v53 = vmul.f32 %v3574_v49, %v1084_v26  ;;  %v1140_v49 = vld [vmem:[#allocation4 + $0x9e] sm:$0xff]  ;;  %v725_v25 = vpop.permute.xlu1 %724 }
 0x1af   : > { %v1073_v27 = vadd.f32 %v1071_v28, %v1041_v57  ;;  %v3584_v14 = vstv %s3568_s29  ;;  %v3585_v3 = vstv %s3580_s27  ;;  %v1123_v54 = vld [vmem:[#allocation4 + $0x94] sm:$0xff]  ;;  %v3587_v33 = vstv %s3582_s11  ;;  %733 = vst.msk [vmem:[#allocation4 + $0x128] sm:$0xff] %vm514_vm4, %v725_v25 }
 0x1b0   : > { %v1081_v2 = vadd.f32 %v1079_v9, %v1049_v58  ;;  %v1095_v5 = vmul.f32 %v3584_v14, %v1092_v47  ;;  %v1102_v50 = vmul.f32 %v3585_v3, %v1099_v42  ;;  %v3586_v18 = vmov %v3585_v3  ;;  %v1131_v28 = vld [vmem:[#allocation4 + $0x95] sm:$0xff]  ;;  %v1132_v47 = vld [vmem:[#allocation4 + $0x9d] sm:$0xff]  ;;  %v723_v14 = vpop.permute.xlu0 %722 }
 0x1b1   : > { %v1103_v7 = vmul.f32 %v3586_v18, %v1100_v29  ;;  %v1089_v59 = vadd.f32 %v1087_v53, %v1057_v44  ;;  %v1110_v57 = vmul.f32 %v3587_v33, %v1107_v11  ;;  %v3588_v26 = vmov %v3587_v33  ;;  %v1139_v44 = vld [vmem:[#allocation4 + $0x96] sm:$0xff]  ;;  %732 = vst.msk [vmem:[#allocation4 + $0x120] sm:$0xff] %vm514_vm4, %v723_v14 }
 0x1b2   : > { %v1111_v20 = vmul.f32 %v3588_v26, %v1108_v24  ;;  %v3589_v48 = vstv %s3583_s15  ;;  %v1097_v42 = vadd.f32 %v1095_v5, %v1065_v32  ;;  %v1104_v29 = vadd.f32 %v1102_v50, %v1072_v55 }
 0x1b3   : > { %v1118_v56 = vmul.f32 %v3589_v48, %v1115_v62  ;;  %v1105_v58 = vadd.f32 %v1103_v7, %v1073_v27  ;;  %v3590_v1 = vmov %v3589_v48  ;;  %v1112_v11 = vadd.f32 %v1110_v57, %v1080_v41 }
 0x1b4   : > { %v1119_v9 = vmul.f32 %v3590_v1, %v1116_v61  ;;  %v1113_v53 = vadd.f32 %v1111_v20, %v1081_v2  ;;  %v3592_v10 = vstv %s2508_s1  ;;  %v3594_v26 = vstv %s2513_s30  ;;  %s3634_s1 = sld [smem:[#allocation72_spill]]  ;;  %s3645_s30 = sld [smem:[#allocation75_spill]] }
 0x1b5   : > { %v1120_v24 = vadd.f32 %v1118_v56, %v1088_v37  ;;  %v1126_v62 = vmul.f32 %v3592_v10, %v1123_v54  ;;  %v3593_v18 = vmov %v3592_v10  ;;  %v1134_v32 = vmul.f32 %v3594_v26, %v1131_v28  ;;  %v742_v28 = vpop.permute.xlu1 %741 }
 0x1b6   : > { %v1121_v3 = vadd.f32 %v1119_v9, %v1089_v59  ;;  %v1127_v33 = vmul.f32 %v3593_v18, %v1124_v8  ;;  %v3595_v55 = vmov %v3594_v26  ;;  %v3596_v5 = vstv %s3591_s25  ;;  %751 = vst.msk [vmem:[#allocation4 + $0x138] sm:$0xff] %vm514_vm4, %v742_v28  ;;  %v3602_v26 = vld [vmem:[#allocation86_spill] sm:$0xff] }
 0x1b7   : > { %v1135_v27 = vmul.f32 %v3595_v55, %v1132_v47  ;;  %v1128_v61 = vadd.f32 %v1126_v62, %v1096_v12  ;;  %v1142_v41 = vmul.f32 %v3596_v5, %v1139_v44  ;;  %v3597_v2 = vmov %v3596_v5  ;;  %v727_v47 = vpop.permute.xlu0 %726  ;;  %v1323_v44 = vld [vmem:[#allocation4 + $0xf1] sm:$0xff]  ;;  %v3604_v5 = vld [vmem:[#allocation84_spill] sm:$0xff] }
 0x1b8   : > { %v1143_v37 = vmul.f32 %v3597_v2, %v1140_v49  ;;  %v1152_v50 = vadd.f32 %v2519_v4, %v1120_v24  ;;  %v1129_v7 = vadd.f32 %v1127_v33, %v1097_v42  ;;  %v1136_v54 = vadd.f32 %v1134_v32, %v1104_v29  ;;  %v1316_v42 = vld [vmem:[#allocation4 + $0xf8] sm:$0xff]  ;;  %734 = vst.msk [vmem:[#allocation4 + $0x130] sm:$0x3f] %vm517_vm5, %v727_v47  ;;  %v1315_v29 = vld [vmem:[#allocation4 + $0xf0] sm:$0xff] }
 0x1b9   : > { %v1137_v59 = vadd.f32 %v1135_v27, %v1105_v58  ;;  %v1153_v57 = vadd.f32 %v2532_v13, %v1121_v3  ;;  %v1144_v20 = vadd.f32 %v1142_v41, %v1112_v11  ;;  %v1160_v56 = vadd.f32 %v2536_v15, %v1128_v61  ;;  %v1331_v49 = vld [vmem:[#allocation4 + $0xf2] sm:$0xff]  ;;  %v1371_v61 = vld [vmem:[#allocation4 + $0x108] sm:$0xff]  ;;  %v3605_v41 = vld [vmem:[#allocation88_spill] sm:$0xff] }
 0x1ba   : > { %v1145_v48 = vadd.f32 %v1143_v37, %v1113_v53  ;;  %v1184_v8 = vadd.f32 %v2552_v21, %v1152_v50  ;;  %v1161_v12 = vadd.f32 %v2578_v34, %v1129_v7  ;;  %v1168_v1 = vadd.f32 %v2540_v17, %v1136_v54  ;;  %v746_v53 = vpop.permute.xlu1 %745  ;;  %v1347_v62 = vld [vmem:[#allocation4 + $0xf4] sm:$0xff]  ;;  %v3608_v54 = vld [vmem:[#allocation89_spill] sm:$0xff] }
 0x1bb   : > { %v1169_v9 = vadd.f32 %v2582_v35, %v1137_v59  ;;  %v1185_v4 = vadd.f32 %v2596_v39, %v1153_v57  ;;  %v1176_v13 = vadd.f32 %v2548_v19, %v1144_v20  ;;  %v1192_v21 = vadd.f32 %v2556_v22, %v1160_v56  ;;  %v744_v24 = vpop.permute.xlu0 %743  ;;  %753 = vst.msk [vmem:[#allocation4 + $0x148] sm:$0x3f] %vm517_vm5, %v746_v53  ;;  %v3609_v57 = vld [vmem:[#allocation90_spill] sm:$0xff]  ;;  %v1348_v53 = vld [vmem:[#allocation4 + $0xfc] sm:$0xff] }
 0x1bc   : > { %v1177_v15 = vadd.f32 %v2592_v38, %v1145_v48  ;;  %v1216_v34 = vadd.f32 %v2721_v31, %v1184_v8  ;;  %v1193_v17 = vadd.f32 %v2606_v45, %v1161_v12  ;;  %v1200_v35 = vadd.f32 %v2560_v23, %v1168_v1  ;;  %v1339_v45 = vld [vmem:[#allocation4 + $0xf3] sm:$0xff]  ;;  %752 = vst.msk [vmem:[#allocation4 + $0x140] sm:$0xff] %vm514_vm4, %v744_v24  ;;  %v3612_v8 = vld [vmem:[#allocation92_spill] sm:$0xff] }
 0x1bd   : > { %v1201_v39 = vadd.f32 %v2610_v51, %v1169_v9  ;;  %v1217_v58 = vadd.f32 %v2749_v30, %v1185_v4  ;;  %v1208_v19 = vadd.f32 %v2713_v63, %v1176_v13  ;;  %v3598_v11 = vstv %s3434_s2  ;;  %v3614_v9 = vld [vmem:[#allocation80_spill] sm:$0xff]  ;;  %s3636_s2 = sld [smem:[#allocation73_spill]] }
 0x1be   : > { %v1209_v38 = vadd.f32 %v2717_v16, %v1177_v15  ;;  %v1319_v22 = vmul.f32 %v3598_v11, %v1316_v42  ;;  %v1224_v31 = vadd.f32 %v2725_v52, %v1192_v21  ;;  %v1225_v23 = vadd.f32 %v2753_v6, %v1193_v17  ;;  %v1355_v16 = vld [vmem:[#allocation4 + $0xf5] sm:$0xff] }
 0x1bf   : > { %v1232_v51 = vadd.f32 %v2729_v36, %v1200_v35  ;;  %v1248_v30 = vadd.f32 %v2737_v43, %v1216_v34  ;;  %v3599_v10 = vmov %v3598_v11  ;;  %v1240_v52 = vadd.f32 %v2733_v40, %v1208_v19  ;;  %v1363_v43 = vld [vmem:[#allocation4 + $0xf6] sm:$0xff]  ;;  %v3615_v34 = vld [vmem:[#allocation81_spill] sm:$0xff] }
 0x1c0   : > { %v1318_v63 = vmul.f32 %v3599_v10, %v1315_v29  ;;  %v1256_v25 = vadd.f32 %v2741_v46, %v1224_v31  ;;  %v3600_v6 = vstv %s3435_s17  ;;  %v3601_v36 = vstv %s3436_s28  ;;  %v1324_v42 = vld [vmem:[#allocation4 + $0xf9] sm:$0xff]  ;;  %s3638_s28 = sld [smem:[#allocation74_spill]]  ;;  %s2184_s17 = smov 48  }
 0x1c1   : > { %v1326_v14 = vmul.f32 %v3600_v6, %v1323_v44  ;;  %v1334_v3 = vmul.f32 %v3601_v36, %v1331_v49  ;;  %v1257_v18 = vadd.f32 %v2771_v60, %v1225_v23  ;;  %v1264_v33 = vadd.f32 %v2745_v0, %v1232_v51  ;;  %v3610_v60 = vld [vmem:[#allocation94_spill] sm:$0xff]  ;;  %v1332_v17 = vld [vmem:[#allocation4 + $0xfa] sm:$0xff]  ;;  %v3618_v23 = vld [vmem:[#allocation85_spill] sm:$0xff] }
 0x1c2   : > { %v1280_v32 = vadd.f32 %v3602_v26, %v1248_v30  ;;  %v3603_v55 = vstv %s3437_s26  ;;  %v1272_v40 = vadd.f32 %v3604_v5, %v1240_v52  ;;  %v1288_v46 = vadd.f32 %v3605_v41, %v1256_v25  ;;  %v3616_v49 = vld [vmem:[#allocation82_spill] sm:$0xff]  ;;  %v3617_v11 = vld [vmem:[#allocation83_spill] sm:$0xff] }
 0x1c3   : > { %v1342_v27 = vmul.f32 %v3603_v55, %v1339_v45  ;;  %v3606_v2 = vstv %s2562_s12  ;;  %v3607_v50 = vstv %s2564_s16  ;;  %v1289_v59 = vadd.f32 %v3608_v54, %v1257_v18  ;;  %v1340_v45 = vld [vmem:[#allocation4 + $0xfb] sm:$0xff]  ;;  %v1387_v5 = vld [vmem:[#allocation4 + $0x10a] sm:$0xff]  ;;  %s3670_s12 = sld [smem:[#allocation59_spill]]  ;;  %s2183_s16 = smov 32  }
 0x1c4   : > { %v1350_v37 = vmul.f32 %v3606_v2, %v1347_v62  ;;  %v1358_v7 = vmul.f32 %v3607_v50, %v1355_v16  ;;  %v1296_v20 = vadd.f32 %v3609_v57, %v1264_v33  ;;  %v1312_v48 = vadd.f32 %v3610_v60, %v1280_v32  ;;  %v1364_v10 = vld [vmem:[#allocation4 + $0xfe] sm:$0xff] }
 0x1c5   : > { %v3611_v0 = vstv %s3439_s8  ;;  %v1304_v28 = vadd.f32 %v3612_v8, %v1272_v40  ;;  %v1320_v47 = vadd.f32 %v1318_v63, %v1288_v46  ;;  %v3613_v12 = vstv %s2572_s14  ;;  %v1372_v63 = vld [vmem:[#allocation4 + $0x110] sm:$0xff]  ;;  %v3621_v52 = vld [vmem:[#allocation91_spill] sm:$0xff]  ;;  %s3649_s8 = sld [smem:[#allocation78_spill]]  ;;  %s2186_s14 = smov 80  }
 0x1c6   : > { %v1366_v56 = vmul.f32 %v3611_v0, %v1363_v43  ;;  %v1374_v1 = vmul.f32 %v3613_v12, %v1371_v61  ;;  %v1233_v4 = vadd.f32 %v3614_v9, %v1201_v39  ;;  %v1321_v13 = vadd.f32 %v1319_v22, %v1289_v59  ;;  %v1356_v39 = vld [vmem:[#allocation4 + $0xfd] sm:$0xff]  ;;  %v3623_v43 = vld [vmem:[#allocation93_spill] sm:$0xff]  ;;  %v1388_v40 = vld [vmem:[#allocation4 + $0x112] sm:$0xff] }
 0x1c7   : > { %v1328_v15 = vadd.f32 %v1326_v14, %v1296_v20  ;;  %v1344_v21 = vadd.f32 %v1342_v27, %v1312_v48  ;;  %v1241_v29 = vadd.f32 %v3615_v34, %v1209_v38  ;;  %v1336_v35 = vadd.f32 %v1334_v3, %v1304_v28  ;;  %v1380_v3 = vld [vmem:[#allocation4 + $0x111] sm:$0xff] }
 0x1c8   : > { %v1352_v44 = vadd.f32 %v1350_v37, %v1320_v47  ;;  %v1249_v19 = vadd.f32 %v3616_v49, %v1217_v58  ;;  %v1265_v31 = vadd.f32 %v3617_v11, %v1233_v4  ;;  %v3619_v30 = vmov %v3600_v6  ;;  %v3620_v58 = vld [vmem:[#allocation87_spill] sm:$0xff]  ;;  %v1395_v59 = vld [vmem:[#allocation4 + $0x10b] sm:$0xff] }
 0x1c9   : > { %v1360_v24 = vadd.f32 %v1358_v7, %v1328_v15  ;;  %v1376_v22 = vadd.f32 %v1374_v1, %v1344_v21  ;;  %v1273_v51 = vadd.f32 %v3618_v23, %v1241_v29  ;;  %v1327_v38 = vmul.f32 %v3619_v30, %v1324_v42  ;;  %v3627_v41 = vld [vmem:[#allocation95_spill] sm:$0xff]  ;;  %v1403_v42 = vld [vmem:[#allocation4 + $0x10c] sm:$0xff] }
 0x1ca   : > { %v1368_v62 = vadd.f32 %v1366_v56, %v1336_v35  ;;  %v1281_v16 = vadd.f32 %v3620_v58, %v1249_v19  ;;  %v1297_v25 = vadd.f32 %v3621_v52, %v1265_v31  ;;  %v3622_v6 = vmov %v3601_v36  ;;  %v1379_v36 = vld [vmem:[#allocation4 + $0x109] sm:$0xff]  ;;  %v1396_v8 = vld [vmem:[#allocation4 + $0x113] sm:$0xff]  ;;  %v1427_v52 = vld [vmem:[#allocation4 + $0x120] sm:$0xff] }
 0x1cb   : > { %v1335_v14 = vmul.f32 %v3622_v6, %v1332_v17  ;;  %v1305_v18 = vadd.f32 %v3623_v43, %v1273_v51  ;;  %v3624_v33 = vmov %v3603_v55  ;;  %v3625_v32 = vmov %v3606_v2  ;;  %v1404_v15 = vld [vmem:[#allocation4 + $0x114] sm:$0xff]  ;;  %v1428_v51 = vld [vmem:[#allocation4 + $0x128] sm:$0xff] }
 0x1cc   : > { %v1343_v26 = vmul.f32 %v3624_v33, %v1340_v45  ;;  %v1351_v55 = vmul.f32 %v3625_v32, %v1348_v53  ;;  %v3626_v27 = vmov %v3607_v50  ;;  %v1313_v46 = vadd.f32 %v3627_v41, %v1281_v16  ;;  %v1411_v21 = vld [vmem:[#allocation4 + $0x10d] sm:$0xff]  ;;  %v1412_v49 = vld [vmem:[#allocation4 + $0x115] sm:$0xff]  ;;  %v1443_v33 = vld [vmem:[#allocation4 + $0x122] sm:$0xff] }
 0x1cd   : > { %v1359_v61 = vmul.f32 %v3626_v27, %v1356_v39  ;;  %v1329_v2 = vadd.f32 %v1327_v38, %v1297_v25  ;;  %v3628_v37 = vmov %v3611_v0  ;;  %v3629_v7 = vmov %v3613_v12  ;;  %v1419_v19 = vld [vmem:[#allocation4 + $0x10e] sm:$0xff]  ;;  %v1420_v11 = vld [vmem:[#allocation4 + $0x116] sm:$0xff]  ;;  %v1475_v41 = vld [vmem:[#allocation4 + $0x126] sm:$0xff] }
 0x1ce   : > { %v1367_v50 = vmul.f32 %v3628_v37, %v1364_v10  ;;  %v1375_v54 = vmul.f32 %v3629_v7, %v1372_v63  ;;  %v1337_v57 = vadd.f32 %v1335_v14, %v1305_v18  ;;  %v1353_v20 = vadd.f32 %v1351_v55, %v1321_v13  ;;  %v1435_v18 = vld [vmem:[#allocation4 + $0x121] sm:$0xff] }
 0x1cf   : > { %v3630_v60 = vstv %s2584_s6  ;;  %v1345_v28 = vadd.f32 %v1343_v26, %v1313_v46  ;;  %v1361_v47 = vadd.f32 %v1359_v61, %v1329_v2  ;;  %v3632_v12 = vstv %s2586_s5  ;;  %s3646_s5 = sld [smem:[#allocation76_spill]]  ;;  %s3647_s6 = sld [smem:[#allocation77_spill]] }
 0x1d0   : > { %v1382_v48 = vmul.f32 %v3630_v60, %v1379_v36  ;;  %v3631_v0 = vmov %v3630_v60  ;;  %v1390_v1 = vmul.f32 %v3632_v12, %v1387_v5  ;;  %v3633_v9 = vmov %v3632_v12  ;;  %v1459_v5 = vld [vmem:[#allocation4 + $0x124] sm:$0xff] }
 0x1d1   : > { %v1383_v56 = vmul.f32 %v3631_v0, %v1380_v3  ;;  %v1391_v4 = vmul.f32 %v3633_v9, %v1388_v40  ;;  %v1369_v34 = vadd.f32 %v1367_v50, %v1337_v57  ;;  %v3635_v17 = vstv %s3441_s10  ;;  %v1467_v40 = vld [vmem:[#allocation4 + $0x125] sm:$0xff]  ;;  %s3650_s10 = sld [smem:[#allocation79_spill]] }
 0x1d2   : > { %v1384_v13 = vadd.f32 %v1382_v48, %v1352_v44  ;;  %v1398_v35 = vmul.f32 %v3635_v17, %v1395_v59  ;;  %v1377_v31 = vadd.f32 %v1375_v54, %v1345_v28  ;;  %v1392_v45 = vadd.f32 %v1390_v1, %v1360_v24  ;;  %v1483_v54 = vld [vmem:[#allocation4 + $0x138] sm:$0xff]  ;;  %v1452_v28 = vld [vmem:[#allocation4 + $0x12b] sm:$0xff] }
 0x1d3   : > { %v1385_v29 = vadd.f32 %v1383_v56, %v1353_v20  ;;  %v1393_v53 = vadd.f32 %v1391_v4, %v1361_v47  ;;  %v3637_v39 = vmov %v3635_v17  ;;  %v3639_v38 = vstv %s3442_s20  ;;  %v1436_v56 = vld [vmem:[#allocation4 + $0x129] sm:$0xff]  ;;  %s2187_s20 = smov 96  }
 0x1d4   : > { %v1399_v23 = vmul.f32 %v3637_v39, %v1396_v8  ;;  %v1400_v30 = vadd.f32 %v1398_v35, %v1368_v62  ;;  %v1406_v10 = vmul.f32 %v3639_v38, %v1403_v42  ;;  %v3640_v44 = vmov %v3639_v38  ;;  %v1451_v62 = vld [vmem:[#allocation4 + $0x123] sm:$0xff]  ;;  %v1491_v38 = vld [vmem:[#allocation4 + $0x139] sm:$0xff] }
 0x1d5   : > { %v1407_v63 = vmul.f32 %v3640_v44, %v1404_v15  ;;  %v3641_v58 = vstv %s3634_s1  ;;  %v3643_v36 = vstv %s3636_s2  ;;  %v3648_v27 = vstv %s3638_s28  ;;  %v1444_v8 = vld [vmem:[#allocation4 + $0x12a] sm:$0xff] }
 0x1d6   : > { %v1414_v16 = vmul.f32 %v3641_v58, %v1411_v21  ;;  %v1401_v25 = vadd.f32 %v1399_v23, %v1369_v34  ;;  %v3642_v6 = vmov %v3641_v58  ;;  %v1422_v3 = vmul.f32 %v3643_v36, %v1419_v19  ;;  %v1460_v21 = vld [vmem:[#allocation4 + $0x12c] sm:$0xff] }
 0x1d7   : > { %v1415_v14 = vmul.f32 %v3642_v6, %v1412_v49  ;;  %v3644_v24 = vmov %v3643_v36  ;;  %v1408_v26 = vadd.f32 %v1406_v10, %v1376_v22  ;;  %v1409_v32 = vadd.f32 %v1407_v63, %v1377_v31  ;;  %v1468_v49 = vld [vmem:[#allocation4 + $0x12d] sm:$0xff]  ;;  %v1500_v6 = vld [vmem:[#allocation4 + $0x142] sm:$0xff] }
 0x1d8   : > { %v1423_v43 = vmul.f32 %v3644_v24, %v1420_v11  ;;  %v1416_v55 = vadd.f32 %v1414_v16, %v1384_v13  ;;  %v1431_v61 = vmul.f32 %v3648_v27, %v1428_v51  ;;  %v1424_v2 = vadd.f32 %v1422_v3, %v1392_v45  ;;  %v1476_v51 = vld [vmem:[#allocation4 + $0x12e] sm:$0xff] }
 0x1d9   : > { %v1417_v46 = vadd.f32 %v1415_v14, %v1385_v29  ;;  %v3651_v50 = vmov %v3648_v27  ;;  %v3652_v57 = vstv %s3645_s30  ;;  %v3653_v20 = vstv %s3646_s5 }
 0x1da   : > { %v1425_v37 = vadd.f32 %v1423_v43, %v1393_v53  ;;  %v1430_v7 = vmul.f32 %v3651_v50, %v1427_v52  ;;  %v1433_v59 = vadd.f32 %v1431_v61, %v1401_v25  ;;  %v1438_v22 = vmul.f32 %v3652_v57, %v1435_v18  ;;  %v1492_v52 = vld [vmem:[#allocation4 + $0x141] sm:$0xff] }
 0x1db   : > { %v1446_v60 = vmul.f32 %v3653_v20, %v1443_v33  ;;  %v3654_v48 = vstv %s3647_s6  ;;  %v3655_v12 = vstv %s3649_s8  ;;  %v3656_v9 = vstv %s3650_s10  ;;  %v1499_v25 = vld [vmem:[#allocation4 + $0x13a] sm:$0xff] }
 0x1dc   : > { %v1454_v0 = vmul.f32 %v3654_v48, %v1451_v62  ;;  %v1432_v47 = vadd.f32 %v1430_v7, %v1400_v30  ;;  %v1462_v1 = vmul.f32 %v3655_v12, %v1459_v5  ;;  %v1470_v4 = vmul.f32 %v3656_v9, %v1467_v40  ;;  %v1484_v30 = vld [vmem:[#allocation4 + $0x140] sm:$0xff] }
 0x1dd   : > { %v3657_v42 = vstv %s2645_s4  ;;  %v1440_v34 = vadd.f32 %v1438_v22, %v1408_v26  ;;  %v1448_v13 = vadd.f32 %v1446_v60, %v1416_v55  ;;  %v3658_v17 = vstv %s2647_s7  ;;  %v1507_v18 = vld [vmem:[#allocation4 + $0x13b] sm:$0xff]  ;;  %v1508_v40 = vld [vmem:[#allocation4 + $0x143] sm:$0xff]  ;;  %s3671_s4 = sld [smem:[#allocation65_spill]]  ;;  %s2182_s7 = smov 16  }
 0x1de   : > { %v1478_v15 = vmul.f32 %v3657_v42, %v1475_v41  ;;  %v1456_v29 = vadd.f32 %v1454_v0, %v1424_v2  ;;  %v1486_v35 = vmul.f32 %v3658_v17, %v1483_v54  ;;  %v1464_v19 = vadd.f32 %v1462_v1, %v1432_v47  ;;  %v1515_v54 = vld [vmem:[#allocation4 + $0x13c] sm:$0xff] }
 0x1df   : > { %v3659_v11 = vmov %v3652_v57  ;;  %v3660_v45 = vmov %v3653_v20  ;;  %v3661_v39 = vmov %v3654_v48  ;;  %v1472_v10 = vadd.f32 %v1470_v4, %v1440_v34  ;;  %v1523_v57 = vld [vmem:[#allocation4 + $0x13d] sm:$0xff] }
 0x1e0   : > { %v1439_v31 = vmul.f32 %v3659_v11, %v1436_v56  ;;  %v1447_v53 = vmul.f32 %v3660_v45, %v1444_v8  ;;  %v1455_v23 = vmul.f32 %v3661_v39, %v1452_v28  ;;  %v1480_v44 = vadd.f32 %v1478_v15, %v1448_v13  ;;  %v1524_v56 = vld [vmem:[#allocation4 + $0x145] sm:$0xff] }
 0x1e1   : > { %v1488_v63 = vadd.f32 %v1486_v35, %v1456_v29  ;;  %v3662_v58 = vmov %v3655_v12  ;;  %v3663_v24 = vmov %v3656_v9  ;;  %v3664_v62 = vmov %v3657_v42  ;;  %v1531_v8 = vld [vmem:[#allocation4 + $0x13e] sm:$0xff]  ;;  %v1532_v28 = vld [vmem:[#allocation4 + $0x146] sm:$0xff] }
 0x1e2   : > { %v1463_v16 = vmul.f32 %v3662_v58, %v1460_v21  ;;  %v1441_v14 = vadd.f32 %v1439_v31, %v1409_v32  ;;  %v1449_v36 = vadd.f32 %v1447_v53, %v1417_v46  ;;  %v1457_v3 = vadd.f32 %v1455_v23, %v1425_v37 }
 0x1e3   : > { %v1471_v43 = vmul.f32 %v3663_v24, %v1468_v49  ;;  %v1479_v26 = vmul.f32 %v3664_v62, %v1476_v51  ;;  %v3665_v55 = vmov %v3658_v17  ;;  %v3666_v61 = vstv %s2653_s0  ;;  %s3680_s0 = sld [smem:[#allocation10_spill]] }
 0x1e4   : > { %v1465_v33 = vadd.f32 %v1463_v16, %v1433_v59  ;;  %v1487_v27 = vmul.f32 %v3665_v55, %v1484_v30  ;;  %v1494_v5 = vmul.f32 %v3666_v61, %v1491_v38  ;;  %v3667_v2 = vmov %v3666_v61  ;;  %v1516_v59 = vld [vmem:[#allocation4 + $0x144] sm:$0xff] }
 0x1e5   : > { %v1473_v41 = vadd.f32 %v1471_v43, %v1441_v14  ;;  %v1495_v50 = vmul.f32 %v3667_v2, %v1492_v52  ;;  %v3668_v7 = vstv %s2655_s22  ;;  %v1481_v22 = vadd.f32 %v1479_v26, %v1449_v36  ;;  %s2188_s22 = smov 112  }
 0x1e6   : > { %v1502_v32 = vmul.f32 %v3668_v7, %v1499_v25  ;;  %v3669_v46 = vmov %v3668_v7  ;;  %v1489_v20 = vadd.f32 %v1487_v27, %v1457_v3  ;;  %v1496_v60 = vadd.f32 %v1494_v5, %v1464_v19 }
 0x1e7   : > { %v1503_v37 = vmul.f32 %v3669_v46, %v1500_v6  ;;  %v3672_v48 = vstv %s2663_s13  ;;  %v1497_v47 = vadd.f32 %v1495_v50, %v1465_v33  ;;  %v3674_v42 = vstv %s2665_s23  ;;  %s2185_s13 = smov 64  }
 0x1e8   : > { %v1510_v0 = vmul.f32 %v3672_v48, %v1507_v18  ;;  %v1504_v12 = vadd.f32 %v1502_v32, %v1472_v10  ;;  %v3673_v9 = vmov %v3672_v48  ;;  %v1518_v15 = vmul.f32 %v3674_v42, %v1515_v54 }
 0x1e9   : > { %v1505_v1 = vadd.f32 %v1503_v37, %v1473_v41  ;;  %v1511_v4 = vmul.f32 %v3673_v9, %v1508_v40  ;;  %v3675_v21 = vmov %v3674_v42  ;;  %v3676_v13 = vstv %s3670_s12 }
 0x1ea   : > { %v1519_v34 = vmul.f32 %v3675_v21, %v1516_v59  ;;  %v1526_v29 = vmul.f32 %v3676_v13, %v1523_v57  ;;  %v3677_v35 = vmov %v3676_v13  ;;  %v3678_v19 = vstv %s3671_s4 }
 0x1eb   : > { %v1513_v17 = vadd.f32 %v1511_v4, %v1481_v22  ;;  %v1527_v49 = vmul.f32 %v3677_v35, %v1524_v56  ;;  %v1534_v11 = vmul.f32 %v3678_v19, %v1531_v8  ;;  %v3679_v31 = vmov %v3678_v19 }
 0x1ec   : > { %v1535_v45 = vmul.f32 %v3679_v31, %v1532_v28  ;;  %v1512_v53 = vadd.f32 %v1510_v0, %v1480_v44  ;;  %v1520_v39 = vadd.f32 %v1518_v15, %v1488_v63  ;;  %v1521_v23 = vadd.f32 %v1519_v34, %v1489_v20 }
 0x1ed   : > { %v1528_v51 = vadd.f32 %v1526_v29, %v1496_v60  ;;  %v1529_v30 = vadd.f32 %v1527_v49, %v1497_v47  ;;  %v1536_v38 = vadd.f32 %v1534_v11, %v1504_v12  ;;  %v2181_v62 = vmov 1966171168  }
 0x1ee   : > { %v1537_v10 = vadd.f32 %v1535_v45, %v1505_v1  ;;  %v1540_v58 = vadd.f32 %v1520_v39, %v1512_v53  ;;  %v1541_v16 = vadd.f32 %v1521_v23, %v1513_v17  ;;  %v1570_v26 = vunpack.c.l.s4 %v2181_v62 }
 0x1ef   : > { %v1538_v52 = vadd.f32 %v1536_v38, %v1528_v51  ;;  %v3681_v5 = vlaneseq }
 0x1f0   : > { %v1539_v25 = vadd.f32 %v1537_v10, %v1529_v30  ;;  %v1571_v61 = vunpack.c.0.s8 %v1570_v26 }
 0x1f1   : > { %v1542_v6 = vadd.f32 %v1540_v58, %v1538_v52  ;;  %v1573_v40 = vshrl.u32 %v3681_v5, 7  ;;  %vm1557_vm6 = vcmp.lt.s32.totalorder %v3681_v5, 16  ;;  %vm1579_vm7 = vcmp.ge.s32.totalorder %v3681_v5, 16 }
 0x1f2   : > { %v1543_v14 = vadd.f32 %v1541_v16, %v1539_v25  ;;  %vm1580_vm8 = vcmp.lt.s32.totalorder %v3681_v5, 32  ;;  %vm1602_vm10 = vcmp.ge.s32.totalorder %v3681_v5, 32  ;;  %vm1603_vm11 = vcmp.lt.s32.totalorder %v3681_v5, 48 }
 0x1f3   : > { %v1544_v36 = vsub.f32 0.0, %v1542_v6  ;;  %v1574_v41 = vsub.s32 %v1571_v61, %v1573_v40  ;;  %vm1581_vm9 = vmand %vm1579_vm7, %vm1580_vm8  ;;  %vm1625_vm13 = vcmp.ge.s32.totalorder %v3681_v5, 48  ;;  %vm1626_vm14 = vcmp.lt.s32.totalorder %v3681_v5, 64 }
 0x1f4   : > { %v1545_v3 = vsub.f32 0.0, %v1543_v14  ;;  %vm1604_vm12 = vmand %vm1602_vm10, %vm1603_vm11  ;;  %vm1648_vm0 = vcmp.ge.s32.totalorder %v3681_v5, 64  ;;  %vm1649_vm1 = vcmp.lt.s32.totalorder %v3681_v5, 80  ;;  %vm1671_vm3 = vcmp.ge.s32.totalorder %v3681_v5, 80 }
 0x1f5   : > { %v1546_v24 = vmul.f32 1.442695, %v1544_v36  ;;  %vm1627_vm15 = vmand %vm1625_vm13, %vm1626_vm14  ;;  %vm1695_vm7 = vcmp.lt.s32.totalorder %v3681_v5, 112  ;;  %vm1718_vm10 = vcmp.lt.s32.totalorder %v3681_v5, 128 }
 0x1f6   : > { %v1548_v43 = vmul.f32 1.442695, %v1545_v3  ;;  %vm1650_vm2 = vmand %vm1648_vm0, %vm1649_vm1 }
 0x1f7   : > { %2130 = vpow2.f32 %v1546_v24 }
 0x1f8   : > { %2132 = vpow2.f32 %v1548_v43 }
 0x201   : > { %v2131_v18 = vpop.eup %2130 }
 0x202   : > { %v2133_v44 = vpop.eup %2132  ;;  %v1550_v63 = vadd.f32 1.0, %v2131_v18 }
 0x203   : > { %v1551_v33 = vadd.f32 1.0, %v2133_v44 }
 0x204   : > { %2134 = vrcp.f32 %v1550_v63 }
 0x205   : > { %2136 = vrcp.f32 %v1551_v33 }
 0x20e   : > { %v2135_v55 = vpop.eup %2134 }
 0x20f   : > { %v2137_v27 = vpop.eup %2136  ;;  %1554 = vst.msk [vmem:[#allocation5] sm:$0xff] %vm514_vm4, %v2135_v55 }
 0x210   : > { %1555 = vst.msk [vmem:[#allocation5 + $0x8] sm:$0xff] %vm514_vm4, %v2137_v27  ;;  %vm1672_vm4 = vcmp.lt.s32.totalorder %v3681_v5, 96 }
 0x211   : > { %vm1673_vm5 = vmand %vm1671_vm3, %vm1672_vm4 }
 0x216   : > { %v2071_v2 = vld.sshfl [vmem:[#allocation5 + $0x1] sm:$0x1 pattern:$0x75316420]  ;;  %v1556_v50 = vld [vmem:[#allocation5] sm:$0x1] }
 0x217   : > { %v1575_v7 = vrot.slane %v2071_v2, %v1574_v41  ;;  %v2078_v32 = vld.sshfl [vmem:[#allocation5 + $0x9] sm:$0x1 pattern:$0x75316420]  ;;  %1559 = vst.msk [vmem:[%s3680_s0] sm:$0x1] %vm1557_vm6, %v1556_v50 }
 0x218   : > { %v1721_v46 = vld [vmem:[#allocation5 + $0x8] sm:$0x1]  ;;  %v1738_v37 = vrot.slane %v2078_v32, %v1574_v41  ;;  %v2072_v54 = vld.sshfl [vmem:[#allocation5 + $0x2] sm:$0x1 pattern:$0x75316420] }
 0x219   : > { %1722 = vst.msk [vmem:[%s3680_s0 + $0x1] sm:$0x1] %vm1557_vm6, %v1721_v46  ;;  %1576 = vrot.lane.b32.xlu0 %v1575_v7, %s2182_s7  ;;  %v2079_v59 = vld.sshfl [vmem:[#allocation5 + $0xa] sm:$0x1 pattern:$0x75316420]  ;;  %v1598_v57 = vrot.slane %v2072_v54, %v1574_v41 }
 0x21a   : > { %1739 = vrot.lane.b32.xlu1 %v1738_v37, %s2182_s7  ;;  %v1758_v22 = vrot.slane %v2079_v59, %v1574_v41  ;;  %v2073_v20 = vld.sshfl [vmem:[#allocation5 + $0x3] sm:$0x1 pattern:$0x75316420]  ;;  %vm1694_vm6 = vcmp.ge.s32.totalorder %v3681_v5, 96 }
 0x21b   : > { %v2080_v60 = vld.sshfl [vmem:[#allocation5 + $0xb] sm:$0x1 pattern:$0x75316420]  ;;  %v1621_v48 = vrot.slane %v2073_v20, %v1574_v41  ;;  %vm1696_vm8 = vmand %vm1694_vm6, %vm1695_vm7 }
 0x21c   : > { %v1778_v0 = vrot.slane %v2080_v60, %v1574_v41  ;;  %v2074_v56 = vld.sshfl [vmem:[#allocation5 + $0x4] sm:$0x1 pattern:$0x75316420] }
 0x21d   : > { %1599 = vrot.lane.b32.xlu0 %v1598_v57, %s2183_s16  ;;  %v2081_v8 = vld.sshfl [vmem:[#allocation5 + $0xc] sm:$0x1 pattern:$0x75316420]  ;;  %v1644_v28 = vrot.slane %v2074_v56, %v1574_v41 }
 0x21e   : > { %1759 = vrot.lane.b32.xlu1 %v1758_v22, %s2183_s16  ;;  %v1798_v47 = vrot.slane %v2081_v8, %v1574_v41  ;;  %v2075_v12 = vld.sshfl [vmem:[#allocation5 + $0x5] sm:$0x1 pattern:$0x75316420] }
 0x21f   : > { %v2082_v1 = vld.sshfl [vmem:[#allocation5 + $0xd] sm:$0x1 pattern:$0x75316420]  ;;  %v1667_v9 = vrot.slane %v2075_v12, %v1574_v41 }
 0x220   : > { %v1818_v4 = vrot.slane %v2082_v1, %v1574_v41  ;;  %v2076_v42 = vld.sshfl [vmem:[#allocation5 + $0x6] sm:$0x1 pattern:$0x75316420] }
 0x221   : > { %1622 = vrot.lane.b32.xlu0 %v1621_v48, %s2184_s17  ;;  %v2083_v15 = vld.sshfl [vmem:[#allocation5 + $0xe] sm:$0x1 pattern:$0x75316420]  ;;  %v1690_v21 = vrot.slane %v2076_v42, %v1574_v41 }
 0x222   : > { %1779 = vrot.lane.b32.xlu1 %v1778_v0, %s2184_s17  ;;  %v1838_v34 = vrot.slane %v2083_v15, %v1574_v41  ;;  %v2077_v13 = vld.sshfl [vmem:[#allocation5 + $0x7] sm:$0x1 pattern:$0x75316420] }
 0x223   : > { %v2084_v29 = vld.sshfl [vmem:[#allocation5 + $0xf] sm:$0x1 pattern:$0x75316420]  ;;  %v1713_v17 = vrot.slane %v2077_v13, %v1574_v41 }
 0x224   : > { %v1858_v35 = vrot.slane %v2084_v29, %v1574_v41 }
 0x225   : > { %1645 = vrot.lane.b32.xlu0 %v1644_v28, %s2185_s13 }
 0x226   : > { %1799 = vrot.lane.b32.xlu1 %v1798_v47, %s2185_s13 }
 0x229   : > { %1668 = vrot.lane.b32.xlu0 %v1667_v9, %s2186_s14 }
 0x22a   : > { %1819 = vrot.lane.b32.xlu1 %v1818_v4, %s2186_s14 }
 0x22d   : > { %1691 = vrot.lane.b32.xlu0 %v1690_v21, %s2187_s20 }
 0x22e   : > { %1839 = vrot.lane.b32.xlu1 %v1838_v34, %s2187_s20 }
 0x231   : > { %1714 = vrot.lane.b32.xlu0 %v1713_v17, %s2188_s22 }
 0x232   : > { %1859 = vrot.lane.b32.xlu1 %v1858_v35, %s2188_s22 }
 0x28b   : > { %v1577_v49 = vpop.permute.xlu0 %1576 }
 0x28c   : > { %1582 = vst.msk [vmem:[%s3680_s0] sm:$0x1] %vm1581_vm9, %v1577_v49  ;;  %v1740_v19 = vpop.permute.xlu1 %1739 }
 0x28d   : > { %1742 = vst.msk [vmem:[%s3680_s0 + $0x1] sm:$0x1] %vm1581_vm9, %v1740_v19  ;;  %vm1717_vm9 = vcmp.ge.s32.totalorder %v3681_v5, 112 }
 0x28e   : > { %vm1719_vm11 = vmand %vm1717_vm9, %vm1718_vm10 }
 0x28f   : > { %v1600_v11 = vpop.permute.xlu0 %1599 }
 0x290   : > { %1605 = vst.msk [vmem:[%s3680_s0] sm:$0x1] %vm1604_vm12, %v1600_v11  ;;  %v1760_v31 = vpop.permute.xlu1 %1759 }
 0x291   : > { %1762 = vst.msk [vmem:[%s3680_s0 + $0x1] sm:$0x1] %vm1604_vm12, %v1760_v31 }
 0x293   : > { %v1623_v45 = vpop.permute.xlu0 %1622 }
 0x294   : > { %1628 = vst.msk [vmem:[%s3680_s0] sm:$0x1] %vm1627_vm15, %v1623_v45  ;;  %v1780_v53 = vpop.permute.xlu1 %1779 }
 0x295   : > { %1782 = vst.msk [vmem:[%s3680_s0 + $0x1] sm:$0x1] %vm1627_vm15, %v1780_v53 }
 0x297   : > { %v1646_v39 = vpop.permute.xlu0 %1645 }
 0x298   : > { %1651 = vst.msk [vmem:[%s3680_s0] sm:$0x1] %vm1650_vm2, %v1646_v39  ;;  %v1800_v23 = vpop.permute.xlu1 %1799 }
 0x299   : > { %1802 = vst.msk [vmem:[%s3680_s0 + $0x1] sm:$0x1] %vm1650_vm2, %v1800_v23 }
 0x29b   : > { %v1669_v51 = vpop.permute.xlu0 %1668 }
 0x29c   : > { %1674 = vst.msk [vmem:[%s3680_s0] sm:$0x1] %vm1673_vm5, %v1669_v51  ;;  %v1820_v30 = vpop.permute.xlu1 %1819 }
 0x29d   : > { %1822 = vst.msk [vmem:[%s3680_s0 + $0x1] sm:$0x1] %vm1673_vm5, %v1820_v30 }
 0x29f   : > { %v1692_v38 = vpop.permute.xlu0 %1691 }
 0x2a0   : > { %1697 = vst.msk [vmem:[%s3680_s0] sm:$0x1] %vm1696_vm8, %v1692_v38  ;;  %v1840_v10 = vpop.permute.xlu1 %1839 }
 0x2a1   : > { %1842 = vst.msk [vmem:[%s3680_s0 + $0x1] sm:$0x1] %vm1696_vm8, %v1840_v10 }
 0x2a3   : > { %v1715_v58 = vpop.permute.xlu0 %1714 }
 0x2a4   : > { %1720 = vst.msk [vmem:[%s3680_s0] sm:$0x1] %vm1719_vm11, %v1715_v58  ;;  %v1860_v16 = vpop.permute.xlu1 %1859 }
 0x2a5   : > { %1862 = vst.msk [vmem:[%s3680_s0 + $0x1] sm:$0x1] %vm1719_vm11, %v1860_v16 }
 0x2a6 PF: > { %s3682_s23 = sld [smem:[#allocation9_spill]] }
 0x2ac   : > { %s13_s9 = sadd.s32 1, %s3682_s23  }
 0x2ad   : > { %p10_p2 = scmp.ge.s32.totalorder %s13_s9, 4  }
 0x2af   :  { %12 = sbr.rel (!%p10_p2) target bundleno = 5 (0x5), region = 85 }
 0x2b6   :  { %1882 = vsyncpa [#allocation7], 1 }
 0x2b7   :  { %1884 = vsyncpa [#allocation7 + $0x1], 1 }

</bundles_post_ra>
